<compile_context>
chip_gen: v7x
topology: tpu7x:2x2x1
jax: 0.10.0
libtpu: 0.0.40
codegen_flags: <defaults>
</compile_context>

<pallas_src>
import functools

import jax
import jax.numpy as jnp
from jax.experimental import pallas as pl
from jax.experimental.pallas import tpu as pltpu

# Hyperparameters implied by the PyTorch module (module-level globals there).
LATENT_SIZE = 16
CONDITION_SIZE = 8
FEATURE_MAP_SIZE = 8
CHANNELS = 3
NUM_CONDITIONS = 4
BN_EPS = 1e-5
KSIZE = 4


# ---------------------------------------------------------------------------
# Pallas kernel: per-phase matmuls + joint train-mode BatchNorm + activation.
#   p_ref : (n_par, K, M)    bf16 patches, M = N*H*W on the lane axis
#   w_ref : (n_par, Cout, K) bf16 weight slabs
#   g_ref, b_ref : (Cout, 1) f32 BatchNorm affine params
#   o_ref : (n_par, Cout, M) f32
# ---------------------------------------------------------------------------
def _fused_layer_kernel(p_ref, w_ref, g_ref, b_ref, o_ref, *, n_par, use_bn, act):
    ys = [jnp.dot(w_ref[p], p_ref[p], preferred_element_type=jnp.float32)
          for p in range(n_par)]

    scale = shift = None
    if use_bn:
        # Exact batch statistics over all phases (= every one of the
        # N*Hout*Wout output pixels) per channel: one sum / sum-of-squares
        # pass, then a single fused scale/shift applied below.
        m_cols = ys[0].shape[1]
        inv_cnt = 1.0 / float(n_par * m_cols)
        s = ys[0].sum(axis=1, keepdims=True)
        ss = (ys[0] * ys[0]).sum(axis=1, keepdims=True)
        for y in ys[1:]:
            s = s + y.sum(axis=1, keepdims=True)
            ss = ss + (y * y).sum(axis=1, keepdims=True)
        mean = s * inv_cnt
        var = jnp.maximum(ss * inv_cnt - mean * mean, 0.0)
        scale = g_ref[...] * jax.lax.rsqrt(var + BN_EPS)    # (Cout, 1)
        shift = b_ref[...] - mean * scale                   # (Cout, 1)

    for p in range(n_par):
        y = ys[p]
        if use_bn:
            y = y * scale + shift
        y = jnp.maximum(y, 0.0) if act == "relu" else jnp.tanh(y)
        o_ref[p] = y


def _fused_layer_call(patches, wslab, gamma, beta, *, use_bn, act):
    n_par, kc, m = patches.shape
    cout = wslab.shape[1]
    kernel = functools.partial(_fused_layer_kernel, n_par=n_par,
                               use_bn=use_bn, act=act)
    return pl.pallas_call(
        kernel,
        out_shape=jax.ShapeDtypeStruct((n_par, cout, m), jnp.float32),
        grid=(1,),
        in_specs=[
            pl.BlockSpec((n_par, kc, m), lambda i: (0, 0, 0)),
            pl.BlockSpec((n_par, cout, kc), lambda i: (0, 0, 0)),
            pl.BlockSpec((cout, 1), lambda i: (0, 0)),
            pl.BlockSpec((cout, 1), lambda i: (0, 0)),
        ],
        out_specs=pl.BlockSpec((n_par, cout, m), lambda i: (0, 0, 0)),
        compiler_params=pltpu.CompilerParams(dimension_semantics=("arbitrary",)),
    )(patches, wslab, gamma, beta)


# ---------------------------------------------------------------------------
# XLA-side patch / weight-slab construction (pure data movement, tiny tensors).
# ---------------------------------------------------------------------------
def _stride1_patches(x, w_pt):
    # ConvTranspose2d(stride=1, pad=0, K=4): regular conv on the (K-1)-padded
    # input with the spatially flipped kernel (only used on the 1x1 input).
    N, Cin, H, W = x.shape
    Cout = w_pt.shape[1]
    Hout, Wout = H + KSIZE - 1, W + KSIZE - 1
    xp = jnp.pad(x, ((0, 0), (0, 0),
                     (KSIZE - 1, KSIZE - 1), (KSIZE - 1, KSIZE - 1)))
    taps = jnp.stack(
        [xp[:, :, kh:kh + Hout, kw:kw + Wout]
         for kh in range(KSIZE) for kw in range(KSIZE)], axis=0)  # (16,N,Cin,Ho,Wo)
    patches = taps.transpose(0, 2, 1, 3, 4).reshape(KSIZE * KSIZE * Cin,
                                                    N * Hout * Wout)
    wslab = (w_pt[:, :, ::-1, ::-1]                 # (Cin, Cout, kh, kw) flipped
             .transpose(1, 2, 3, 0)                 # (Cout, kh, kw, Cin)
             .reshape(Cout, KSIZE * KSIZE * Cin))
    return patches[None], wslab[None], (Hout, Wout)


def _subpixel_patches(x, w_pt):
    # ConvTranspose2d(stride=2, pad=1, K=4): output phase (po, pw), i.e.
    # oh = 2u+po, ow = 2v+pw, is a 2x2 conv of the 1-padded input with the
    # matching 2x2 sub-kernel -> no zero-inserted (structurally zero) FLOPs.
    N, Cin, H, W = x.shape
    Cout = w_pt.shape[1]
    xp = jnp.pad(x, ((0, 0), (0, 0), (1, 1), (1, 1)))
    patches, wslabs = [], []
    for po in (0, 1):
        for pw in (0, 1):
            taps = jnp.stack(
                [xp[:, :, po + a:po + a + H, pw + b:pw + b + W]
                 for a in (0, 1) for b in (0, 1)], axis=0)       # (4,N,Cin,H,W)
            patches.append(
                taps.transpose(0, 2, 1, 3, 4).reshape(4 * Cin, N * H * W))
            kh = jnp.array([3 - po, 1 - po])   # tap row a=0,1 -> kernel row kh
            kw = jnp.array([3 - pw, 1 - pw])   # tap col b=0,1 -> kernel col kw
            wsub = w_pt[:, :, kh][:, :, :, kw]                   # (Cin,Cout,2,2)
            wslabs.append(wsub.transpose(1, 2, 3, 0).reshape(Cout, 4 * Cin))
    return jnp.stack(patches, axis=0), jnp.stack(wslabs, axis=0)


def conv_transpose_layer_pallas(x, w_pt, stride, pad, gamma, beta, *, use_bn, act):
    N, _, H, W = x.shape
    Cout = w_pt.shape[1]
    xb = x.astype(jnp.bfloat16)        # bf16 operands, f32 MXU accumulation
    wb = w_pt.astype(jnp.bfloat16)
    if stride == 1:
        assert pad == 0
        patches, wslab, (Hout, Wout) = _stride1_patches(xb, wb)
    else:
        assert stride == 2 and pad == 1
        patches, wslab = _subpixel_patches(xb, wb)
        Hout, Wout = 2 * H, 2 * W
    y = _fused_layer_call(patches, wslab, gamma, beta, use_bn=use_bn, act=act)
    if stride == 1:
        return y[0].reshape(Cout, N, Hout, Wout).transpose(1, 0, 2, 3)
    # (po, pw, Cout, N, H, W) -> (N, Cout, 2H, 2W); the final reshape is free.
    return (y.reshape(2, 2, Cout, N, H, W)
             .transpose(3, 2, 4, 0, 5, 1)
             .reshape(N, Cout, Hout, Wout))


def conv_transpose_layer_ref(x, w_pt, stride, pad, gamma, beta, *, use_bn, act):
    # Pure-XLA reference: ConvTranspose2d == lhs-dilated conv with the flipped
    # kernel.  Same bf16-operand / f32-accumulation quantization points as the
    # Pallas path so the self-check isolates the kernel math.
    xb = x.astype(jnp.bfloat16)
    wb = (jnp.transpose(w_pt, (1, 0, 2, 3))[:, :, ::-1, ::-1]).astype(jnp.bfloat16)
    p = KSIZE - 1 - pad
    y = jax.lax.conv_general_dilated(
        xb, wb, window_strides=(1, 1), padding=[(p, p), (p, p)],
        lhs_dilation=(stride, stride),
        dimension_numbers=("NCHW", "OIHW", "NCHW"),
        preferred_element_type=jnp.float32)
    if use_bn:
        mean = y.mean(axis=(0, 2, 3), keepdims=True)
        var = ((y - mean) ** 2).mean(axis=(0, 2, 3), keepdims=True)
        y = (y - mean) * jax.lax.rsqrt(var + BN_EPS)
        y = y * gamma.reshape(1, -1, 1, 1) + beta.reshape(1, -1, 1, 1)
    return jnp.maximum(y, 0.0) if act == "relu" else jnp.tanh(y)


# ---------------------------------------------------------------------------
# Parameters (deterministic synthetic init) and full forward pass.
# ---------------------------------------------------------------------------
def init_params(key):
    fm = FEATURE_MAP_SIZE
    dims = [
        (LATENT_SIZE + CONDITION_SIZE, fm * 8),
        (fm * 8, fm * 4),
        (fm * 4, fm * 2),
        (fm * 2, fm),
        (fm, CHANNELS),
    ]
    ks = jax.random.split(key, 1 + len(dims) + 2 * (len(dims) - 1))
    params = {
        "embedding": jax.random.normal(ks[0], (NUM_CONDITIONS, CONDITION_SIZE),
                                       jnp.float32),
        "convs": [], "gammas": [], "betas": [],
    }
    for i, (cin, cout) in enumerate(dims):
        params["convs"].append(
            0.02 * jax.random.normal(ks[1 + i], (cin, cout, KSIZE, KSIZE),
                                     jnp.float32))
    for i, (_, cout) in enumerate(dims[:-1]):
        params["gammas"].append(
            1.0 + 0.02 * jax.random.normal(ks[1 + len(dims) + i], (cout, 1),
                                           jnp.float32))
        params["betas"].append(
            0.02 * jax.random.normal(ks[1 + len(dims) + 4 + i], (cout, 1),
                                     jnp.float32))
    return params


def inner_generator_forward(params, z_nchw, condition, *, use_pallas=True):
    # Condition embedding -> (N, condition_size, 1, 1); concat with input on C.
    emb = jnp.take(params["embedding"], condition, axis=0)      # (N, cond)
    x = jnp.concatenate([z_nchw[:, :, 0, 0], emb], axis=1)      # (N, lat+cond)
    x = x[:, :, None, None]                                     # NCHW, 1x1

    layer = conv_transpose_layer_pallas if use_pallas else conv_transpose_layer_ref
    strides = [1, 2, 2, 2, 2]
    pads = [0, 1, 1, 1, 1]
    for i in range(5):
        last = i == 4
        cout = params["convs"][i].shape[1]
        g = params["gammas"][i] if not last else jnp.ones((cout, 1), jnp.float32)
        b = params["betas"][i] if not last else jnp.zeros((cout, 1), jnp.float32)
        x = layer(x, params["convs"][i], strides[i], pads[i], g, b,
                  use_bn=not last, act=("tanh" if last else "relu"))
    return x  # NCHW: (N, CHANNELS, 64, 64)


if __name__ == "__main__":
    key = jax.random.PRNGKey(0)
    pkey, zkey = jax.random.split(key)
    params = init_params(pkey)

    batch = 2
    z = jax.random.normal(zkey, (batch, LATENT_SIZE, 1, 1), jnp.float32)
    condition = jnp.array([1, 3], dtype=jnp.int32)

    fwd = jax.jit(functools.partial(inner_generator_forward, use_pallas=True))
    out = jax.block_until_ready(fwd(params, z, condition))
    assert out.shape == (batch, CHANNELS, 64, 64), out.shape

    # Self-check the Pallas sub-pixel kernels against a plain lax dilated-conv
    # reference with identical quantization points.
    ref_fwd = jax.jit(functools.partial(inner_generator_forward, use_pallas=False))
    ref = jax.block_until_ready(ref_fwd(params, z, condition))
    err = float(jnp.max(jnp.abs(out - ref)))
    assert err < 1e-2, err

    print("KERNEL_OK")
</pallas_src>

<mosaic_0001>
module attributes {stable_mosaic.version = 11 : i64} {
  func.func @_fused_layer_kernel(%arg0: i32, %arg1: memref<1x384x32xbf16, #tpu.memory_space<vmem>>, %arg2: memref<1x64x384xbf16, #tpu.memory_space<vmem>>, %arg3: memref<64x1xf32, #tpu.memory_space<vmem>>, %arg4: memref<64x1xf32, #tpu.memory_space<vmem>>, %arg5: memref<1x64x32xf32, #tpu.memory_space<vmem>>) attributes {dimension_semantics = [#tpu.dimension_semantics<arbitrary>], iteration_bounds = array<i64: 1>, scalar_prefetch = 0 : i64, scratch_operands = 0 : i64, tpu.core_type = #tpu.core_type<tc>, window_params = [{pipeline_mode = #tpu.pipeline_mode<synchronous>, transform_indices = @transform_0, window_bounds = array<i64: 1, 384, 32>}, {pipeline_mode = #tpu.pipeline_mode<synchronous>, transform_indices = @transform_1, window_bounds = array<i64: 1, 64, 384>}, {pipeline_mode = #tpu.pipeline_mode<synchronous>, transform_indices = @transform_2, window_bounds = array<i64: 64, 1>}, {pipeline_mode = #tpu.pipeline_mode<synchronous>, transform_indices = @transform_3, window_bounds = array<i64: 64, 1>}, {pipeline_mode = #tpu.pipeline_mode<synchronous>, transform_indices = @transform_4, window_bounds = array<i64: 1, 64, 32>}]} {
    %c0 = arith.constant 0 : index
    %c0_0 = arith.constant 0 : index
    %c0_1 = arith.constant 0 : index
    %0 = vector.load %arg2[%c0, %c0_0, %c0_1] : memref<1x64x384xbf16, #tpu.memory_space<vmem>>, vector<1x64x384xbf16>
    %1 = vector.shape_cast %0 : vector<1x64x384xbf16> to vector<64x384xbf16>
    %c0_2 = arith.constant 0 : index
    %c0_3 = arith.constant 0 : index
    %c0_4 = arith.constant 0 : index
    %2 = vector.load %arg1[%c0_2, %c0_3, %c0_4] : memref<1x384x32xbf16, #tpu.memory_space<vmem>>, vector<1x384x32xbf16>
    %3 = vector.shape_cast %2 : vector<1x384x32xbf16> to vector<384x32xbf16>
    %cst = arith.constant dense<0.000000e+00> : vector<64x32xf32>
    %4 = tpu.matmul %1, %3, %cst {dimension_numbers = #tpu.dot_dimension_numbers<[1], [0], [0], [1], [0, 0, 1, 1], [], []>} : vector<64x384xbf16>, vector<384x32xbf16>, vector<64x32xf32> -> vector<64x32xf32>
    %cst_5 = arith.constant dense<0.000000e+00> : vector<64xf32>
    %5 = vector.multi_reduction <add>, %4, %cst_5 [1] : vector<64x32xf32> to vector<64xf32>
    %6 = vector.shape_cast %5 : vector<64xf32> to vector<64x1xf32>
    %7 = arith.mulf %4, %4 : vector<64x32xf32>
    %cst_6 = arith.constant dense<0.000000e+00> : vector<64xf32>
    %8 = vector.multi_reduction <add>, %7, %cst_6 [1] : vector<64x32xf32> to vector<64xf32>
    %9 = vector.shape_cast %8 : vector<64xf32> to vector<64x1xf32>
    %cst_7 = arith.constant 3.125000e-02 : f32
    %10 = vector.broadcast %cst_7 : f32 to vector<64x1xf32>
    %11 = arith.mulf %6, %10 : vector<64x1xf32>
    %cst_8 = arith.constant 3.125000e-02 : f32
    %12 = vector.broadcast %cst_8 : f32 to vector<64x1xf32>
    %13 = arith.mulf %9, %12 : vector<64x1xf32>
    %14 = arith.mulf %11, %11 : vector<64x1xf32>
    %15 = arith.subf %13, %14 : vector<64x1xf32>
    %cst_9 = arith.constant 0.000000e+00 : f32
    %16 = vector.broadcast %cst_9 : f32 to vector<64x1xf32>
    %17 = arith.maximumf %15, %16 : vector<64x1xf32>
    %c0_10 = arith.constant 0 : index
    %c0_11 = arith.constant 0 : index
    %18 = vector.load %arg3[%c0_10, %c0_11] : memref<64x1xf32, #tpu.memory_space<vmem>>, vector<64x1xf32>
    %cst_12 = arith.constant 9.99999974E-6 : f32
    %19 = vector.broadcast %cst_12 : f32 to vector<64x1xf32>
    %20 = arith.addf %17, %19 : vector<64x1xf32>
    %21 = math.rsqrt %20 : vector<64x1xf32>
    %22 = arith.mulf %18, %21 : vector<64x1xf32>
    %c0_13 = arith.constant 0 : index
    %c0_14 = arith.constant 0 : index
    %23 = vector.load %arg4[%c0_13, %c0_14] : memref<64x1xf32, #tpu.memory_space<vmem>>, vector<64x1xf32>
    %24 = arith.mulf %11, %22 : vector<64x1xf32>
    %25 = arith.subf %23, %24 : vector<64x1xf32>
    %26 = vector.broadcast %22 : vector<64x1xf32> to vector<64x32xf32>
    %27 = arith.mulf %4, %26 : vector<64x32xf32>
    %28 = vector.broadcast %25 : vector<64x1xf32> to vector<64x32xf32>
    %29 = arith.addf %27, %28 : vector<64x32xf32>
    %cst_15 = arith.constant 0.000000e+00 : f32
    %30 = vector.broadcast %cst_15 : f32 to vector<64x32xf32>
    %31 = arith.maximumf %29, %30 : vector<64x32xf32>
    %c0_16 = arith.constant 0 : index
    %c0_17 = arith.constant 0 : index
    %c0_18 = arith.constant 0 : index
    %32 = vector.load %arg5[%c0_16, %c0_17, %c0_18] : memref<1x64x32xf32, #tpu.memory_space<vmem>>, vector<1x64x32xf32>
    %33 = vector.shape_cast %32 : vector<1x64x32xf32> to vector<64x32xf32>
    %34 = vector.shape_cast %31 : vector<64x32xf32> to vector<1x64x32xf32>
    tpu.vector_store %arg5[%c0_16, %c0_17, %c0_18], %34 {strides = array<i32>} : memref<1x64x32xf32, #tpu.memory_space<vmem>>, vector<1x64x32xf32>,
    return
  }
  func.func @transform_0(%arg0: i32) -> (i32, i32, i32) {
    %c0_i32 = arith.constant 0 : i32
    %c0_i32_0 = arith.constant 0 : i32
    %c0_i32_1 = arith.constant 0 : i32
    %c0_i32_2 = arith.constant 0 : i32
    return %c0_i32, %c0_i32_0, %c0_i32_1 : i32, i32, i32
  }
  func.func @transform_1(%arg0: i32) -> (i32, i32, i32) {
    %c0_i32 = arith.constant 0 : i32
    %c0_i32_0 = arith.constant 0 : i32
    %c0_i32_1 = arith.constant 0 : i32
    %c0_i32_2 = arith.constant 0 : i32
    return %c0_i32, %c0_i32_0, %c0_i32_1 : i32, i32, i32
  }
  func.func @transform_2(%arg0: i32) -> (i32, i32) {
    %c0_i32 = arith.constant 0 : i32
    %c0_i32_0 = arith.constant 0 : i32
    %c0_i32_1 = arith.constant 0 : i32
    return %c0_i32, %c0_i32_0 : i32, i32
  }
  func.func @transform_3(%arg0: i32) -> (i32, i32) {
    %c0_i32 = arith.constant 0 : i32
    %c0_i32_0 = arith.constant 0 : i32
    %c0_i32_1 = arith.constant 0 : i32
    return %c0_i32, %c0_i32_0 : i32, i32
  }
  func.func @transform_4(%arg0: i32) -> (i32, i32, i32) {
    %c0_i32 = arith.constant 0 : i32
    %c0_i32_0 = arith.constant 0 : i32
    %c0_i32_1 = arith.constant 0 : i32
    %c0_i32_2 = arith.constant 0 : i32
    return %c0_i32, %c0_i32_0, %c0_i32_1 : i32, i32, i32
  }
}

module attributes {stable_mosaic.version = 11 : i64} {
  func.func @_fused_layer_kernel(%arg0: i32, %arg1: memref<4x256x32xbf16, #tpu.memory_space<vmem>>, %arg2: memref<4x32x256xbf16, #tpu.memory_space<vmem>>, %arg3: memref<32x1xf32, #tpu.memory_space<vmem>>, %arg4: memref<32x1xf32, #tpu.memory_space<vmem>>, %arg5: memref<4x32x32xf32, #tpu.memory_space<vmem>>) attributes {dimension_semantics = [#tpu.dimension_semantics<arbitrary>], iteration_bounds = array<i64: 1>, scalar_prefetch = 0 : i64, scratch_operands = 0 : i64, tpu.core_type = #tpu.core_type<tc>, window_params = [{pipeline_mode = #tpu.pipeline_mode<synchronous>, transform_indices = @transform_0, window_bounds = array<i64: 4, 256, 32>}, {pipeline_mode = #tpu.pipeline_mode<synchronous>, transform_indices = @transform_1, window_bounds = array<i64: 4, 32, 256>}, {pipeline_mode = #tpu.pipeline_mode<synchronous>, transform_indices = @transform_2, window_bounds = array<i64: 32, 1>}, {pipeline_mode = #tpu.pipeline_mode<synchronous>, transform_indices = @transform_3, window_bounds = array<i64: 32, 1>}, {pipeline_mode = #tpu.pipeline_mode<synchronous>, transform_indices = @transform_4, window_bounds = array<i64: 4, 32, 32>}]} {
    %c0 = arith.constant 0 : index
    %c0_0 = arith.constant 0 : index
    %c0_1 = arith.constant 0 : index
    %0 = vector.load %arg2[%c0, %c0_0, %c0_1] : memref<4x32x256xbf16, #tpu.memory_space<vmem>>, vector<1x32x256xbf16>
    %1 = vector.shape_cast %0 : vector<1x32x256xbf16> to vector<32x256xbf16>
    %c0_2 = arith.constant 0 : index
    %c0_3 = arith.constant 0 : index
    %c0_4 = arith.constant 0 : index
    %2 = vector.load %arg1[%c0_2, %c0_3, %c0_4] : memref<4x256x32xbf16, #tpu.memory_space<vmem>>, vector<1x256x32xbf16>
    %3 = vector.shape_cast %2 : vector<1x256x32xbf16> to vector<256x32xbf16>
    %cst = arith.constant dense<0.000000e+00> : vector<32x32xf32>
    %4 = tpu.matmul %1, %3, %cst {dimension_numbers = #tpu.dot_dimension_numbers<[1], [0], [0], [1], [0, 0, 1, 1], [], []>} : vector<32x256xbf16>, vector<256x32xbf16>, vector<32x32xf32> -> vector<32x32xf32>
    %c1 = arith.constant 1 : index
    %c0_5 = arith.constant 0 : index
    %c0_6 = arith.constant 0 : index
    %5 = vector.load %arg2[%c1, %c0_5, %c0_6] : memref<4x32x256xbf16, #tpu.memory_space<vmem>>, vector<1x32x256xbf16>
    %6 = vector.shape_cast %5 : vector<1x32x256xbf16> to vector<32x256xbf16>
    %c1_7 = arith.constant 1 : index
    %c0_8 = arith.constant 0 : index
    %c0_9 = arith.constant 0 : index
    %7 = vector.load %arg1[%c1_7, %c0_8, %c0_9] : memref<4x256x32xbf16, #tpu.memory_space<vmem>>, vector<1x256x32xbf16>
    %8 = vector.shape_cast %7 : vector<1x256x32xbf16> to vector<256x32xbf16>
    %cst_10 = arith.constant dense<0.000000e+00> : vector<32x32xf32>
    %9 = tpu.matmul %6, %8, %cst_10 {dimension_numbers = #tpu.dot_dimension_numbers<[1], [0], [0], [1], [0, 0, 1, 1], [], []>} : vector<32x256xbf16>, vector<256x32xbf16>, vector<32x32xf32> -> vector<32x32xf32>
    %c2 = arith.constant 2 : index
    %c0_11 = arith.constant 0 : index
    %c0_12 = arith.constant 0 : index
    %10 = vector.load %arg2[%c2, %c0_11, %c0_12] : memref<4x32x256xbf16, #tpu.memory_space<vmem>>, vector<1x32x256xbf16>
    %11 = vector.shape_cast %10 : vector<1x32x256xbf16> to vector<32x256xbf16>
    %c2_13 = arith.constant 2 : index
    %c0_14 = arith.constant 0 : index
    %c0_15 = arith.constant 0 : index
    %12 = vector.load %arg1[%c2_13, %c0_14, %c0_15] : memref<4x256x32xbf16, #tpu.memory_space<vmem>>, vector<1x256x32xbf16>
    %13 = vector.shape_cast %12 : vector<1x256x32xbf16> to vector<256x32xbf16>
    %cst_16 = arith.constant dense<0.000000e+00> : vector<32x32xf32>
    %14 = tpu.matmul %11, %13, %cst_16 {dimension_numbers = #tpu.dot_dimension_numbers<[1], [0], [0], [1], [0, 0, 1, 1], [], []>} : vector<32x256xbf16>, vector<256x32xbf16>, vector<32x32xf32> -> vector<32x32xf32>
    %c3 = arith.constant 3 : index
    %c0_17 = arith.constant 0 : index
    %c0_18 = arith.constant 0 : index
    %15 = vector.load %arg2[%c3, %c0_17, %c0_18] : memref<4x32x256xbf16, #tpu.memory_space<vmem>>, vector<1x32x256xbf16>
    %16 = vector.shape_cast %15 : vector<1x32x256xbf16> to vector<32x256xbf16>
    %c3_19 = arith.constant 3 : index
    %c0_20 = arith.constant 0 : index
    %c0_21 = arith.constant 0 : index
    %17 = vector.load %arg1[%c3_19, %c0_20, %c0_21] : memref<4x256x32xbf16, #tpu.memory_space<vmem>>, vector<1x256x32xbf16>
    %18 = vector.shape_cast %17 : vector<1x256x32xbf16> to vector<256x32xbf16>
    %cst_22 = arith.constant dense<0.000000e+00> : vector<32x32xf32>
    %19 = tpu.matmul %16, %18, %cst_22 {dimension_numbers = #tpu.dot_dimension_numbers<[1], [0], [0], [1], [0, 0, 1, 1], [], []>} : vector<32x256xbf16>, vector<256x32xbf16>, vector<32x32xf32> -> vector<32x32xf32>
    %cst_23 = arith.constant dense<0.000000e+00> : vector<32xf32>
    %20 = vector.multi_reduction <add>, %4, %cst_23 [1] : vector<32x32xf32> to vector<32xf32>
    %21 = vector.shape_cast %20 : vector<32xf32> to vector<32x1xf32>
    %22 = arith.mulf %4, %4 : vector<32x32xf32>
    %cst_24 = arith.constant dense<0.000000e+00> : vector<32xf32>
    %23 = vector.multi_reduction <add>, %22, %cst_24 [1] : vector<32x32xf32> to vector<32xf32>
    %24 = vector.shape_cast %23 : vector<32xf32> to vector<32x1xf32>
    %cst_25 = arith.constant dense<0.000000e+00> : vector<32xf32>
    %25 = vector.multi_reduction <add>, %9, %cst_25 [1] : vector<32x32xf32> to vector<32xf32>
    %26 = vector.shape_cast %25 : vector<32xf32> to vector<32x1xf32>
    %27 = arith.addf %21, %26 : vector<32x1xf32>
    %28 = arith.mulf %9, %9 : vector<32x32xf32>
    %cst_26 = arith.constant dense<0.000000e+00> : vector<32xf32>
    %29 = vector.multi_reduction <add>, %28, %cst_26 [1] : vector<32x32xf32> to vector<32xf32>
    %30 = vector.shape_cast %29 : vector<32xf32> to vector<32x1xf32>
    %31 = arith.addf %24, %30 : vector<32x1xf32>
    %cst_27 = arith.constant dense<0.000000e+00> : vector<32xf32>
    %32 = vector.multi_reduction <add>, %14, %cst_27 [1] : vector<32x32xf32> to vector<32xf32>
    %33 = vector.shape_cast %32 : vector<32xf32> to vector<32x1xf32>
    %34 = arith.addf %27, %33 : vector<32x1xf32>
    %35 = arith.mulf %14, %14 : vector<32x32xf32>
    %cst_28 = arith.constant dense<0.000000e+00> : vector<32xf32>
    %36 = vector.multi_reduction <add>, %35, %cst_28 [1] : vector<32x32xf32> to vector<32xf32>
    %37 = vector.shape_cast %36 : vector<32xf32> to vector<32x1xf32>
    %38 = arith.addf %31, %37 : vector<32x1xf32>
    %cst_29 = arith.constant dense<0.000000e+00> : vector<32xf32>
    %39 = vector.multi_reduction <add>, %19, %cst_29 [1] : vector<32x32xf32> to vector<32xf32>
    %40 = vector.shape_cast %39 : vector<32xf32> to vector<32x1xf32>
    %41 = arith.addf %34, %40 : vector<32x1xf32>
    %42 = arith.mulf %19, %19 : vector<32x32xf32>
    %cst_30 = arith.constant dense<0.000000e+00> : vector<32xf32>
    %43 = vector.multi_reduction <add>, %42, %cst_30 [1] : vector<32x32xf32> to vector<32xf32>
    %44 = vector.shape_cast %43 : vector<32xf32> to vector<32x1xf32>
    %45 = arith.addf %38, %44 : vector<32x1xf32>
    %cst_31 = arith.constant 7.812500e-03 : f32
    %46 = vector.broadcast %cst_31 : f32 to vector<32x1xf32>
    %47 = arith.mulf %41, %46 : vector<32x1xf32>
    %cst_32 = arith.constant 7.812500e-03 : f32
    %48 = vector.broadcast %cst_32 : f32 to vector<32x1xf32>
    %49 = arith.mulf %45, %48 : vector<32x1xf32>
    %50 = arith.mulf %47, %47 : vector<32x1xf32>
    %51 = arith.subf %49, %50 : vector<32x1xf32>
    %cst_33 = arith.constant 0.000000e+00 : f32
    %52 = vector.broadcast %cst_33 : f32 to vector<32x1xf32>
    %53 = arith.maximumf %51, %52 : vector<32x1xf32>
    %c0_34 = arith.constant 0 : index
    %c0_35 = arith.constant 0 : index
    %54 = vector.load %arg3[%c0_34, %c0_35] : memref<32x1xf32, #tpu.memory_space<vmem>>, vector<32x1xf32>
    %cst_36 = arith.constant 9.99999974E-6 : f32
    %55 = vector.broadcast %cst_36 : f32 to vector<32x1xf32>
    %56 = arith.addf %53, %55 : vector<32x1xf32>
    %57 = math.rsqrt %56 : vector<32x1xf32>
    %58 = arith.mulf %54, %57 : vector<32x1xf32>
    %c0_37 = arith.constant 0 : index
    %c0_38 = arith.constant 0 : index
    %59 = vector.load %arg4[%c0_37, %c0_38] : memref<32x1xf32, #tpu.memory_space<vmem>>, vector<32x1xf32>
    %60 = arith.mulf %47, %58 : vector<32x1xf32>
    %61 = arith.subf %59, %60 : vector<32x1xf32>
    %62 = vector.broadcast %58 : vector<32x1xf32> to vector<32x32xf32>
    %63 = arith.mulf %4, %62 : vector<32x32xf32>
    %64 = vector.broadcast %61 : vector<32x1xf32> to vector<32x32xf32>
    %65 = arith.addf %63, %64 : vector<32x32xf32>
    %cst_39 = arith.constant 0.000000e+00 : f32
    %66 = vector.broadcast %cst_39 : f32 to vector<32x32xf32>
    %67 = arith.maximumf %65, %66 : vector<32x32xf32>
    %c0_40 = arith.constant 0 : index
    %c0_41 = arith.constant 0 : index
    %c0_42 = arith.constant 0 : index
    %68 = vector.load %arg5[%c0_40, %c0_41, %c0_42] : memref<4x32x32xf32, #tpu.memory_space<vmem>>, vector<1x32x32xf32>
    %69 = vector.shape_cast %68 : vector<1x32x32xf32> to vector<32x32xf32>
    %70 = vector.shape_cast %67 : vector<32x32xf32> to vector<1x32x32xf32>
    tpu.vector_store %arg5[%c0_40, %c0_41, %c0_42], %70 {strides = array<i32>} : memref<4x32x32xf32, #tpu.memory_space<vmem>>, vector<1x32x32xf32>,
    %71 = vector.broadcast %58 : vector<32x1xf32> to vector<32x32xf32>
    %72 = arith.mulf %9, %71 : vector<32x32xf32>
    %73 = vector.broadcast %61 : vector<32x1xf32> to vector<32x32xf32>
    %74 = arith.addf %72, %73 : vector<32x32xf32>
    %cst_43 = arith.constant 0.000000e+00 : f32
    %75 = vector.broadcast %cst_43 : f32 to vector<32x32xf32>
    %76 = arith.maximumf %74, %75 : vector<32x32xf32>
    %c1_44 = arith.constant 1 : index
    %c0_45 = arith.constant 0 : index
    %c0_46 = arith.constant 0 : index
    %77 = vector.load %arg5[%c1_44, %c0_45, %c0_46] : memref<4x32x32xf32, #tpu.memory_space<vmem>>, vector<1x32x32xf32>
    %78 = vector.shape_cast %77 : vector<1x32x32xf32> to vector<32x32xf32>
    %79 = vector.shape_cast %76 : vector<32x32xf32> to vector<1x32x32xf32>
    tpu.vector_store %arg5[%c1_44, %c0_45, %c0_46], %79 {strides = array<i32>} : memref<4x32x32xf32, #tpu.memory_space<vmem>>, vector<1x32x32xf32>,
    %80 = vector.broadcast %58 : vector<32x1xf32> to vector<32x32xf32>
    %81 = arith.mulf %14, %80 : vector<32x32xf32>
    %82 = vector.broadcast %61 : vector<32x1xf32> to vector<32x32xf32>
    %83 = arith.addf %81, %82 : vector<32x32xf32>
    %cst_47 = arith.constant 0.000000e+00 : f32
    %84 = vector.broadcast %cst_47 : f32 to vector<32x32xf32>
    %85 = arith.maximumf %83, %84 : vector<32x32xf32>
    %c2_48 = arith.constant 2 : index
    %c0_49 = arith.constant 0 : index
    %c0_50 = arith.constant 0 : index
    %86 = vector.load %arg5[%c2_48, %c0_49, %c0_50] : memref<4x32x32xf32, #tpu.memory_space<vmem>>, vector<1x32x32xf32>
    %87 = vector.shape_cast %86 : vector<1x32x32xf32> to vector<32x32xf32>
    %88 = vector.shape_cast %85 : vector<32x32xf32> to vector<1x32x32xf32>
    tpu.vector_store %arg5[%c2_48, %c0_49, %c0_50], %88 {strides = array<i32>} : memref<4x32x32xf32, #tpu.memory_space<vmem>>, vector<1x32x32xf32>,
    %89 = vector.broadcast %58 : vector<32x1xf32> to vector<32x32xf32>
    %90 = arith.mulf %19, %89 : vector<32x32xf32>
    %91 = vector.broadcast %61 : vector<32x1xf32> to vector<32x32xf32>
    %92 = arith.addf %90, %91 : vector<32x32xf32>
    %cst_51 = arith.constant 0.000000e+00 : f32
    %93 = vector.broadcast %cst_51 : f32 to vector<32x32xf32>
    %94 = arith.maximumf %92, %93 : vector<32x32xf32>
    %c3_52 = arith.constant 3 : index
    %c0_53 = arith.constant 0 : index
    %c0_54 = arith.constant 0 : index
    %95 = vector.load %arg5[%c3_52, %c0_53, %c0_54] : memref<4x32x32xf32, #tpu.memory_space<vmem>>, vector<1x32x32xf32>
    %96 = vector.shape_cast %95 : vector<1x32x32xf32> to vector<32x32xf32>
    %97 = vector.shape_cast %94 : vector<32x32xf32> to vector<1x32x32xf32>
    tpu.vector_store %arg5[%c3_52, %c0_53, %c0_54], %97 {strides = array<i32>} : memref<4x32x32xf32, #tpu.memory_space<vmem>>, vector<1x32x32xf32>,
    return
  }
  func.func @transform_0(%arg0: i32) -> (i32, i32, i32) {
    %c0_i32 = arith.constant 0 : i32
    %c0_i32_0 = arith.constant 0 : i32
    %c0_i32_1 = arith.constant 0 : i32
    %c0_i32_2 = arith.constant 0 : i32
    return %c0_i32, %c0_i32_0, %c0_i32_1 : i32, i32, i32
  }
  func.func @transform_1(%arg0: i32) -> (i32, i32, i32) {
    %c0_i32 = arith.constant 0 : i32
    %c0_i32_0 = arith.constant 0 : i32
    %c0_i32_1 = arith.constant 0 : i32
    %c0_i32_2 = arith.constant 0 : i32
    return %c0_i32, %c0_i32_0, %c0_i32_1 : i32, i32, i32
  }
  func.func @transform_2(%arg0: i32) -> (i32, i32) {
    %c0_i32 = arith.constant 0 : i32
    %c0_i32_0 = arith.constant 0 : i32
    %c0_i32_1 = arith.constant 0 : i32
    return %c0_i32, %c0_i32_0 : i32, i32
  }
  func.func @transform_3(%arg0: i32) -> (i32, i32) {
    %c0_i32 = arith.constant 0 : i32
    %c0_i32_0 = arith.constant 0 : i32
    %c0_i32_1 = arith.constant 0 : i32
    return %c0_i32, %c0_i32_0 : i32, i32
  }
  func.func @transform_4(%arg0: i32) -> (i32, i32, i32) {
    %c0_i32 = arith.constant 0 : i32
    %c0_i32_0 = arith.constant 0 : i32
    %c0_i32_1 = arith.constant 0 : i32
    %c0_i32_2 = arith.constant 0 : i32
    return %c0_i32, %c0_i32_0, %c0_i32_1 : i32, i32, i32
  }
}

module attributes {stable_mosaic.version = 11 : i64} {
  func.func @_fused_layer_kernel(%arg0: i32, %arg1: memref<4x128x128xbf16, #tpu.memory_space<vmem>>, %arg2: memref<4x16x128xbf16, #tpu.memory_space<vmem>>, %arg3: memref<16x1xf32, #tpu.memory_space<vmem>>, %arg4: memref<16x1xf32, #tpu.memory_space<vmem>>, %arg5: memref<4x16x128xf32, #tpu.memory_space<vmem>>) attributes {dimension_semantics = [#tpu.dimension_semantics<arbitrary>], iteration_bounds = array<i64: 1>, scalar_prefetch = 0 : i64, scratch_operands = 0 : i64, tpu.core_type = #tpu.core_type<tc>, window_params = [{pipeline_mode = #tpu.pipeline_mode<synchronous>, transform_indices = @transform_0, window_bounds = array<i64: 4, 128, 128>}, {pipeline_mode = #tpu.pipeline_mode<synchronous>, transform_indices = @transform_1, window_bounds = array<i64: 4, 16, 128>}, {pipeline_mode = #tpu.pipeline_mode<synchronous>, transform_indices = @transform_2, window_bounds = array<i64: 16, 1>}, {pipeline_mode = #tpu.pipeline_mode<synchronous>, transform_indices = @transform_3, window_bounds = array<i64: 16, 1>}, {pipeline_mode = #tpu.pipeline_mode<synchronous>, transform_indices = @transform_4, window_bounds = array<i64: 4, 16, 128>}]} {
    %c0 = arith.constant 0 : index
    %c0_0 = arith.constant 0 : index
    %c0_1 = arith.constant 0 : index
    %0 = vector.load %arg2[%c0, %c0_0, %c0_1] : memref<4x16x128xbf16, #tpu.memory_space<vmem>>, vector<1x16x128xbf16>
    %1 = vector.shape_cast %0 : vector<1x16x128xbf16> to vector<16x128xbf16>
    %c0_2 = arith.constant 0 : index
    %c0_3 = arith.constant 0 : index
    %c0_4 = arith.constant 0 : index
    %2 = vector.load %arg1[%c0_2, %c0_3, %c0_4] : memref<4x128x128xbf16, #tpu.memory_space<vmem>>, vector<1x128x128xbf16>
    %3 = vector.shape_cast %2 : vector<1x128x128xbf16> to vector<128x128xbf16>
    %cst = arith.constant dense<0.000000e+00> : vector<16x128xf32>
    %4 = tpu.matmul %1, %3, %cst {dimension_numbers = #tpu.dot_dimension_numbers<[1], [0], [0], [1], [0, 0, 1, 1], [], []>} : vector<16x128xbf16>, vector<128x128xbf16>, vector<16x128xf32> -> vector<16x128xf32>
    %c1 = arith.constant 1 : index
    %c0_5 = arith.constant 0 : index
    %c0_6 = arith.constant 0 : index
    %5 = vector.load %arg2[%c1, %c0_5, %c0_6] : memref<4x16x128xbf16, #tpu.memory_space<vmem>>, vector<1x16x128xbf16>
    %6 = vector.shape_cast %5 : vector<1x16x128xbf16> to vector<16x128xbf16>
    %c1_7 = arith.constant 1 : index
    %c0_8 = arith.constant 0 : index
    %c0_9 = arith.constant 0 : index
    %7 = vector.load %arg1[%c1_7, %c0_8, %c0_9] : memref<4x128x128xbf16, #tpu.memory_space<vmem>>, vector<1x128x128xbf16>
    %8 = vector.shape_cast %7 : vector<1x128x128xbf16> to vector<128x128xbf16>
    %cst_10 = arith.constant dense<0.000000e+00> : vector<16x128xf32>
    %9 = tpu.matmul %6, %8, %cst_10 {dimension_numbers = #tpu.dot_dimension_numbers<[1], [0], [0], [1], [0, 0, 1, 1], [], []>} : vector<16x128xbf16>, vector<128x128xbf16>, vector<16x128xf32> -> vector<16x128xf32>
    %c2 = arith.constant 2 : index
    %c0_11 = arith.constant 0 : index
    %c0_12 = arith.constant 0 : index
    %10 = vector.load %arg2[%c2, %c0_11, %c0_12] : memref<4x16x128xbf16, #tpu.memory_space<vmem>>, vector<1x16x128xbf16>
    %11 = vector.shape_cast %10 : vector<1x16x128xbf16> to vector<16x128xbf16>
    %c2_13 = arith.constant 2 : index
    %c0_14 = arith.constant 0 : index
    %c0_15 = arith.constant 0 : index
    %12 = vector.load %arg1[%c2_13, %c0_14, %c0_15] : memref<4x128x128xbf16, #tpu.memory_space<vmem>>, vector<1x128x128xbf16>
    %13 = vector.shape_cast %12 : vector<1x128x128xbf16> to vector<128x128xbf16>
    %cst_16 = arith.constant dense<0.000000e+00> : vector<16x128xf32>
    %14 = tpu.matmul %11, %13, %cst_16 {dimension_numbers = #tpu.dot_dimension_numbers<[1], [0], [0], [1], [0, 0, 1, 1], [], []>} : vector<16x128xbf16>, vector<128x128xbf16>, vector<16x128xf32> -> vector<16x128xf32>
    %c3 = arith.constant 3 : index
    %c0_17 = arith.constant 0 : index
    %c0_18 = arith.constant 0 : index
    %15 = vector.load %arg2[%c3, %c0_17, %c0_18] : memref<4x16x128xbf16, #tpu.memory_space<vmem>>, vector<1x16x128xbf16>
    %16 = vector.shape_cast %15 : vector<1x16x128xbf16> to vector<16x128xbf16>
    %c3_19 = arith.constant 3 : index
    %c0_20 = arith.constant 0 : index
    %c0_21 = arith.constant 0 : index
    %17 = vector.load %arg1[%c3_19, %c0_20, %c0_21] : memref<4x128x128xbf16, #tpu.memory_space<vmem>>, vector<1x128x128xbf16>
    %18 = vector.shape_cast %17 : vector<1x128x128xbf16> to vector<128x128xbf16>
    %cst_22 = arith.constant dense<0.000000e+00> : vector<16x128xf32>
    %19 = tpu.matmul %16, %18, %cst_22 {dimension_numbers = #tpu.dot_dimension_numbers<[1], [0], [0], [1], [0, 0, 1, 1], [], []>} : vector<16x128xbf16>, vector<128x128xbf16>, vector<16x128xf32> -> vector<16x128xf32>
    %cst_23 = arith.constant dense<0.000000e+00> : vector<16xf32>
    %20 = vector.multi_reduction <add>, %4, %cst_23 [1] : vector<16x128xf32> to vector<16xf32>
    %21 = vector.shape_cast %20 : vector<16xf32> to vector<16x1xf32>
    %22 = arith.mulf %4, %4 : vector<16x128xf32>
    %cst_24 = arith.constant dense<0.000000e+00> : vector<16xf32>
    %23 = vector.multi_reduction <add>, %22, %cst_24 [1] : vector<16x128xf32> to vector<16xf32>
    %24 = vector.shape_cast %23 : vector<16xf32> to vector<16x1xf32>
    %cst_25 = arith.constant dense<0.000000e+00> : vector<16xf32>
    %25 = vector.multi_reduction <add>, %9, %cst_25 [1] : vector<16x128xf32> to vector<16xf32>
    %26 = vector.shape_cast %25 : vector<16xf32> to vector<16x1xf32>
    %27 = arith.addf %21, %26 : vector<16x1xf32>
    %28 = arith.mulf %9, %9 : vector<16x128xf32>
    %cst_26 = arith.constant dense<0.000000e+00> : vector<16xf32>
    %29 = vector.multi_reduction <add>, %28, %cst_26 [1] : vector<16x128xf32> to vector<16xf32>
    %30 = vector.shape_cast %29 : vector<16xf32> to vector<16x1xf32>
    %31 = arith.addf %24, %30 : vector<16x1xf32>
    %cst_27 = arith.constant dense<0.000000e+00> : vector<16xf32>
    %32 = vector.multi_reduction <add>, %14, %cst_27 [1] : vector<16x128xf32> to vector<16xf32>
    %33 = vector.shape_cast %32 : vector<16xf32> to vector<16x1xf32>
    %34 = arith.addf %27, %33 : vector<16x1xf32>
    %35 = arith.mulf %14, %14 : vector<16x128xf32>
    %cst_28 = arith.constant dense<0.000000e+00> : vector<16xf32>
    %36 = vector.multi_reduction <add>, %35, %cst_28 [1] : vector<16x128xf32> to vector<16xf32>
    %37 = vector.shape_cast %36 : vector<16xf32> to vector<16x1xf32>
    %38 = arith.addf %31, %37 : vector<16x1xf32>
    %cst_29 = arith.constant dense<0.000000e+00> : vector<16xf32>
    %39 = vector.multi_reduction <add>, %19, %cst_29 [1] : vector<16x128xf32> to vector<16xf32>
    %40 = vector.shape_cast %39 : vector<16xf32> to vector<16x1xf32>
    %41 = arith.addf %34, %40 : vector<16x1xf32>
    %42 = arith.mulf %19, %19 : vector<16x128xf32>
    %cst_30 = arith.constant dense<0.000000e+00> : vector<16xf32>
    %43 = vector.multi_reduction <add>, %42, %cst_30 [1] : vector<16x128xf32> to vector<16xf32>
    %44 = vector.shape_cast %43 : vector<16xf32> to vector<16x1xf32>
    %45 = arith.addf %38, %44 : vector<16x1xf32>
    %cst_31 = arith.constant 0.001953125 : f32
    %46 = vector.broadcast %cst_31 : f32 to vector<16x1xf32>
    %47 = arith.mulf %41, %46 : vector<16x1xf32>
    %cst_32 = arith.constant 0.001953125 : f32
    %48 = vector.broadcast %cst_32 : f32 to vector<16x1xf32>
    %49 = arith.mulf %45, %48 : vector<16x1xf32>
    %50 = arith.mulf %47, %47 : vector<16x1xf32>
    %51 = arith.subf %49, %50 : vector<16x1xf32>
    %cst_33 = arith.constant 0.000000e+00 : f32
    %52 = vector.broadcast %cst_33 : f32 to vector<16x1xf32>
    %53 = arith.maximumf %51, %52 : vector<16x1xf32>
    %c0_34 = arith.constant 0 : index
    %c0_35 = arith.constant 0 : index
    %54 = vector.load %arg3[%c0_34, %c0_35] : memref<16x1xf32, #tpu.memory_space<vmem>>, vector<16x1xf32>
    %cst_36 = arith.constant 9.99999974E-6 : f32
    %55 = vector.broadcast %cst_36 : f32 to vector<16x1xf32>
    %56 = arith.addf %53, %55 : vector<16x1xf32>
    %57 = math.rsqrt %56 : vector<16x1xf32>
    %58 = arith.mulf %54, %57 : vector<16x1xf32>
    %c0_37 = arith.constant 0 : index
    %c0_38 = arith.constant 0 : index
    %59 = vector.load %arg4[%c0_37, %c0_38] : memref<16x1xf32, #tpu.memory_space<vmem>>, vector<16x1xf32>
    %60 = arith.mulf %47, %58 : vector<16x1xf32>
    %61 = arith.subf %59, %60 : vector<16x1xf32>
    %62 = vector.broadcast %58 : vector<16x1xf32> to vector<16x128xf32>
    %63 = arith.mulf %4, %62 : vector<16x128xf32>
    %64 = vector.broadcast %61 : vector<16x1xf32> to vector<16x128xf32>
    %65 = arith.addf %63, %64 : vector<16x128xf32>
    %cst_39 = arith.constant 0.000000e+00 : f32
    %66 = vector.broadcast %cst_39 : f32 to vector<16x128xf32>
    %67 = arith.maximumf %65, %66 : vector<16x128xf32>
    %c0_40 = arith.constant 0 : index
    %c0_41 = arith.constant 0 : index
    %c0_42 = arith.constant 0 : index
    %68 = vector.load %arg5[%c0_40, %c0_41, %c0_42] : memref<4x16x128xf32, #tpu.memory_space<vmem>>, vector<1x16x128xf32>
    %69 = vector.shape_cast %68 : vector<1x16x128xf32> to vector<16x128xf32>
    %70 = vector.shape_cast %67 : vector<16x128xf32> to vector<1x16x128xf32>
    tpu.vector_store %arg5[%c0_40, %c0_41, %c0_42], %70 {strides = array<i32>} : memref<4x16x128xf32, #tpu.memory_space<vmem>>, vector<1x16x128xf32>,
    %71 = vector.broadcast %58 : vector<16x1xf32> to vector<16x128xf32>
    %72 = arith.mulf %9, %71 : vector<16x128xf32>
    %73 = vector.broadcast %61 : vector<16x1xf32> to vector<16x128xf32>
    %74 = arith.addf %72, %73 : vector<16x128xf32>
    %cst_43 = arith.constant 0.000000e+00 : f32
    %75 = vector.broadcast %cst_43 : f32 to vector<16x128xf32>
    %76 = arith.maximumf %74, %75 : vector<16x128xf32>
    %c1_44 = arith.constant 1 : index
    %c0_45 = arith.constant 0 : index
    %c0_46 = arith.constant 0 : index
    %77 = vector.load %arg5[%c1_44, %c0_45, %c0_46] : memref<4x16x128xf32, #tpu.memory_space<vmem>>, vector<1x16x128xf32>
    %78 = vector.shape_cast %77 : vector<1x16x128xf32> to vector<16x128xf32>
    %79 = vector.shape_cast %76 : vector<16x128xf32> to vector<1x16x128xf32>
    tpu.vector_store %arg5[%c1_44, %c0_45, %c0_46], %79 {strides = array<i32>} : memref<4x16x128xf32, #tpu.memory_space<vmem>>, vector<1x16x128xf32>,
    %80 = vector.broadcast %58 : vector<16x1xf32> to vector<16x128xf32>
    %81 = arith.mulf %14, %80 : vector<16x128xf32>
    %82 = vector.broadcast %61 : vector<16x1xf32> to vector<16x128xf32>
    %83 = arith.addf %81, %82 : vector<16x128xf32>
    %cst_47 = arith.constant 0.000000e+00 : f32
    %84 = vector.broadcast %cst_47 : f32 to vector<16x128xf32>
    %85 = arith.maximumf %83, %84 : vector<16x128xf32>
    %c2_48 = arith.constant 2 : index
    %c0_49 = arith.constant 0 : index
    %c0_50 = arith.constant 0 : index
    %86 = vector.load %arg5[%c2_48, %c0_49, %c0_50] : memref<4x16x128xf32, #tpu.memory_space<vmem>>, vector<1x16x128xf32>
    %87 = vector.shape_cast %86 : vector<1x16x128xf32> to vector<16x128xf32>
    %88 = vector.shape_cast %85 : vector<16x128xf32> to vector<1x16x128xf32>
    tpu.vector_store %arg5[%c2_48, %c0_49, %c0_50], %88 {strides = array<i32>} : memref<4x16x128xf32, #tpu.memory_space<vmem>>, vector<1x16x128xf32>,
    %89 = vector.broadcast %58 : vector<16x1xf32> to vector<16x128xf32>
    %90 = arith.mulf %19, %89 : vector<16x128xf32>
    %91 = vector.broadcast %61 : vector<16x1xf32> to vector<16x128xf32>
    %92 = arith.addf %90, %91 : vector<16x128xf32>
    %cst_51 = arith.constant 0.000000e+00 : f32
    %93 = vector.broadcast %cst_51 : f32 to vector<16x128xf32>
    %94 = arith.maximumf %92, %93 : vector<16x128xf32>
    %c3_52 = arith.constant 3 : index
    %c0_53 = arith.constant 0 : index
    %c0_54 = arith.constant 0 : index
    %95 = vector.load %arg5[%c3_52, %c0_53, %c0_54] : memref<4x16x128xf32, #tpu.memory_space<vmem>>, vector<1x16x128xf32>
    %96 = vector.shape_cast %95 : vector<1x16x128xf32> to vector<16x128xf32>
    %97 = vector.shape_cast %94 : vector<16x128xf32> to vector<1x16x128xf32>
    tpu.vector_store %arg5[%c3_52, %c0_53, %c0_54], %97 {strides = array<i32>} : memref<4x16x128xf32, #tpu.memory_space<vmem>>, vector<1x16x128xf32>,
    return
  }
  func.func @transform_0(%arg0: i32) -> (i32, i32, i32) {
    %c0_i32 = arith.constant 0 : i32
    %c0_i32_0 = arith.constant 0 : i32
    %c0_i32_1 = arith.constant 0 : i32
    %c0_i32_2 = arith.constant 0 : i32
    return %c0_i32, %c0_i32_0, %c0_i32_1 : i32, i32, i32
  }
  func.func @transform_1(%arg0: i32) -> (i32, i32, i32) {
    %c0_i32 = arith.constant 0 : i32
    %c0_i32_0 = arith.constant 0 : i32
    %c0_i32_1 = arith.constant 0 : i32
    %c0_i32_2 = arith.constant 0 : i32
    return %c0_i32, %c0_i32_0, %c0_i32_1 : i32, i32, i32
  }
  func.func @transform_2(%arg0: i32) -> (i32, i32) {
    %c0_i32 = arith.constant 0 : i32
    %c0_i32_0 = arith.constant 0 : i32
    %c0_i32_1 = arith.constant 0 : i32
    return %c0_i32, %c0_i32_0 : i32, i32
  }
  func.func @transform_3(%arg0: i32) -> (i32, i32) {
    %c0_i32 = arith.constant 0 : i32
    %c0_i32_0 = arith.constant 0 : i32
    %c0_i32_1 = arith.constant 0 : i32
    return %c0_i32, %c0_i32_0 : i32, i32
  }
  func.func @transform_4(%arg0: i32) -> (i32, i32, i32) {
    %c0_i32 = arith.constant 0 : i32
    %c0_i32_0 = arith.constant 0 : i32
    %c0_i32_1 = arith.constant 0 : i32
    %c0_i32_2 = arith.constant 0 : i32
    return %c0_i32, %c0_i32_0, %c0_i32_1 : i32, i32, i32
  }
}

module attributes {stable_mosaic.version = 11 : i64} {
  func.func @_fused_layer_kernel(%arg0: i32, %arg1: memref<4x64x512xbf16, #tpu.memory_space<vmem>>, %arg2: memref<4x8x64xbf16, #tpu.memory_space<vmem>>, %arg3: memref<8x1xf32, #tpu.memory_space<vmem>>, %arg4: memref<8x1xf32, #tpu.memory_space<vmem>>, %arg5: memref<4x8x512xf32, #tpu.memory_space<vmem>>) attributes {dimension_semantics = [#tpu.dimension_semantics<arbitrary>], iteration_bounds = array<i64: 1>, scalar_prefetch = 0 : i64, scratch_operands = 0 : i64, tpu.core_type = #tpu.core_type<tc>, window_params = [{pipeline_mode = #tpu.pipeline_mode<synchronous>, transform_indices = @transform_0, window_bounds = array<i64: 4, 64, 512>}, {pipeline_mode = #tpu.pipeline_mode<synchronous>, transform_indices = @transform_1, window_bounds = array<i64: 4, 8, 64>}, {pipeline_mode = #tpu.pipeline_mode<synchronous>, transform_indices = @transform_2, window_bounds = array<i64: 8, 1>}, {pipeline_mode = #tpu.pipeline_mode<synchronous>, transform_indices = @transform_3, window_bounds = array<i64: 8, 1>}, {pipeline_mode = #tpu.pipeline_mode<synchronous>, transform_indices = @transform_4, window_bounds = array<i64: 4, 8, 512>}]} {
    %c0 = arith.constant 0 : index
    %c0_0 = arith.constant 0 : index
    %c0_1 = arith.constant 0 : index
    %0 = vector.load %arg2[%c0, %c0_0, %c0_1] : memref<4x8x64xbf16, #tpu.memory_space<vmem>>, vector<1x8x64xbf16>
    %1 = vector.shape_cast %0 : vector<1x8x64xbf16> to vector<8x64xbf16>
    %c0_2 = arith.constant 0 : index
    %c0_3 = arith.constant 0 : index
    %c0_4 = arith.constant 0 : index
    %2 = vector.load %arg1[%c0_2, %c0_3, %c0_4] : memref<4x64x512xbf16, #tpu.memory_space<vmem>>, vector<1x64x512xbf16>
    %3 = vector.shape_cast %2 : vector<1x64x512xbf16> to vector<64x512xbf16>
    %cst = arith.constant dense<0.000000e+00> : vector<8x512xf32>
    %4 = tpu.matmul %1, %3, %cst {dimension_numbers = #tpu.dot_dimension_numbers<[1], [0], [0], [1], [0, 0, 1, 1], [], []>} : vector<8x64xbf16>, vector<64x512xbf16>, vector<8x512xf32> -> vector<8x512xf32>
    %c1 = arith.constant 1 : index
    %c0_5 = arith.constant 0 : index
    %c0_6 = arith.constant 0 : index
    %5 = vector.load %arg2[%c1, %c0_5, %c0_6] : memref<4x8x64xbf16, #tpu.memory_space<vmem>>, vector<1x8x64xbf16>
    %6 = vector.shape_cast %5 : vector<1x8x64xbf16> to vector<8x64xbf16>
    %c1_7 = arith.constant 1 : index
    %c0_8 = arith.constant 0 : index
    %c0_9 = arith.constant 0 : index
    %7 = vector.load %arg1[%c1_7, %c0_8, %c0_9] : memref<4x64x512xbf16, #tpu.memory_space<vmem>>, vector<1x64x512xbf16>
    %8 = vector.shape_cast %7 : vector<1x64x512xbf16> to vector<64x512xbf16>
    %cst_10 = arith.constant dense<0.000000e+00> : vector<8x512xf32>
    %9 = tpu.matmul %6, %8, %cst_10 {dimension_numbers = #tpu.dot_dimension_numbers<[1], [0], [0], [1], [0, 0, 1, 1], [], []>} : vector<8x64xbf16>, vector<64x512xbf16>, vector<8x512xf32> -> vector<8x512xf32>
    %c2 = arith.constant 2 : index
    %c0_11 = arith.constant 0 : index
    %c0_12 = arith.constant 0 : index
    %10 = vector.load %arg2[%c2, %c0_11, %c0_12] : memref<4x8x64xbf16, #tpu.memory_space<vmem>>, vector<1x8x64xbf16>
    %11 = vector.shape_cast %10 : vector<1x8x64xbf16> to vector<8x64xbf16>
    %c2_13 = arith.constant 2 : index
    %c0_14 = arith.constant 0 : index
    %c0_15 = arith.constant 0 : index
    %12 = vector.load %arg1[%c2_13, %c0_14, %c0_15] : memref<4x64x512xbf16, #tpu.memory_space<vmem>>, vector<1x64x512xbf16>
    %13 = vector.shape_cast %12 : vector<1x64x512xbf16> to vector<64x512xbf16>
    %cst_16 = arith.constant dense<0.000000e+00> : vector<8x512xf32>
    %14 = tpu.matmul %11, %13, %cst_16 {dimension_numbers = #tpu.dot_dimension_numbers<[1], [0], [0], [1], [0, 0, 1, 1], [], []>} : vector<8x64xbf16>, vector<64x512xbf16>, vector<8x512xf32> -> vector<8x512xf32>
    %c3 = arith.constant 3 : index
    %c0_17 = arith.constant 0 : index
    %c0_18 = arith.constant 0 : index
    %15 = vector.load %arg2[%c3, %c0_17, %c0_18] : memref<4x8x64xbf16, #tpu.memory_space<vmem>>, vector<1x8x64xbf16>
    %16 = vector.shape_cast %15 : vector<1x8x64xbf16> to vector<8x64xbf16>
    %c3_19 = arith.constant 3 : index
    %c0_20 = arith.constant 0 : index
    %c0_21 = arith.constant 0 : index
    %17 = vector.load %arg1[%c3_19, %c0_20, %c0_21] : memref<4x64x512xbf16, #tpu.memory_space<vmem>>, vector<1x64x512xbf16>
    %18 = vector.shape_cast %17 : vector<1x64x512xbf16> to vector<64x512xbf16>
    %cst_22 = arith.constant dense<0.000000e+00> : vector<8x512xf32>
    %19 = tpu.matmul %16, %18, %cst_22 {dimension_numbers = #tpu.dot_dimension_numbers<[1], [0], [0], [1], [0, 0, 1, 1], [], []>} : vector<8x64xbf16>, vector<64x512xbf16>, vector<8x512xf32> -> vector<8x512xf32>
    %cst_23 = arith.constant dense<0.000000e+00> : vector<8xf32>
    %20 = vector.multi_reduction <add>, %4, %cst_23 [1] : vector<8x512xf32> to vector<8xf32>
    %21 = vector.shape_cast %20 : vector<8xf32> to vector<8x1xf32>
    %22 = arith.mulf %4, %4 : vector<8x512xf32>
    %cst_24 = arith.constant dense<0.000000e+00> : vector<8xf32>
    %23 = vector.multi_reduction <add>, %22, %cst_24 [1] : vector<8x512xf32> to vector<8xf32>
    %24 = vector.shape_cast %23 : vector<8xf32> to vector<8x1xf32>
    %cst_25 = arith.constant dense<0.000000e+00> : vector<8xf32>
    %25 = vector.multi_reduction <add>, %9, %cst_25 [1] : vector<8x512xf32> to vector<8xf32>
    %26 = vector.shape_cast %25 : vector<8xf32> to vector<8x1xf32>
    %27 = arith.addf %21, %26 : vector<8x1xf32>
    %28 = arith.mulf %9, %9 : vector<8x512xf32>
    %cst_26 = arith.constant dense<0.000000e+00> : vector<8xf32>
    %29 = vector.multi_reduction <add>, %28, %cst_26 [1] : vector<8x512xf32> to vector<8xf32>
    %30 = vector.shape_cast %29 : vector<8xf32> to vector<8x1xf32>
    %31 = arith.addf %24, %30 : vector<8x1xf32>
    %cst_27 = arith.constant dense<0.000000e+00> : vector<8xf32>
    %32 = vector.multi_reduction <add>, %14, %cst_27 [1] : vector<8x512xf32> to vector<8xf32>
    %33 = vector.shape_cast %32 : vector<8xf32> to vector<8x1xf32>
    %34 = arith.addf %27, %33 : vector<8x1xf32>
    %35 = arith.mulf %14, %14 : vector<8x512xf32>
    %cst_28 = arith.constant dense<0.000000e+00> : vector<8xf32>
    %36 = vector.multi_reduction <add>, %35, %cst_28 [1] : vector<8x512xf32> to vector<8xf32>
    %37 = vector.shape_cast %36 : vector<8xf32> to vector<8x1xf32>
    %38 = arith.addf %31, %37 : vector<8x1xf32>
    %cst_29 = arith.constant dense<0.000000e+00> : vector<8xf32>
    %39 = vector.multi_reduction <add>, %19, %cst_29 [1] : vector<8x512xf32> to vector<8xf32>
    %40 = vector.shape_cast %39 : vector<8xf32> to vector<8x1xf32>
    %41 = arith.addf %34, %40 : vector<8x1xf32>
    %42 = arith.mulf %19, %19 : vector<8x512xf32>
    %cst_30 = arith.constant dense<0.000000e+00> : vector<8xf32>
    %43 = vector.multi_reduction <add>, %42, %cst_30 [1] : vector<8x512xf32> to vector<8xf32>
    %44 = vector.shape_cast %43 : vector<8xf32> to vector<8x1xf32>
    %45 = arith.addf %38, %44 : vector<8x1xf32>
    %cst_31 = arith.constant 4.8828125E-4 : f32
    %46 = vector.broadcast %cst_31 : f32 to vector<8x1xf32>
    %47 = arith.mulf %41, %46 : vector<8x1xf32>
    %cst_32 = arith.constant 4.8828125E-4 : f32
    %48 = vector.broadcast %cst_32 : f32 to vector<8x1xf32>
    %49 = arith.mulf %45, %48 : vector<8x1xf32>
    %50 = arith.mulf %47, %47 : vector<8x1xf32>
    %51 = arith.subf %49, %50 : vector<8x1xf32>
    %cst_33 = arith.constant 0.000000e+00 : f32
    %52 = vector.broadcast %cst_33 : f32 to vector<8x1xf32>
    %53 = arith.maximumf %51, %52 : vector<8x1xf32>
    %c0_34 = arith.constant 0 : index
    %c0_35 = arith.constant 0 : index
    %54 = vector.load %arg3[%c0_34, %c0_35] : memref<8x1xf32, #tpu.memory_space<vmem>>, vector<8x1xf32>
    %cst_36 = arith.constant 9.99999974E-6 : f32
    %55 = vector.broadcast %cst_36 : f32 to vector<8x1xf32>
    %56 = arith.addf %53, %55 : vector<8x1xf32>
    %57 = math.rsqrt %56 : vector<8x1xf32>
    %58 = arith.mulf %54, %57 : vector<8x1xf32>
    %c0_37 = arith.constant 0 : index
    %c0_38 = arith.constant 0 : index
    %59 = vector.load %arg4[%c0_37, %c0_38] : memref<8x1xf32, #tpu.memory_space<vmem>>, vector<8x1xf32>
    %60 = arith.mulf %47, %58 : vector<8x1xf32>
    %61 = arith.subf %59, %60 : vector<8x1xf32>
    %62 = vector.broadcast %58 : vector<8x1xf32> to vector<8x512xf32>
    %63 = arith.mulf %4, %62 : vector<8x512xf32>
    %64 = vector.broadcast %61 : vector<8x1xf32> to vector<8x512xf32>
    %65 = arith.addf %63, %64 : vector<8x512xf32>
    %cst_39 = arith.constant 0.000000e+00 : f32
    %66 = vector.broadcast %cst_39 : f32 to vector<8x512xf32>
    %67 = arith.maximumf %65, %66 : vector<8x512xf32>
    %c0_40 = arith.constant 0 : index
    %c0_41 = arith.constant 0 : index
    %c0_42 = arith.constant 0 : index
    %68 = vector.load %arg5[%c0_40, %c0_41, %c0_42] : memref<4x8x512xf32, #tpu.memory_space<vmem>>, vector<1x8x512xf32>
    %69 = vector.shape_cast %68 : vector<1x8x512xf32> to vector<8x512xf32>
    %70 = vector.shape_cast %67 : vector<8x512xf32> to vector<1x8x512xf32>
    tpu.vector_store %arg5[%c0_40, %c0_41, %c0_42], %70 {strides = array<i32>} : memref<4x8x512xf32, #tpu.memory_space<vmem>>, vector<1x8x512xf32>,
    %71 = vector.broadcast %58 : vector<8x1xf32> to vector<8x512xf32>
    %72 = arith.mulf %9, %71 : vector<8x512xf32>
    %73 = vector.broadcast %61 : vector<8x1xf32> to vector<8x512xf32>
    %74 = arith.addf %72, %73 : vector<8x512xf32>
    %cst_43 = arith.constant 0.000000e+00 : f32
    %75 = vector.broadcast %cst_43 : f32 to vector<8x512xf32>
    %76 = arith.maximumf %74, %75 : vector<8x512xf32>
    %c1_44 = arith.constant 1 : index
    %c0_45 = arith.constant 0 : index
    %c0_46 = arith.constant 0 : index
    %77 = vector.load %arg5[%c1_44, %c0_45, %c0_46] : memref<4x8x512xf32, #tpu.memory_space<vmem>>, vector<1x8x512xf32>
    %78 = vector.shape_cast %77 : vector<1x8x512xf32> to vector<8x512xf32>
    %79 = vector.shape_cast %76 : vector<8x512xf32> to vector<1x8x512xf32>
    tpu.vector_store %arg5[%c1_44, %c0_45, %c0_46], %79 {strides = array<i32>} : memref<4x8x512xf32, #tpu.memory_space<vmem>>, vector<1x8x512xf32>,
    %80 = vector.broadcast %58 : vector<8x1xf32> to vector<8x512xf32>
    %81 = arith.mulf %14, %80 : vector<8x512xf32>
    %82 = vector.broadcast %61 : vector<8x1xf32> to vector<8x512xf32>
    %83 = arith.addf %81, %82 : vector<8x512xf32>
    %cst_47 = arith.constant 0.000000e+00 : f32
    %84 = vector.broadcast %cst_47 : f32 to vector<8x512xf32>
    %85 = arith.maximumf %83, %84 : vector<8x512xf32>
    %c2_48 = arith.constant 2 : index
    %c0_49 = arith.constant 0 : index
    %c0_50 = arith.constant 0 : index
    %86 = vector.load %arg5[%c2_48, %c0_49, %c0_50] : memref<4x8x512xf32, #tpu.memory_space<vmem>>, vector<1x8x512xf32>
    %87 = vector.shape_cast %86 : vector<1x8x512xf32> to vector<8x512xf32>
    %88 = vector.shape_cast %85 : vector<8x512xf32> to vector<1x8x512xf32>
    tpu.vector_store %arg5[%c2_48, %c0_49, %c0_50], %88 {strides = array<i32>} : memref<4x8x512xf32, #tpu.memory_space<vmem>>, vector<1x8x512xf32>,
    %89 = vector.broadcast %58 : vector<8x1xf32> to vector<8x512xf32>
    %90 = arith.mulf %19, %89 : vector<8x512xf32>
    %91 = vector.broadcast %61 : vector<8x1xf32> to vector<8x512xf32>
    %92 = arith.addf %90, %91 : vector<8x512xf32>
    %cst_51 = arith.constant 0.000000e+00 : f32
    %93 = vector.broadcast %cst_51 : f32 to vector<8x512xf32>
    %94 = arith.maximumf %92, %93 : vector<8x512xf32>
    %c3_52 = arith.constant 3 : index
    %c0_53 = arith.constant 0 : index
    %c0_54 = arith.constant 0 : index
    %95 = vector.load %arg5[%c3_52, %c0_53, %c0_54] : memref<4x8x512xf32, #tpu.memory_space<vmem>>, vector<1x8x512xf32>
    %96 = vector.shape_cast %95 : vector<1x8x512xf32> to vector<8x512xf32>
    %97 = vector.shape_cast %94 : vector<8x512xf32> to vector<1x8x512xf32>
    tpu.vector_store %arg5[%c3_52, %c0_53, %c0_54], %97 {strides = array<i32>} : memref<4x8x512xf32, #tpu.memory_space<vmem>>, vector<1x8x512xf32>,
    return
  }
  func.func @transform_0(%arg0: i32) -> (i32, i32, i32) {
    %c0_i32 = arith.constant 0 : i32
    %c0_i32_0 = arith.constant 0 : i32
    %c0_i32_1 = arith.constant 0 : i32
    %c0_i32_2 = arith.constant 0 : i32
    return %c0_i32, %c0_i32_0, %c0_i32_1 : i32, i32, i32
  }
  func.func @transform_1(%arg0: i32) -> (i32, i32, i32) {
    %c0_i32 = arith.constant 0 : i32
    %c0_i32_0 = arith.constant 0 : i32
    %c0_i32_1 = arith.constant 0 : i32
    %c0_i32_2 = arith.constant 0 : i32
    return %c0_i32, %c0_i32_0, %c0_i32_1 : i32, i32, i32
  }
  func.func @transform_2(%arg0: i32) -> (i32, i32) {
    %c0_i32 = arith.constant 0 : i32
    %c0_i32_0 = arith.constant 0 : i32
    %c0_i32_1 = arith.constant 0 : i32
    return %c0_i32, %c0_i32_0 : i32, i32
  }
  func.func @transform_3(%arg0: i32) -> (i32, i32) {
    %c0_i32 = arith.constant 0 : i32
    %c0_i32_0 = arith.constant 0 : i32
    %c0_i32_1 = arith.constant 0 : i32
    return %c0_i32, %c0_i32_0 : i32, i32
  }
  func.func @transform_4(%arg0: i32) -> (i32, i32, i32) {
    %c0_i32 = arith.constant 0 : i32
    %c0_i32_0 = arith.constant 0 : i32
    %c0_i32_1 = arith.constant 0 : i32
    %c0_i32_2 = arith.constant 0 : i32
    return %c0_i32, %c0_i32_0, %c0_i32_1 : i32, i32, i32
  }
}

module attributes {stable_mosaic.version = 11 : i64} {
  func.func @_fused_layer_kernel(%arg0: i32, %arg1: memref<4x32x2048xbf16, #tpu.memory_space<vmem>>, %arg2: memref<4x3x32xbf16, #tpu.memory_space<vmem>>, %arg3: memref<3x1xf32, #tpu.memory_space<vmem>>, %arg4: memref<3x1xf32, #tpu.memory_space<vmem>>, %arg5: memref<4x3x2048xf32, #tpu.memory_space<vmem>>) attributes {dimension_semantics = [#tpu.dimension_semantics<arbitrary>], iteration_bounds = array<i64: 1>, scalar_prefetch = 0 : i64, scratch_operands = 0 : i64, tpu.core_type = #tpu.core_type<tc>, window_params = [{pipeline_mode = #tpu.pipeline_mode<synchronous>, transform_indices = @transform_0, window_bounds = array<i64: 4, 32, 2048>}, {pipeline_mode = #tpu.pipeline_mode<synchronous>, transform_indices = @transform_1, window_bounds = array<i64: 4, 3, 32>}, {pipeline_mode = #tpu.pipeline_mode<synchronous>, transform_indices = @transform_2, window_bounds = array<i64: 3, 1>}, {pipeline_mode = #tpu.pipeline_mode<synchronous>, transform_indices = @transform_3, window_bounds = array<i64: 3, 1>}, {pipeline_mode = #tpu.pipeline_mode<synchronous>, transform_indices = @transform_4, window_bounds = array<i64: 4, 3, 2048>}]} {
    %c0 = arith.constant 0 : index
    %c0_0 = arith.constant 0 : index
    %c0_1 = arith.constant 0 : index
    %0 = vector.load %arg2[%c0, %c0_0, %c0_1] : memref<4x3x32xbf16, #tpu.memory_space<vmem>>, vector<1x3x32xbf16>
    %1 = vector.shape_cast %0 : vector<1x3x32xbf16> to vector<3x32xbf16>
    %c0_2 = arith.constant 0 : index
    %c0_3 = arith.constant 0 : index
    %c0_4 = arith.constant 0 : index
    %2 = vector.load %arg1[%c0_2, %c0_3, %c0_4] : memref<4x32x2048xbf16, #tpu.memory_space<vmem>>, vector<1x32x2048xbf16>
    %3 = vector.shape_cast %2 : vector<1x32x2048xbf16> to vector<32x2048xbf16>
    %cst = arith.constant dense<0.000000e+00> : vector<3x2048xf32>
    %4 = tpu.matmul %1, %3, %cst {dimension_numbers = #tpu.dot_dimension_numbers<[1], [0], [0], [1], [0, 0, 1, 1], [], []>} : vector<3x32xbf16>, vector<32x2048xbf16>, vector<3x2048xf32> -> vector<3x2048xf32>
    %c1 = arith.constant 1 : index
    %c0_5 = arith.constant 0 : index
    %c0_6 = arith.constant 0 : index
    %5 = vector.load %arg2[%c1, %c0_5, %c0_6] : memref<4x3x32xbf16, #tpu.memory_space<vmem>>, vector<1x3x32xbf16>
    %6 = vector.shape_cast %5 : vector<1x3x32xbf16> to vector<3x32xbf16>
    %c1_7 = arith.constant 1 : index
    %c0_8 = arith.constant 0 : index
    %c0_9 = arith.constant 0 : index
    %7 = vector.load %arg1[%c1_7, %c0_8, %c0_9] : memref<4x32x2048xbf16, #tpu.memory_space<vmem>>, vector<1x32x2048xbf16>
    %8 = vector.shape_cast %7 : vector<1x32x2048xbf16> to vector<32x2048xbf16>
    %cst_10 = arith.constant dense<0.000000e+00> : vector<3x2048xf32>
    %9 = tpu.matmul %6, %8, %cst_10 {dimension_numbers = #tpu.dot_dimension_numbers<[1], [0], [0], [1], [0, 0, 1, 1], [], []>} : vector<3x32xbf16>, vector<32x2048xbf16>, vector<3x2048xf32> -> vector<3x2048xf32>
    %c2 = arith.constant 2 : index
    %c0_11 = arith.constant 0 : index
    %c0_12 = arith.constant 0 : index
    %10 = vector.load %arg2[%c2, %c0_11, %c0_12] : memref<4x3x32xbf16, #tpu.memory_space<vmem>>, vector<1x3x32xbf16>
    %11 = vector.shape_cast %10 : vector<1x3x32xbf16> to vector<3x32xbf16>
    %c2_13 = arith.constant 2 : index
    %c0_14 = arith.constant 0 : index
    %c0_15 = arith.constant 0 : index
    %12 = vector.load %arg1[%c2_13, %c0_14, %c0_15] : memref<4x32x2048xbf16, #tpu.memory_space<vmem>>, vector<1x32x2048xbf16>
    %13 = vector.shape_cast %12 : vector<1x32x2048xbf16> to vector<32x2048xbf16>
    %cst_16 = arith.constant dense<0.000000e+00> : vector<3x2048xf32>
    %14 = tpu.matmul %11, %13, %cst_16 {dimension_numbers = #tpu.dot_dimension_numbers<[1], [0], [0], [1], [0, 0, 1, 1], [], []>} : vector<3x32xbf16>, vector<32x2048xbf16>, vector<3x2048xf32> -> vector<3x2048xf32>
    %c3 = arith.constant 3 : index
    %c0_17 = arith.constant 0 : index
    %c0_18 = arith.constant 0 : index
    %15 = vector.load %arg2[%c3, %c0_17, %c0_18] : memref<4x3x32xbf16, #tpu.memory_space<vmem>>, vector<1x3x32xbf16>
    %16 = vector.shape_cast %15 : vector<1x3x32xbf16> to vector<3x32xbf16>
    %c3_19 = arith.constant 3 : index
    %c0_20 = arith.constant 0 : index
    %c0_21 = arith.constant 0 : index
    %17 = vector.load %arg1[%c3_19, %c0_20, %c0_21] : memref<4x32x2048xbf16, #tpu.memory_space<vmem>>, vector<1x32x2048xbf16>
    %18 = vector.shape_cast %17 : vector<1x32x2048xbf16> to vector<32x2048xbf16>
    %cst_22 = arith.constant dense<0.000000e+00> : vector<3x2048xf32>
    %19 = tpu.matmul %16, %18, %cst_22 {dimension_numbers = #tpu.dot_dimension_numbers<[1], [0], [0], [1], [0, 0, 1, 1], [], []>} : vector<3x32xbf16>, vector<32x2048xbf16>, vector<3x2048xf32> -> vector<3x2048xf32>
    %20 = math.tanh %4 : vector<3x2048xf32>
    %c0_23 = arith.constant 0 : index
    %c0_24 = arith.constant 0 : index
    %c0_25 = arith.constant 0 : index
    %21 = vector.load %arg5[%c0_23, %c0_24, %c0_25] : memref<4x3x2048xf32, #tpu.memory_space<vmem>>, vector<1x3x2048xf32>
    %22 = vector.shape_cast %21 : vector<1x3x2048xf32> to vector<3x2048xf32>
    %23 = vector.shape_cast %20 : vector<3x2048xf32> to vector<1x3x2048xf32>
    tpu.vector_store %arg5[%c0_23, %c0_24, %c0_25], %23 {strides = array<i32>} : memref<4x3x2048xf32, #tpu.memory_space<vmem>>, vector<1x3x2048xf32>,
    %24 = math.tanh %9 : vector<3x2048xf32>
    %c1_26 = arith.constant 1 : index
    %c0_27 = arith.constant 0 : index
    %c0_28 = arith.constant 0 : index
    %25 = vector.load %arg5[%c1_26, %c0_27, %c0_28] : memref<4x3x2048xf32, #tpu.memory_space<vmem>>, vector<1x3x2048xf32>
    %26 = vector.shape_cast %25 : vector<1x3x2048xf32> to vector<3x2048xf32>
    %27 = vector.shape_cast %24 : vector<3x2048xf32> to vector<1x3x2048xf32>
    tpu.vector_store %arg5[%c1_26, %c0_27, %c0_28], %27 {strides = array<i32>} : memref<4x3x2048xf32, #tpu.memory_space<vmem>>, vector<1x3x2048xf32>,
    %28 = math.tanh %14 : vector<3x2048xf32>
    %c2_29 = arith.constant 2 : index
    %c0_30 = arith.constant 0 : index
    %c0_31 = arith.constant 0 : index
    %29 = vector.load %arg5[%c2_29, %c0_30, %c0_31] : memref<4x3x2048xf32, #tpu.memory_space<vmem>>, vector<1x3x2048xf32>
    %30 = vector.shape_cast %29 : vector<1x3x2048xf32> to vector<3x2048xf32>
    %31 = vector.shape_cast %28 : vector<3x2048xf32> to vector<1x3x2048xf32>
    tpu.vector_store %arg5[%c2_29, %c0_30, %c0_31], %31 {strides = array<i32>} : memref<4x3x2048xf32, #tpu.memory_space<vmem>>, vector<1x3x2048xf32>,
    %32 = math.tanh %19 : vector<3x2048xf32>
    %c3_32 = arith.constant 3 : index
    %c0_33 = arith.constant 0 : index
    %c0_34 = arith.constant 0 : index
    %33 = vector.load %arg5[%c3_32, %c0_33, %c0_34] : memref<4x3x2048xf32, #tpu.memory_space<vmem>>, vector<1x3x2048xf32>
    %34 = vector.shape_cast %33 : vector<1x3x2048xf32> to vector<3x2048xf32>
    %35 = vector.shape_cast %32 : vector<3x2048xf32> to vector<1x3x2048xf32>
    tpu.vector_store %arg5[%c3_32, %c0_33, %c0_34], %35 {strides = array<i32>} : memref<4x3x2048xf32, #tpu.memory_space<vmem>>, vector<1x3x2048xf32>,
    return
  }
  func.func @transform_0(%arg0: i32) -> (i32, i32, i32) {
    %c0_i32 = arith.constant 0 : i32
    %c0_i32_0 = arith.constant 0 : i32
    %c0_i32_1 = arith.constant 0 : i32
    %c0_i32_2 = arith.constant 0 : i32
    return %c0_i32, %c0_i32_0, %c0_i32_1 : i32, i32, i32
  }
  func.func @transform_1(%arg0: i32) -> (i32, i32, i32) {
    %c0_i32 = arith.constant 0 : i32
    %c0_i32_0 = arith.constant 0 : i32
    %c0_i32_1 = arith.constant 0 : i32
    %c0_i32_2 = arith.constant 0 : i32
    return %c0_i32, %c0_i32_0, %c0_i32_1 : i32, i32, i32
  }
  func.func @transform_2(%arg0: i32) -> (i32, i32) {
    %c0_i32 = arith.constant 0 : i32
    %c0_i32_0 = arith.constant 0 : i32
    %c0_i32_1 = arith.constant 0 : i32
    return %c0_i32, %c0_i32_0 : i32, i32
  }
  func.func @transform_3(%arg0: i32) -> (i32, i32) {
    %c0_i32 = arith.constant 0 : i32
    %c0_i32_0 = arith.constant 0 : i32
    %c0_i32_1 = arith.constant 0 : i32
    return %c0_i32, %c0_i32_0 : i32, i32
  }
  func.func @transform_4(%arg0: i32) -> (i32, i32, i32) {
    %c0_i32 = arith.constant 0 : i32
    %c0_i32_0 = arith.constant 0 : i32
    %c0_i32_1 = arith.constant 0 : i32
    %c0_i32_2 = arith.constant 0 : i32
    return %c0_i32, %c0_i32_0, %c0_i32_1 : i32, i32, i32
  }
}

</mosaic_0001>

<bundles_post_ra>
// kernel: inner_generator_forward.5
= control target key start
LH: loop header
LB: loop body
LE: loop exit
PB: predicated region body
PF: predicated region fallthrough
CT: control target
= control target key end

     0   :  { %vm420_vm0 = vcmask 261120   ;;  %s1168_s0 = inlined_call_operand.vmem [shape: bf16[1,384,32], index: 0, kind: input, shape index: {}]   ;;  %s1169_s1 = inlined_call_operand.vmem [shape: bf16[1,64,384], index: 1, kind: input, shape index: {}]   ;;  %s1170_s2 = inlined_call_operand.vmem [shape: f32[64,1], index: 2, kind: input, shape index: {}]   ;;  %s1171_s3 = inlined_call_operand.vmem [shape: f32[64,1], index: 3, kind: input, shape index: {}]   ;;  %s1172_s4 = inlined_call_operand.vmem [shape: f32[1,64,32], index: 4, kind: output, shape index: {}]  }
   0x1   :  { %v804_v0 = vld [vmem:[%s1168_s0 + $0x40] sm:$0xff]   ;;  %v807_v3 = vld [vmem:[%s1168_s0 + $0x48] sm:$0xff]   ;;  %v810_v6 = vld [vmem:[%s1168_s0 + $0x50] sm:$0xff]  }
   0x2   :  { %v805_v1 = vld [vmem:[%s1168_s0 + $0x80] sm:$0xff]   ;;  %725 = vmatprep.subr.bf16.mxu0 %v804_v0  ;;  %v808_v4 = vld [vmem:[%s1168_s0 + $0x88] sm:$0xff]   ;;  %v811_v7 = vld [vmem:[%s1168_s0 + $0x90] sm:$0xff]  }
   0x3   :  { %v806_v2 = vld [vmem:[%s1168_s0] sm:$0xff]   ;;  %777 = vmatprep.subr.bf16.mxu1 %v805_v1  ;;  %v809_v5 = vld [vmem:[%s1168_s0 + $0x8] sm:$0xff]   ;;  %v812_v8 = vld [vmem:[%s1168_s0 + $0x10] sm:$0xff]  }
   0x4   :  { %726 = vmatpush3.bf16.msra.mxu0 %v806_v2  ;;  %778 = vmatpush3.bf16.msra.mxu1 %v805_v1  ;;  %v813_v9 = vld [vmem:[%s1168_s0 + $0x58] sm:$0xff]   ;;  %v816_v12 = vld [vmem:[%s1168_s0 + $0x60] sm:$0xff]   ;;  %v819_v15 = vld [vmem:[%s1168_s0 + $0x68] sm:$0xff]  }
   0x5   :  { %727 = vmatprep.subr.bf16.mxu0 %v807_v3  ;;  %779 = vmatprep.subr.bf16.mxu1 %v808_v4  ;;  %v814_v10 = vld [vmem:[%s1168_s0 + $0x98] sm:$0xff]   ;;  %v817_v13 = vld [vmem:[%s1168_s0 + $0xa0] sm:$0xff]   ;;  %v820_v16 = vld [vmem:[%s1168_s0 + $0xa8] sm:$0xff]  }
   0x6   :  { %v815_v11 = vld [vmem:[%s1168_s0 + $0x18] sm:$0xff]   ;;  %v818_v14 = vld [vmem:[%s1168_s0 + $0x20] sm:$0xff]   ;;  %v821_v17 = vld [vmem:[%s1168_s0 + $0x28] sm:$0xff]  }
   0x7   :  { %v822_v18 = vld [vmem:[%s1168_s0 + $0x70] sm:$0xff]   ;;  %v825_v21 = vld [vmem:[%s1168_s0 + $0x78] sm:$0xff]   ;;  %v828_v26 = vld [vmem:[%s1169_s1] ss:$12 sps:$4 sm:$0xff]  }
   0x8   :  { %728 = vmatpush3.bf16.msra.mxu0 %v809_v5  ;;  %780 = vmatpush3.bf16.msra.mxu1 %v808_v4  ;;  %v823_v19 = vld [vmem:[%s1168_s0 + $0xb0] sm:$0xff]   ;;  %v826_v22 = vld [vmem:[%s1168_s0 + $0xb8] sm:$0xff]   ;;  %v832_v27 = vld [vmem:[%s1169_s1 + $0x20] ss:$12 sps:$4 sm:$0xff]  }
   0x9   :  { %729 = vmatprep.subr.bf16.mxu0 %v810_v6  ;;  %781 = vmatprep.subr.bf16.mxu1 %v811_v7  ;;  %v824_v20 = vld [vmem:[%s1168_s0 + $0x30] sm:$0xff]   ;;  %v827_v25 = vld [vmem:[%s1168_s0 + $0x38] sm:$0xff]  }
   0xa   :  { %v830_v23 = vld [vmem:[%s1169_s1 + $0x4] ss:$12 sps:$4 sm:$0xff]   ;;  %v831_v24 = vld [vmem:[%s1169_s1 + $0x8] ss:$12 sps:$4 sm:$0xff]   ;;  %v841_v34 = vld [vmem:[%s1169_s1 + $0x4c] ss:$12 sps:$4 sm:$0xff]  }
   0xb   :  { %322 = vmatprep.mubr.bf16.mxu0 %v830_v23  ;;  %793 = vmatprep.mubr.bf16.mxu1 %v831_v24  ;;  %v833_v28 = vld [vmem:[%s1169_s1 + $0x1c] ss:$12 sps:$4 sm:$0xff]   ;;  %v839_v29 = vld [vmem:[%s1169_s1 + $0x38] ss:$12 sps:$4 sm:$0xff]   ;;  %v836_v32 = vld [vmem:[%s1169_s1 + $0x34] ss:$12 sps:$4 sm:$0xff]  }
   0xc   :  { %730 = vmatpush3.bf16.msra.mxu0 %v812_v8  ;;  %782 = vmatpush3.bf16.msra.mxu1 %v811_v7  ;;  %v835_v30 = vld [vmem:[%s1169_s1 + $0x18] ss:$12 sps:$4 sm:$0xff]   ;;  %v840_v31 = vld [vmem:[%s1169_s1 + $0x50] ss:$12 sps:$4 sm:$0xff]   ;;  %v843_v35 = vld [vmem:[%s1169_s1 + $0x48] ss:$12 sps:$4 sm:$0xff]  }
   0xd   :  { %731 = vmatprep.subr.bf16.mxu0 %v813_v9  ;;  %783 = vmatprep.subr.bf16.mxu1 %v814_v10  ;;  %v838_v33 = vld [vmem:[%s1169_s1 + $0x30] ss:$12 sps:$4 sm:$0xff]  }
  0x10   :  { %732 = vmatpush3.bf16.msra.mxu0 %v815_v11  ;;  %784 = vmatpush3.bf16.msra.mxu1 %v814_v10 }
  0x11   :  { %733 = vmatprep.subr.bf16.mxu0 %v816_v12  ;;  %785 = vmatprep.subr.bf16.mxu1 %v817_v13 }
  0x14   :  { %734 = vmatpush3.bf16.msra.mxu0 %v818_v14  ;;  %786 = vmatpush3.bf16.msra.mxu1 %v817_v13 }
  0x15   :  { %735 = vmatprep.subr.bf16.mxu0 %v819_v15  ;;  %787 = vmatprep.subr.bf16.mxu1 %v820_v16 }
  0x18   :  { %736 = vmatpush3.bf16.msra.mxu0 %v821_v17  ;;  %788 = vmatpush3.bf16.msra.mxu1 %v820_v16 }
  0x19   :  { %737 = vmatprep.subr.bf16.mxu0 %v822_v18  ;;  %789 = vmatprep.subr.bf16.mxu1 %v823_v19 }
  0x1c   :  { %738 = vmatpush3.bf16.msra.mxu0 %v824_v20  ;;  %790 = vmatpush3.bf16.msra.mxu1 %v823_v19 }
  0x1d   :  { %739 = vmatprep.subr.bf16.mxu0 %v825_v21  ;;  %791 = vmatprep.subr.bf16.mxu1 %v826_v22 }
  0x20   :  { %740 = vmatpush3.bf16.msra.mxu0 %v827_v25  ;;  %792 = vmatpush3.bf16.msra.mxu1 %v826_v22 }
  0x23   :  { %323 = vmatmul.mubr.bf16.vlgmr.msra.gmra.mrb[0].mxu0 %v828_v26  ;;  %794 = vmatmul.mubr.bf16.vlgmr.msra.gmra.mrb[0].mxu1 %v832_v27 }
  0x24   :  { %330 = vmatprep.mubr.bf16.mxu0 %v833_v28  ;;  %797 = vmatprep.mubr.bf16.mxu1 %v839_v29 }
  0x2b   :  { %331 = vmatmul.mubr.bf16.gmra.mrb[4].mxu0 %v835_v30  ;;  %798 = vmatmul.mubr.bf16.gmra.mrb[4].mxu1 %v840_v31 }
  0x2c   :  { %338 = vmatprep.mubr.bf16.mxu0 %v836_v32 }
  0x33   :  { %339 = vmatmul.mubr.bf16.gmra.mrb[8].mxu0 %v838_v33 }
  0x34   :  { %346 = vmatprep.mubr.bf16.mxu0 %v841_v34 }
  0x3b   :  { %347 = vmatmul.mubr.bf16.gmra.mrb[12].mxu0 %v843_v35 }
  0xf6   :  { %v741_v36 = vpop.f32.mrb[0].mxu0  ;;  %v795_v37 = vpop.f32.mrb[0].mxu1 }
  0xf7   :  { %v742_v38 = vpop.f32.mrb[1].mxu0  ;;  %v389_v39 = vpop.f32.mrb[1].mxu1 }
  0xf8   :  { %v743_v40 = vadd.f32 %v742_v38, %v741_v36  ;;  %v744_v41 = vpop.f32.mrb[2].mxu0  ;;  %v796_v42 = vpop.f32.mrb[2].mxu1  ;;  %v860_v36 = vmov 0  }
  0xf9   :  { %v745_v43 = vpop.f32.mrb[3].mxu0  ;;  %v392_v44 = vpop.f32.mrb[3].mxu1  ;;  %803 = vset.pattern.permute.xlu1 %v860_v36  ;;  %802 = vset.pattern.permute.xlu0 %v860_v36 }
  0xfa   :  { %v994_v45 = vadd.f32 %v743_v40, %v389_v39  ;;  %v746_v46 = vadd.f32 %v745_v43, %v744_v41 }
  0xfc   :  { %v996_v47 = vadd.f32 %v746_v46, %v392_v44  ;;  %v421_v48 = vsel %vm420_vm0, %v994_v45, 0.0  ;;  %v445_v58 = vmul.f32 %v994_v45, %v994_v45 }
  0xfd   :  { %422 = vadd.xlane.f32.xlu0 %v421_v48 }
  0xfe   :  { %v747_v49 = vpop.f32.mrb[4].mxu0  ;;  %v446_v50 = vmul.f32 %v996_v47, %v996_v47  ;;  %v799_v51 = vpop.f32.mrb[4].mxu1  ;;  %v424_v57 = vsel %vm420_vm0, %v996_v47, 0.0  ;;  %v453_v2 = vsel %vm420_vm0, %v445_v58, 0.0 }
  0xff   :  { %v748_v52 = vpop.f32.mrb[5].mxu0  ;;  %v405_v53 = vpop.f32.mrb[5].mxu1 }
 0x100   :  { %v749_v54 = vadd.f32 %v748_v52, %v747_v49  ;;  %v750_v55 = vpop.f32.mrb[6].mxu0  ;;  %v456_v56 = vsel %vm420_vm0, %v446_v50, 0.0  ;;  %v800_v59 = vpop.f32.mrb[6].mxu1 }
 0x101   :  { %v751_v60 = vpop.f32.mrb[7].mxu0  ;;  %457 = vadd.xlane.f32.xlu1 %v456_v56  ;;  %425 = vadd.xlane.f32.xlu0 %v424_v57  ;;  %v408_v61 = vpop.f32.mrb[7].mxu1 }
 0x102   :  { %v1007_v62 = vadd.f32 %v795_v37, %v749_v54  ;;  %v752_v63 = vadd.f32 %v751_v60, %v750_v55 }
 0x104   :  { %v1009_v0 = vadd.f32 %v796_v42, %v752_v63  ;;  %v427_v1 = vsel %vm420_vm0, %v1007_v62, 0.0  ;;  %v447_v3 = vmul.f32 %v1007_v62, %v1007_v62 }
 0x105   :  { %428 = vadd.xlane.f32.xlu1 %v427_v1  ;;  %454 = vadd.xlane.f32.xlu0 %v453_v2 }
 0x106   :  { %v753_v4 = vpop.f32.mrb[8].mxu0  ;;  %v430_v7 = vsel %vm420_vm0, %v1009_v0, 0.0  ;;  %v459_v8 = vsel %vm420_vm0, %v447_v3, 0.0  ;;  %v448_v10 = vmul.f32 %v1009_v0, %v1009_v0 }
 0x107   :  { %v754_v5 = vpop.f32.mrb[9].mxu0 }
 0x108   :  { %v755_v6 = vadd.f32 %v754_v5, %v753_v4  ;;  %v756_v9 = vpop.f32.mrb[10].mxu0  ;;  %v462_v15 = vsel %vm420_vm0, %v448_v10, 0.0 }
 0x109   :  { %431 = vadd.xlane.f32.xlu1 %v430_v7  ;;  %460 = vadd.xlane.f32.xlu0 %v459_v8  ;;  %v757_v11 = vpop.f32.mrb[11].mxu0 }
 0x10a   :  { %v1021_v12 = vadd.f32 %v755_v6, %v405_v53  ;;  %v758_v13 = vadd.f32 %v757_v11, %v756_v9 }
 0x10c   :  { %v1023_v14 = vadd.f32 %v758_v13, %v408_v61  ;;  %v433_v16 = vsel %vm420_vm0, %v1021_v12, 0.0  ;;  %v449_v17 = vmul.f32 %v1021_v12, %v1021_v12 }
 0x10d   :  { %463 = vadd.xlane.f32.xlu1 %v462_v15  ;;  %434 = vadd.xlane.f32.xlu0 %v433_v16 }
 0x10e   :  { %v759_v18 = vpop.f32.mrb[12].mxu0  ;;  %v436_v19 = vsel %vm420_vm0, %v1023_v14, 0.0  ;;  %v465_v20 = vsel %vm420_vm0, %v449_v17, 0.0  ;;  %v450_v21 = vmul.f32 %v1023_v14, %v1023_v14  ;;  %v518_v17 = vld [vmem:[%s1170_s2 + $0x8] sm:$0xff] }
 0x10f   :  { %v760_v22 = vpop.f32.mrb[13].mxu0 }
 0x110   :  { %v761_v23 = vadd.f32 %v760_v22, %v759_v18  ;;  %v762_v24 = vpop.f32.mrb[14].mxu0  ;;  %v468_v28 = vsel %vm420_vm0, %v450_v21, 0.0 }
 0x111   :  { %v763_v25 = vpop.f32.mrb[15].mxu0  ;;  %437 = vadd.xlane.f32.xlu1 %v436_v19  ;;  %466 = vadd.xlane.f32.xlu0 %v465_v20 }
 0x112   :  { %v1035_v26 = vadd.f32 %v799_v51, %v761_v23  ;;  %v764_v27 = vadd.f32 %v763_v25, %v762_v24  ;;  %v517_v25 = vld [vmem:[%s1170_s2] sm:$0xff] }
 0x114   :  { %v1038_v29 = vadd.f32 %v800_v59, %v764_v27  ;;  %v439_v30 = vsel %vm420_vm0, %v1035_v26, 0.0  ;;  %v451_v31 = vmul.f32 %v1035_v26, %v1035_v26 }
 0x115   :  { %469 = vadd.xlane.f32.xlu1 %v468_v28  ;;  %440 = vadd.xlane.f32.xlu0 %v439_v30 }
 0x116   :  { %v442_v32 = vsel %vm420_vm0, %v1038_v29, 0.0  ;;  %v471_v33 = vsel %vm420_vm0, %v451_v31, 0.0  ;;  %v452_v34 = vmul.f32 %v1038_v29, %v1038_v29 }
 0x118   :  { %v474_v35 = vsel %vm420_vm0, %v452_v34, 0.0 }
 0x119   :  { %443 = vadd.xlane.f32.xlu1 %v442_v32  ;;  %472 = vadd.xlane.f32.xlu0 %v471_v33 }
 0x11d   :  { %475 = vadd.xlane.f32.xlu1 %v474_v35 }
 0x18a   :  { %v423_v37 = vpop.xlane.xlu0 %422 }
 0x18b   :  { %v1050_v40 = vmul.f32 0.03125, %v423_v37 }
 0x18d   :  { %v493_v48 = vmul.f32 %v1050_v40, %v1050_v40 }
 0x18e   :  { %v458_v38 = vpop.xlane.xlu1 %457  ;;  %v426_v39 = vpop.xlane.xlu0 %425 }
 0x18f   :  { %v478_v41 = vmul.f32 0.03125, %v426_v39  ;;  %v486_v42 = vmul.f32 0.03125, %v458_v38  ;;  %v550_v39 = vld [vmem:[%s1171_s3 + $0x8] sm:$0xff] }
 0x191   :  { %v494_v43 = vmul.f32 %v478_v41, %v478_v41 }
 0x192   :  { %v429_v44 = vpop.xlane.xlu1 %428  ;;  %v455_v46 = vpop.xlane.xlu0 %454 }
 0x193   :  { %v502_v49 = vsub.f32 %v486_v42, %v494_v43  ;;  %v1054_v50 = vmul.f32 0.03125, %v429_v44  ;;  %v485_v51 = vmul.f32 0.03125, %v455_v46  ;;  %v549_v42 = vld [vmem:[%s1171_s3] sm:$0xff] }
 0x195   :  { %v510_v52 = vmax.f32 %v502_v49, 0.0  ;;  %v501_v53 = vsub.f32 %v485_v51, %v493_v48  ;;  %v495_v54 = vmul.f32 %v1054_v50, %v1054_v50 }
 0x196   :  { %v432_v55 = vpop.xlane.xlu1 %431  ;;  %v461_v56 = vpop.xlane.xlu0 %460 }
 0x197   :  { %v526_v57 = vadd.f32 1e-05, %v510_v52  ;;  %v509_v58 = vmax.f32 %v501_v53, 0.0  ;;  %v1058_v59 = vmul.f32 0.03125, %v432_v55  ;;  %v487_v60 = vmul.f32 0.03125, %v461_v56  ;;  %v519_v56 = vld [vmem:[%s1170_s2 + $0x10] sm:$0xff] }
 0x199   :  { %844 = vrsqrt.f32 %v526_v57  ;;  %v525_v61 = vadd.f32 1e-05, %v509_v58  ;;  %v503_v63 = vsub.f32 %v487_v60, %v495_v54  ;;  %v496_v1 = vmul.f32 %v1058_v59, %v1058_v59 }
 0x19a   :  { %v464_v2 = vpop.xlane.xlu1 %463  ;;  %v435_v3 = vpop.xlane.xlu0 %434 }
 0x19b   :  { %846 = vrsqrt.f32 %v525_v61  ;;  %v511_v4 = vmax.f32 %v503_v63, 0.0  ;;  %v488_v5 = vmul.f32 0.03125, %v464_v2  ;;  %v1062_v6 = vmul.f32 0.03125, %v435_v3  ;;  %v552_v2 = vld [vmem:[%s1171_s3 + $0x18] sm:$0xff] }
 0x19d   :  { %v527_v7 = vadd.f32 1e-05, %v511_v4  ;;  %v504_v8 = vsub.f32 %v488_v5, %v496_v1  ;;  %v497_v9 = vmul.f32 %v1062_v6, %v1062_v6 }
 0x19e   :  { %v438_v10 = vpop.xlane.xlu1 %437  ;;  %v467_v11 = vpop.xlane.xlu0 %466 }
 0x19f   :  { %v512_v13 = vmax.f32 %v504_v8, 0.0  ;;  %v1066_v15 = vmul.f32 0.03125, %v438_v10  ;;  %v489_v16 = vmul.f32 0.03125, %v467_v11  ;;  %848 = vrsqrt.f32 %v527_v7  ;;  %v522_v10 = vld [vmem:[%s1170_s2 + $0x28] sm:$0xff] }
 0x1a1   :  { %v528_v18 = vadd.f32 1e-05, %v512_v13  ;;  %v498_v19 = vmul.f32 %v1066_v15, %v1066_v15  ;;  %v505_v20 = vsub.f32 %v489_v16, %v497_v9  ;;  %v551_v9 = vld [vmem:[%s1171_s3 + $0x10] sm:$0xff] }
 0x1a2   :  { %v470_v21 = vpop.xlane.xlu1 %469  ;;  %v441_v22 = vpop.xlane.xlu0 %440 }
 0x1a3   :  { %v845_v23 = vpop.eup %844  ;;  %850 = vrsqrt.f32 %v528_v18  ;;  %v490_v24 = vmul.f32 0.03125, %v470_v21  ;;  %v513_v30 = vmax.f32 %v505_v20, 0.0  ;;  %v1076_v37 = vmul.f32 0.03125, %v441_v22  ;;  %v521_v18 = vld [vmem:[%s1170_s2 + $0x20] sm:$0xff]  ;;  %v524_v22 = vld [vmem:[%s1170_s2 + $0x38] sm:$0xff] }
 0x1a4   :  { %v542_v27 = vmul.f32 %v845_v23, %v518_v17 }
 0x1a5   :  { %v847_v28 = vpop.eup %846  ;;  %v506_v31 = vsub.f32 %v490_v24, %v498_v19  ;;  %v499_v53 = vmul.f32 %v1076_v37, %v1076_v37 }
 0x1a6   :  { %v558_v32 = vmul.f32 %v542_v27, %v478_v41  ;;  %v444_v33 = vpop.xlane.xlu1 %443  ;;  %580 = vperm.xlu1 %803, %v542_v27   ;;  %v473_v34 = vpop.xlane.xlu0 %472  ;;  %v541_v35 = vmul.f32 %v847_v28, %v517_v25  ;;  %v529_v41 = vadd.f32 1e-05, %v513_v30  ;;  %v556_v27 = vld [vmem:[%s1171_s3 + $0x38] sm:$0xff] }
 0x1a7   :  { %v514_v36 = vmax.f32 %v506_v31, 0.0  ;;  %v484_v38 = vmul.f32 0.03125, %v444_v33  ;;  %v491_v46 = vmul.f32 0.03125, %v473_v34  ;;  %v523_v33 = vld [vmem:[%s1170_s2 + $0x30] sm:$0xff] }
 0x1a8   :  { %575 = vperm.xlu0 %802, %v541_v35   ;;  %v557_v43 = vmul.f32 %v541_v35, %v1050_v40  ;;  %v566_v49 = vsub.f32 %v550_v39, %v558_v32  ;;  %v520_v40 = vld [vmem:[%s1170_s2 + $0x18] sm:$0xff]  ;;  %v555_v35 = vld [vmem:[%s1171_s3 + $0x30] sm:$0xff] }
 0x1a9   :  { %v530_v44 = vadd.f32 1e-05, %v514_v36  ;;  %v849_v52 = vpop.eup %848  ;;  %v500_v54 = vmul.f32 %v484_v38, %v484_v38  ;;  %v507_v58 = vsub.f32 %v491_v46, %v499_v53 }
 0x1aa   :  { %v476_v48 = vpop.xlane.xlu1 %475  ;;  %v565_v51 = vsub.f32 %v549_v42, %v557_v43  ;;  %v543_v61 = vmul.f32 %v849_v52, %v519_v56 }
 0x1ab   :  { %852 = vrsqrt.f32 %v530_v44  ;;  %v492_v55 = vmul.f32 0.03125, %v476_v48  ;;  %v515_v4 = vmax.f32 %v507_v58, 0.0 }
 0x1ac   :  { %628 = vperm.xlu0 %802, %v566_v49   ;;  %623 = vperm.xlu1 %803, %v565_v51   ;;  %854 = vrsqrt.f32 %v529_v41  ;;  %v559_v8 = vmul.f32 %v543_v61, %v1054_v50  ;;  %v554_v50 = vld [vmem:[%s1171_s3 + $0x28] sm:$0xff] }
 0x1ad   :  { %v851_v57 = vpop.eup %850  ;;  %v508_v60 = vsub.f32 %v492_v55, %v500_v54  ;;  %v531_v13 = vadd.f32 1e-05, %v515_v4 }
 0x1ae   :  { %v544_v63 = vmul.f32 %v851_v57, %v520_v40  ;;  %v567_v16 = vsub.f32 %v551_v9, %v559_v8 }
 0x1af   :  { %v516_v1 = vmax.f32 %v508_v60, 0.0 }
 0x1b0   :  { %585 = vperm.xlu1 %803, %v543_v61   ;;  %v560_v3 = vmul.f32 %v544_v63, %v1058_v59 }
 0x1b1   :  { %v532_v5 = vadd.f32 1e-05, %v516_v1 }
 0x1b2   :  { %v568_v7 = vsub.f32 %v552_v2, %v560_v3 }
 0x1b3   :  { %856 = vrsqrt.f32 %v532_v5 }
 0x1b4   :  { %638 = vperm.xlu0 %802, %v568_v7   ;;  %590 = vperm.xlu1 %803, %v544_v63   ;;  %858 = vrsqrt.f32 %v531_v13 }
 0x1b5   :  { %v853_v11 = vpop.eup %852 }
 0x1b6   :  { %v546_v59 = vmul.f32 %v853_v11, %v522_v10  ;;  %v855_v17 = vpop.eup %854 }
 0x1b7   :  { %v545_v21 = vmul.f32 %v855_v17, %v521_v18 }
 0x1b8   :  { %633 = vperm.xlu1 %803, %v567_v16   ;;  %v562_v19 = vmul.f32 %v546_v59, %v1066_v15  ;;  %v553_v15 = vld [vmem:[%s1171_s3 + $0x20] sm:$0xff] }
 0x1b9   :  { %v561_v25 = vmul.f32 %v545_v21, %v1062_v6 }
 0x1ba   :  { %v570_v20 = vsub.f32 %v554_v50, %v562_v19 }
 0x1bb   :  { %v569_v31 = vsub.f32 %v553_v15, %v561_v25 }
 0x1bc   :  { %648 = vperm.xlu0 %802, %v570_v20   ;;  %595 = vperm.xlu1 %803, %v545_v21  }
 0x1bd   :  { %v857_v23 = vpop.eup %856 }
 0x1be   :  { %v548_v24 = vmul.f32 %v857_v23, %v524_v22  ;;  %v859_v32 = vpop.eup %858 }
 0x1bf   :  { %v547_v6 = vmul.f32 %v859_v32, %v523_v33 }
 0x1c0   :  { %600 = vperm.xlu1 %803, %v546_v59   ;;  %v564_v28 = vmul.f32 %v548_v24, %v484_v38 }
 0x1c1   :  { %v563_v34 = vmul.f32 %v547_v6, %v1076_v37 }
 0x1c2   :  { %v572_v30 = vsub.f32 %v556_v27, %v564_v28 }
 0x1c3   :  { %v571_v36 = vsub.f32 %v555_v35, %v563_v34 }
 0x1c4   :  { %658 = vperm.xlu0 %802, %v572_v30   ;;  %643 = vperm.xlu1 %803, %v569_v31  }
 0x1c8   :  { %605 = vperm.xlu1 %803, %v547_v6  }
 0x1cc   :  { %610 = vperm.xlu1 %803, %v548_v24  }
 0x1d0   :  { %653 = vperm.xlu1 %803, %v571_v36  }
 0x225   :  { %v581_v38 = vpop.permute.xlu1 %580 }
 0x226   :  { %v614_v42 = vmul.f32 %v581_v38, %v996_v47 }
 0x227   :  { %v576_v39 = vpop.permute.xlu0 %575 }
 0x228   :  { %v613_v43 = vmul.f32 %v576_v39, %v994_v45 }
 0x22b   :  { %v624_v41 = vpop.permute.xlu1 %623  ;;  %v629_v44 = vpop.permute.xlu0 %628 }
 0x22c   :  { %v661_v46 = vadd.f32 %v624_v41, %v613_v43  ;;  %v662_v48 = vadd.f32 %v629_v44, %v614_v42 }
 0x22e   :  { %v669_v49 = vmax.f32 %v661_v46, 0.0  ;;  %v670_v51 = vmax.f32 %v662_v48, 0.0 }
 0x22f   :  { %v586_v37 = vpop.permute.xlu1 %585 }
 0x230   :  { %677 = vst.msk [vmem:[%s1172_s4] sm:$0xff] %vm420_vm0, %v669_v49  ;;  %678 = vst.msk [vmem:[%s1172_s4 + $0x8] sm:$0xff] %vm420_vm0, %v670_v51  ;;  %v615_v53 = vmul.f32 %v586_v37, %v1007_v62 }
 0x233   :  { %v591_v47 = vpop.permute.xlu1 %590  ;;  %v639_v52 = vpop.permute.xlu0 %638 }
 0x234   :  { %v616_v45 = vmul.f32 %v591_v47, %v1009_v0 }
 0x236   :  { %v664_v54 = vadd.f32 %v639_v52, %v616_v45 }
 0x237   :  { %v634_v55 = vpop.permute.xlu1 %633 }
 0x238   :  { %v672_v56 = vmax.f32 %v664_v54, 0.0  ;;  %v663_v40 = vadd.f32 %v634_v55, %v615_v53 }
 0x23a   :  { %680 = vst.msk [vmem:[%s1172_s4 + $0x18] sm:$0xff] %vm420_vm0, %v672_v56  ;;  %v671_v57 = vmax.f32 %v663_v40, 0.0 }
 0x23b   :  { %v596_v58 = vpop.permute.xlu1 %595  ;;  %v649_v62 = vpop.permute.xlu0 %648 }
 0x23c   :  { %679 = vst.msk [vmem:[%s1172_s4 + $0x10] sm:$0xff] %vm420_vm0, %v671_v57  ;;  %v617_v61 = vmul.f32 %v596_v58, %v1021_v12 }
 0x23f   :  { %v601_v0 = vpop.permute.xlu1 %600 }
 0x240   :  { %v618_v60 = vmul.f32 %v601_v0, %v1023_v14 }
 0x242   :  { %v666_v63 = vadd.f32 %v649_v62, %v618_v60 }
 0x243   :  { %v644_v1 = vpop.permute.xlu1 %643  ;;  %v659_v12 = vpop.permute.xlu0 %658 }
 0x244   :  { %v674_v2 = vmax.f32 %v666_v63, 0.0  ;;  %v665_v3 = vadd.f32 %v644_v1, %v617_v61 }
 0x246   :  { %682 = vst.msk [vmem:[%s1172_s4 + $0x28] sm:$0xff] %vm420_vm0, %v674_v2  ;;  %v673_v4 = vmax.f32 %v665_v3, 0.0 }
 0x247   :  { %v606_v5 = vpop.permute.xlu1 %605 }
 0x248   :  { %681 = vst.msk [vmem:[%s1172_s4 + $0x20] sm:$0xff] %vm420_vm0, %v673_v4  ;;  %v619_v8 = vmul.f32 %v606_v5, %v1035_v26 }
 0x24b   :  { %v611_v14 = vpop.permute.xlu1 %610 }
 0x24c   :  { %v620_v7 = vmul.f32 %v611_v14, %v1038_v29 }
 0x24e   :  { %v668_v9 = vadd.f32 %v659_v12, %v620_v7 }
 0x24f   :  { %v654_v10 = vpop.permute.xlu1 %653 }
 0x250   :  { %v676_v11 = vmax.f32 %v668_v9, 0.0  ;;  %v667_v13 = vadd.f32 %v654_v10, %v619_v8 }
 0x252   :  { %684 = vst.msk [vmem:[%s1172_s4 + $0x38] sm:$0xff] %vm420_vm0, %v676_v11  ;;  %v675_v16 = vmax.f32 %v667_v13, 0.0 }
 0x254   :  { %683 = vst.msk [vmem:[%s1172_s4 + $0x30] sm:$0xff] %vm420_vm0, %v675_v16 }

// kernel: inner_generator_forward.6
= control target key start
LH: loop header
LB: loop body
LE: loop exit
PB: predicated region body
PF: predicated region fallthrough
CT: control target
= control target key end

     0   :  { %vm828_vm0 = vcmask 261120   ;;  %s2022_s0 = inlined_call_operand.vmem [shape: bf16[4,256,32], index: 0, kind: input, shape index: {}]   ;;  %s2023_s1 = inlined_call_operand.vmem [shape: bf16[4,32,256], index: 1, kind: input, shape index: {}]   ;;  %s2024_s2 = inlined_call_operand.vmem [shape: f32[32,1], index: 2, kind: input, shape index: {}]   ;;  %s2025_s3 = inlined_call_operand.vmem [shape: f32[32,1], index: 3, kind: input, shape index: {}]   ;;  %s2026_s4 = inlined_call_operand.vmem [shape: f32[4,32,32], index: 4, kind: output, shape index: {}]  }
   0x1   :  { %v1439_v0 = vld [vmem:[%s2022_s0 + $0x40] sm:$0xff]   ;;  %v1443_v4 = vld [vmem:[%s2022_s0 + $0x48] sm:$0xff]   ;;  %v1447_v8 = vld [vmem:[%s2022_s0 + $0x50] sm:$0xff]  }
   0x2   :  { %v1440_v1 = vld [vmem:[%s2022_s0 + $0xc0] sm:$0xff]   ;;  %1324 = vmatprep.subr.bf16.mxu0 %v1439_v0  ;;  %v1444_v5 = vld [vmem:[%s2022_s0 + $0xc8] sm:$0xff]   ;;  %v1448_v9 = vld [vmem:[%s2022_s0 + $0xd0] sm:$0xff]  }
   0x3   :  { %v1441_v2 = vld [vmem:[%s2022_s0] sm:$0xff]   ;;  %1352 = vmatprep.subr.bf16.mxu1 %v1440_v1  ;;  %v1445_v6 = vld [vmem:[%s2022_s0 + $0x8] sm:$0xff]   ;;  %v1449_v10 = vld [vmem:[%s2022_s0 + $0x10] sm:$0xff]  }
   0x4   :  { %v1442_v3 = vld [vmem:[%s2022_s0 + $0x80] sm:$0xff]   ;;  %1325 = vmatpush3.bf16.msra.mxu0 %v1441_v2  ;;  %v1446_v7 = vld [vmem:[%s2022_s0 + $0x88] sm:$0xff]   ;;  %v1450_v11 = vld [vmem:[%s2022_s0 + $0x90] sm:$0xff]  }
   0x5   :  { %1353 = vmatpush3.bf16.msra.mxu1 %v1442_v3  ;;  %1326 = vmatprep.subr.bf16.mxu0 %v1443_v4  ;;  %v1451_v12 = vld [vmem:[%s2022_s0 + $0x58] sm:$0xff]   ;;  %v1455_v16 = vld [vmem:[%s2022_s0 + $0x60] sm:$0xff]   ;;  %v1459_v20 = vld [vmem:[%s2022_s0 + $0x68] sm:$0xff]  }
   0x6   :  { %1354 = vmatprep.subr.bf16.mxu1 %v1444_v5  ;;  %v1452_v13 = vld [vmem:[%s2022_s0 + $0xd8] sm:$0xff]   ;;  %v1456_v17 = vld [vmem:[%s2022_s0 + $0xe0] sm:$0xff]   ;;  %v1460_v21 = vld [vmem:[%s2022_s0 + $0xe8] sm:$0xff]  }
   0x7   :  { %v1453_v14 = vld [vmem:[%s2022_s0 + $0x18] sm:$0xff]   ;;  %v1457_v18 = vld [vmem:[%s2022_s0 + $0x20] sm:$0xff]   ;;  %v1461_v22 = vld [vmem:[%s2022_s0 + $0x28] sm:$0xff]  }
   0x8   :  { %1327 = vmatpush3.bf16.msra.mxu0 %v1445_v6  ;;  %v1454_v15 = vld [vmem:[%s2022_s0 + $0x98] sm:$0xff]   ;;  %v1458_v19 = vld [vmem:[%s2022_s0 + $0xa0] sm:$0xff]   ;;  %v1462_v23 = vld [vmem:[%s2022_s0 + $0xa8] sm:$0xff]  }
   0x9   :  { %1355 = vmatpush3.bf16.msra.mxu1 %v1446_v7  ;;  %1328 = vmatprep.subr.bf16.mxu0 %v1447_v8  ;;  %v1463_v24 = vld [vmem:[%s2022_s0 + $0x70] sm:$0xff]   ;;  %v1467_v28 = vld [vmem:[%s2022_s0 + $0x78] sm:$0xff]   ;;  %v1471_v32 = vld [vmem:[%s2023_s1] ss:$8 sps:$4 sm:$0xff]  }
   0xa   :  { %1356 = vmatprep.subr.bf16.mxu1 %v1448_v9  ;;  %v1464_v25 = vld [vmem:[%s2022_s0 + $0xf0] sm:$0xff]   ;;  %v1468_v29 = vld [vmem:[%s2022_s0 + $0xf8] sm:$0xff]   ;;  %v1473_v33 = vld [vmem:[%s2023_s1 + $0x4] ss:$8 sps:$4 sm:$0xff]  }
   0xb   :  { %v1465_v26 = vld [vmem:[%s2022_s0 + $0x30] sm:$0xff]   ;;  %v1469_v30 = vld [vmem:[%s2022_s0 + $0x38] sm:$0xff]   ;;  %v1474_v34 = vld [vmem:[%s2023_s1 + $0x20] ss:$8 sps:$4 sm:$0xff]   ;;  %202 = vmatprep.mubr.bf16.mxu0 %v1473_v33 }
   0xc   :  { %1329 = vmatpush3.bf16.msra.mxu0 %v1449_v10  ;;  %v1466_v27 = vld [vmem:[%s2022_s0 + $0xb0] sm:$0xff]   ;;  %v1470_v31 = vld [vmem:[%s2022_s0 + $0xb8] sm:$0xff]   ;;  %v1476_v35 = vld [vmem:[%s2023_s1 + $0x24] ss:$8 sps:$4 sm:$0xff]  }
   0xd   :  { %1357 = vmatpush3.bf16.msra.mxu1 %v1450_v11  ;;  %1330 = vmatprep.subr.bf16.mxu0 %v1451_v12  ;;  %v1477_v36 = vld [vmem:[%s2022_s0 + $0x140] sm:$0xff]   ;;  %v1481_v40 = vld [vmem:[%s2022_s0 + $0x148] sm:$0xff]   ;;  %v1485_v44 = vld [vmem:[%s2022_s0 + $0x150] sm:$0xff]  }
   0xe   :  { %1358 = vmatprep.subr.bf16.mxu1 %v1452_v13  ;;  %405 = vmatprep.mubr.bf16.mxu1 %v1476_v35  ;;  %v1478_v37 = vld [vmem:[%s2022_s0 + $0x100] sm:$0xff]   ;;  %v1482_v41 = vld [vmem:[%s2022_s0 + $0x108] sm:$0xff]   ;;  %v1486_v45 = vld [vmem:[%s2022_s0 + $0x110] sm:$0xff]  }
   0xf   :  { %v1479_v38 = vld [vmem:[%s2022_s0 + $0x1c0] sm:$0xff]   ;;  %v1483_v42 = vld [vmem:[%s2022_s0 + $0x1c8] sm:$0xff]   ;;  %v1487_v46 = vld [vmem:[%s2022_s0 + $0x1d0] sm:$0xff]  }
  0x10   :  { %1331 = vmatpush3.bf16.msra.mxu0 %v1453_v14  ;;  %v1480_v39 = vld [vmem:[%s2022_s0 + $0x180] sm:$0xff]   ;;  %v1484_v43 = vld [vmem:[%s2022_s0 + $0x188] sm:$0xff]   ;;  %v1488_v47 = vld [vmem:[%s2022_s0 + $0x190] sm:$0xff]  }
  0x11   :  { %1359 = vmatpush3.bf16.msra.mxu1 %v1454_v15  ;;  %1332 = vmatprep.subr.bf16.mxu0 %v1455_v16  ;;  %v1489_v48 = vld [vmem:[%s2023_s1 + $0x14] ss:$8 sps:$4 sm:$0xff]   ;;  %v1492_v50 = vld [vmem:[%s2023_s1 + $0x10] ss:$8 sps:$4 sm:$0xff]   ;;  %v1498_v55 = vld [vmem:[%s2022_s0 + $0x160] sm:$0xff]  }
  0x12   :  { %1360 = vmatprep.subr.bf16.mxu1 %v1456_v17  ;;  %v1491_v49 = vld [vmem:[%s2022_s0 + $0x158] sm:$0xff]   ;;  %v1500_v57 = vld [vmem:[%s2022_s0 + $0x120] sm:$0xff]   ;;  %v1503_v60 = vld [vmem:[%s2022_s0 + $0x168] sm:$0xff]  }
  0x13   :  { %v1493_v51 = vld [vmem:[%s2022_s0 + $0x118] sm:$0xff]   ;;  %v1501_v58 = vld [vmem:[%s2022_s0 + $0x1e0] sm:$0xff]   ;;  %v1504_v61 = vld [vmem:[%s2022_s0 + $0x128] sm:$0xff]  }
  0x14   :  { %1333 = vmatpush3.bf16.msra.mxu0 %v1457_v18  ;;  %v1494_v52 = vld [vmem:[%s2022_s0 + $0x1d8] sm:$0xff]   ;;  %v1502_v59 = vld [vmem:[%s2022_s0 + $0x1a0] sm:$0xff]   ;;  %v1505_v62 = vld [vmem:[%s2022_s0 + $0x1e8] sm:$0xff]  }
  0x15   :  { %1361 = vmatpush3.bf16.msra.mxu1 %v1458_v19  ;;  %1334 = vmatprep.subr.bf16.mxu0 %v1459_v20  ;;  %v1495_v53 = vld [vmem:[%s2022_s0 + $0x198] sm:$0xff]   ;;  %v1506_v63 = vld [vmem:[%s2022_s0 + $0x1a8] sm:$0xff]   ;;  %v1507_v0 = vld [vmem:[%s2022_s0 + $0x170] sm:$0xff]  }
  0x16   :  { %1362 = vmatprep.subr.bf16.mxu1 %v1460_v21  ;;  %v1496_v54 = vld [vmem:[%s2023_s1 + $0x34] ss:$8 sps:$4 sm:$0xff]   ;;  %v1499_v56 = vld [vmem:[%s2023_s1 + $0x30] ss:$8 sps:$4 sm:$0xff]   ;;  %v1515_v8 = vld [vmem:[%s2023_s1 + $0x40] ss:$8 sps:$4 sm:$0xff]  }
  0x17   :  { %v1508_v1 = vld [vmem:[%s2022_s0 + $0x130] sm:$0xff]   ;;  %v1511_v4 = vld [vmem:[%s2022_s0 + $0x178] sm:$0xff]   ;;  %v1517_v9 = vld [vmem:[%s2023_s1 + $0x44] ss:$8 sps:$4 sm:$0xff]  }
  0x18   :  { %1335 = vmatpush3.bf16.msra.mxu0 %v1461_v22  ;;  %v1509_v2 = vld [vmem:[%s2022_s0 + $0x1f0] sm:$0xff]   ;;  %v1512_v5 = vld [vmem:[%s2022_s0 + $0x138] sm:$0xff]   ;;  %v1518_v10 = vld [vmem:[%s2023_s1 + $0x60] ss:$8 sps:$4 sm:$0xff]  }
  0x19   :  { %1363 = vmatpush3.bf16.msra.mxu1 %v1462_v23  ;;  %1336 = vmatprep.subr.bf16.mxu0 %v1463_v24  ;;  %v1510_v3 = vld [vmem:[%s2022_s0 + $0x1b0] sm:$0xff]   ;;  %v1513_v6 = vld [vmem:[%s2022_s0 + $0x1f8] sm:$0xff]   ;;  %v1520_v11 = vld [vmem:[%s2023_s1 + $0x64] ss:$8 sps:$4 sm:$0xff]  }
  0x1a   :  { %1364 = vmatprep.subr.bf16.mxu1 %v1464_v25  ;;  %v1514_v7 = vld [vmem:[%s2022_s0 + $0x1b8] sm:$0xff]  }
  0x1b   :  { %v1521_v12 = vld [vmem:[%s2023_s1 + $0x54] ss:$8 sps:$4 sm:$0xff]   ;;  %v1523_v14 = vld [vmem:[%s2023_s1 + $0x50] ss:$8 sps:$4 sm:$0xff]  }
  0x1c   :  { %1337 = vmatpush3.bf16.msra.mxu0 %v1465_v26  ;;  %v1524_v13 = vld [vmem:[%s2023_s1 + $0x74] ss:$8 sps:$4 sm:$0xff]   ;;  %v1526_v15 = vld [vmem:[%s2023_s1 + $0x70] ss:$8 sps:$4 sm:$0xff]  }
  0x1d   :  { %1365 = vmatpush3.bf16.msra.mxu1 %v1466_v27  ;;  %1338 = vmatprep.subr.bf16.mxu0 %v1467_v28 }
  0x1e   :  { %1366 = vmatprep.subr.bf16.mxu1 %v1468_v29 }
  0x20   :  { %1339 = vmatpush3.bf16.msra.mxu0 %v1469_v30 }
  0x21   :  { %1367 = vmatpush3.bf16.msra.mxu1 %v1470_v31  ;;  %1380 = vmatprep.subr.bf16.mxu0 %v1477_v36 }
  0x22   :  { %1408 = vmatprep.subr.bf16.mxu1 %v1479_v38 }
  0x23   :  { %203 = vmatmul.mubr.bf16.vlgmr.msra.gmra.mrb[0].mxu0 %v1471_v32 }
  0x24   :  { %406 = vmatmul.mubr.bf16.vlgmr.msra.gmra.mrb[0].mxu1 %v1474_v34  ;;  %1381 = vmatpush3.bf16.msra.mxu0 %v1478_v37 }
  0x25   :  { %1409 = vmatpush3.bf16.msra.mxu1 %v1480_v39  ;;  %1382 = vmatprep.subr.bf16.mxu0 %v1481_v40 }
  0x26   :  { %1410 = vmatprep.subr.bf16.mxu1 %v1483_v42  ;;  %210 = vmatprep.mubr.bf16.mxu0 %v1489_v48 }
  0x27   :  { %413 = vmatprep.mubr.bf16.mxu1 %v1496_v54 }
  0x28   :  { %1383 = vmatpush3.bf16.msra.mxu0 %v1482_v41 }
  0x29   :  { %1411 = vmatpush3.bf16.msra.mxu1 %v1484_v43  ;;  %1384 = vmatprep.subr.bf16.mxu0 %v1485_v44 }
  0x2a   :  { %1412 = vmatprep.subr.bf16.mxu1 %v1487_v46 }
  0x2b   :  { %211 = vmatmul.mubr.bf16.gmra.mrb[4].mxu0 %v1492_v50 }
  0x2c   :  { %1385 = vmatpush3.bf16.msra.mxu0 %v1486_v45  ;;  %414 = vmatmul.mubr.bf16.gmra.mrb[4].mxu1 %v1499_v56 }
  0x2d   :  { %1413 = vmatpush3.bf16.msra.mxu1 %v1488_v47  ;;  %1386 = vmatprep.subr.bf16.mxu0 %v1491_v49 }
  0x2e   :  { %1414 = vmatprep.subr.bf16.mxu1 %v1494_v52  ;;  %608 = vmatprep.mubr.bf16.mxu0 %v1517_v9 }
  0x2f   :  { %811 = vmatprep.mubr.bf16.mxu1 %v1520_v11 }
  0x30   :  { %1387 = vmatpush3.bf16.msra.mxu0 %v1493_v51 }
  0x31   :  { %1415 = vmatpush3.bf16.msra.mxu1 %v1495_v53  ;;  %1388 = vmatprep.subr.bf16.mxu0 %v1498_v55 }
  0x32   :  { %1416 = vmatprep.subr.bf16.mxu1 %v1501_v58 }
  0x34   :  { %1389 = vmatpush3.bf16.msra.mxu0 %v1500_v57 }
  0x35   :  { %1417 = vmatpush3.bf16.msra.mxu1 %v1502_v59  ;;  %1390 = vmatprep.subr.bf16.mxu0 %v1503_v60 }
  0x36   :  { %1418 = vmatprep.subr.bf16.mxu1 %v1505_v62 }
  0x38   :  { %1391 = vmatpush3.bf16.msra.mxu0 %v1504_v61 }
  0x39   :  { %1419 = vmatpush3.bf16.msra.mxu1 %v1506_v63  ;;  %1392 = vmatprep.subr.bf16.mxu0 %v1507_v0 }
  0x3a   :  { %1420 = vmatprep.subr.bf16.mxu1 %v1509_v2 }
  0x3c   :  { %1393 = vmatpush3.bf16.msra.mxu0 %v1508_v1 }
  0x3d   :  { %1421 = vmatpush3.bf16.msra.mxu1 %v1510_v3  ;;  %1394 = vmatprep.subr.bf16.mxu0 %v1511_v4 }
  0x3e   :  { %1422 = vmatprep.subr.bf16.mxu1 %v1513_v6 }
  0x40   :  { %1395 = vmatpush3.bf16.msra.mxu0 %v1512_v5 }
  0x41   :  { %1423 = vmatpush3.bf16.msra.mxu1 %v1514_v7 }
  0x43   :  { %609 = vmatmul.mubr.bf16.vlgmr.msra.gmra.mrb[8].mxu0 %v1515_v8 }
  0x44   :  { %812 = vmatmul.mubr.bf16.vlgmr.msra.gmra.mrb[8].mxu1 %v1518_v10  ;;  %616 = vmatprep.mubr.bf16.mxu0 %v1521_v12 }
  0x45   :  { %819 = vmatprep.mubr.bf16.mxu1 %v1524_v13 }
  0x4b   :  { %617 = vmatmul.mubr.bf16.gmra.mrb[12].mxu0 %v1523_v14 }
  0x4c   :  { %820 = vmatmul.mubr.bf16.gmra.mrb[12].mxu1 %v1526_v15 }
  0xf6   :  { %v1340_v16 = vpop.f32.mrb[0].mxu0 }
  0xf7   :  { %v1368_v17 = vpop.f32.mrb[0].mxu1  ;;  %v1341_v18 = vpop.f32.mrb[1].mxu0 }
  0xf8   :  { %v1801_v19 = vadd.f32 %v1341_v18, %v1340_v16  ;;  %v1369_v20 = vpop.f32.mrb[1].mxu1  ;;  %v1343_v21 = vpop.f32.mrb[2].mxu0 }
  0xf9   :  { %v1803_v22 = vadd.f32 %v1369_v20, %v1368_v17  ;;  %v1371_v23 = vpop.f32.mrb[2].mxu1  ;;  %v1344_v24 = vpop.f32.mrb[3].mxu0 }
  0xfa   :  { %v1805_v25 = vadd.f32 %v1344_v24, %v1343_v21  ;;  %v1372_v26 = vpop.f32.mrb[3].mxu1  ;;  %v829_v27 = vsel %vm828_vm0, %v1801_v19, 0.0  ;;  %v841_v35 = vmul.f32 %v1801_v19, %v1801_v19 }
  0xfb   :  { %v1809_v28 = vadd.f32 %v1372_v26, %v1371_v23  ;;  %830 = vadd.xlane.f32.xlu0 %v829_v27  ;;  %v857_v31 = vsel %vm828_vm0, %v1803_v22, 0.0  ;;  %v873_v42 = vmul.f32 %v1803_v22, %v1803_v22 }
  0xfc   :  { %v842_v30 = vmul.f32 %v1805_v25, %v1805_v25  ;;  %v832_v34 = vsel %vm828_vm0, %v1805_v25, 0.0  ;;  %v845_v41 = vsel %vm828_vm0, %v841_v35, 0.0 }
  0xfd   :  { %v860_v29 = vsel %vm828_vm0, %v1809_v28, 0.0  ;;  %v874_v33 = vmul.f32 %v1809_v28, %v1809_v28  ;;  %v877_v47 = vsel %vm828_vm0, %v873_v42, 0.0 }
  0xfe   :  { %861 = vadd.xlane.f32.xlu1 %v860_v29  ;;  %v848_v32 = vsel %vm828_vm0, %v842_v30, 0.0  ;;  %v1346_v36 = vpop.f32.mrb[4].mxu0 }
  0xff   :  { %858 = vadd.xlane.f32.xlu0 %v857_v31  ;;  %v1347_v37 = vpop.f32.mrb[5].mxu0  ;;  %v880_v38 = vsel %vm828_vm0, %v874_v33, 0.0  ;;  %v1374_v46 = vpop.f32.mrb[4].mxu1 }
 0x100   :  { %v1825_v39 = vadd.f32 %v1347_v37, %v1346_v36  ;;  %v1349_v40 = vpop.f32.mrb[6].mxu0  ;;  %v1375_v48 = vpop.f32.mrb[5].mxu1 }
 0x101   :  { %v1350_v43 = vpop.f32.mrb[7].mxu0  ;;  %v1835_v49 = vadd.f32 %v1375_v48, %v1374_v46  ;;  %v1377_v50 = vpop.f32.mrb[6].mxu1 }
 0x102   :  { %849 = vadd.xlane.f32.xlu1 %v848_v32  ;;  %v1830_v44 = vadd.f32 %v1350_v43, %v1349_v40  ;;  %v835_v45 = vsel %vm828_vm0, %v1825_v39, 0.0  ;;  %v1378_v51 = vpop.f32.mrb[7].mxu1  ;;  %v843_v55 = vmul.f32 %v1825_v39, %v1825_v39 }
 0x103   :  { %833 = vadd.xlane.f32.xlu0 %v832_v34  ;;  %v1839_v53 = vadd.f32 %v1378_v51, %v1377_v50  ;;  %v863_v54 = vsel %vm828_vm0, %v1835_v49, 0.0  ;;  %v875_v59 = vmul.f32 %v1835_v49, %v1835_v49 }
 0x104   :  { %v838_v52 = vsel %vm828_vm0, %v1830_v44, 0.0  ;;  %v844_v57 = vmul.f32 %v1830_v44, %v1830_v44  ;;  %v851_v58 = vsel %vm828_vm0, %v843_v55, 0.0 }
 0x105   :  { %v866_v56 = vsel %vm828_vm0, %v1839_v53, 0.0  ;;  %v876_v61 = vmul.f32 %v1839_v53, %v1839_v53  ;;  %v883_v62 = vsel %vm828_vm0, %v875_v59, 0.0 }
 0x106   :  { %881 = vadd.xlane.f32.xlu1 %v880_v38  ;;  %v854_v60 = vsel %vm828_vm0, %v844_v57, 0.0 }
 0x107   :  { %846 = vadd.xlane.f32.xlu0 %v845_v41  ;;  %v886_v63 = vsel %vm828_vm0, %v876_v61, 0.0 }
 0x10a   :  { %836 = vadd.xlane.f32.xlu1 %v835_v45 }
 0x10b   :  { %878 = vadd.xlane.f32.xlu0 %v877_v47 }
 0x10e   :  { %839 = vadd.xlane.f32.xlu1 %v838_v52 }
 0x10f   :  { %864 = vadd.xlane.f32.xlu0 %v863_v54 }
 0x112   :  { %867 = vadd.xlane.f32.xlu1 %v866_v56  ;;  %v1535_v56 = vmov 0  }
 0x113   :  { %852 = vadd.xlane.f32.xlu0 %v851_v58  ;;  %1438 = vset.pattern.permute.xlu1 %v1535_v56 }
 0x114   :  { %1437 = vset.pattern.permute.xlu0 %v1535_v56 }
 0x116   :  { %855 = vadd.xlane.f32.xlu1 %v854_v60  ;;  %v1396_v0 = vpop.f32.mrb[8].mxu0 }
 0x117   :  { %884 = vadd.xlane.f32.xlu0 %v883_v62  ;;  %v1397_v1 = vpop.f32.mrb[9].mxu0  ;;  %v1424_v2 = vpop.f32.mrb[8].mxu1 }
 0x118   :  { %v1857_v3 = vadd.f32 %v1397_v1, %v1396_v0  ;;  %v1399_v4 = vpop.f32.mrb[10].mxu0  ;;  %v1425_v5 = vpop.f32.mrb[9].mxu1 }
 0x119   :  { %v1859_v6 = vadd.f32 %v1425_v5, %v1424_v2  ;;  %v1400_v7 = vpop.f32.mrb[11].mxu0  ;;  %v1427_v8 = vpop.f32.mrb[10].mxu1 }
 0x11a   :  { %887 = vadd.xlane.f32.xlu1 %v886_v63  ;;  %v1861_v9 = vadd.f32 %v1400_v7, %v1399_v4  ;;  %v1428_v10 = vpop.f32.mrb[11].mxu1  ;;  %v893_v11 = vsel %vm828_vm0, %v1857_v3, 0.0  ;;  %v909_v16 = vmul.f32 %v1857_v3, %v1857_v3 }
 0x11b   :  { %v1865_v12 = vadd.f32 %v1428_v10, %v1427_v8  ;;  %894 = vadd.xlane.f32.xlu0 %v893_v11  ;;  %v929_v14 = vsel %vm828_vm0, %v1859_v6, 0.0  ;;  %v945_v33 = vmul.f32 %v1859_v6, %v1859_v6 }
 0x11c   :  { %v896_v13 = vsel %vm828_vm0, %v1861_v9, 0.0  ;;  %v910_v24 = vmul.f32 %v1861_v9, %v1861_v9  ;;  %v913_v31 = vsel %vm828_vm0, %v909_v16, 0.0 }
 0x11d   :  { %v932_v20 = vsel %vm828_vm0, %v1865_v12, 0.0  ;;  %v946_v37 = vmul.f32 %v1865_v12, %v1865_v12  ;;  %v949_v38 = vsel %vm828_vm0, %v945_v33, 0.0 }
 0x11e   :  { %897 = vadd.xlane.f32.xlu1 %v896_v13  ;;  %v1402_v15 = vpop.f32.mrb[12].mxu0  ;;  %v916_v36 = vsel %vm828_vm0, %v910_v24, 0.0 }
 0x11f   :  { %930 = vadd.xlane.f32.xlu0 %v929_v14  ;;  %v1403_v17 = vpop.f32.mrb[13].mxu0  ;;  %v1430_v18 = vpop.f32.mrb[12].mxu1  ;;  %v952_v40 = vsel %vm828_vm0, %v946_v37, 0.0 }
 0x120   :  { %v1875_v21 = vadd.f32 %v1403_v17, %v1402_v15  ;;  %v1405_v23 = vpop.f32.mrb[14].mxu0  ;;  %v1431_v26 = vpop.f32.mrb[13].mxu1 }
 0x121   :  { %v1406_v27 = vpop.f32.mrb[15].mxu0  ;;  %v1879_v29 = vadd.f32 %v1431_v26, %v1430_v18  ;;  %v1433_v30 = vpop.f32.mrb[14].mxu1 }
 0x122   :  { %933 = vadd.xlane.f32.xlu1 %v932_v20  ;;  %v1882_v32 = vadd.f32 %v1406_v27, %v1405_v23  ;;  %v1434_v34 = vpop.f32.mrb[15].mxu1  ;;  %v899_v41 = vsel %vm828_vm0, %v1875_v21, 0.0  ;;  %v911_v45 = vmul.f32 %v1875_v21, %v1875_v21 }
 0x123   :  { %914 = vadd.xlane.f32.xlu0 %v913_v31  ;;  %v1886_v35 = vadd.f32 %v1434_v34, %v1433_v30  ;;  %v935_v43 = vsel %vm828_vm0, %v1879_v29, 0.0  ;;  %v947_v50 = vmul.f32 %v1879_v29, %v1879_v29 }
 0x124   :  { %v902_v42 = vsel %vm828_vm0, %v1882_v32, 0.0  ;;  %v912_v47 = vmul.f32 %v1882_v32, %v1882_v32  ;;  %v919_v48 = vsel %vm828_vm0, %v911_v45, 0.0 }
 0x125   :  { %v938_v46 = vsel %vm828_vm0, %v1886_v35, 0.0  ;;  %v948_v52 = vmul.f32 %v1886_v35, %v1886_v35  ;;  %v955_v54 = vsel %vm828_vm0, %v947_v50, 0.0 }
 0x126   :  { %917 = vadd.xlane.f32.xlu1 %v916_v36  ;;  %v922_v51 = vsel %vm828_vm0, %v912_v47, 0.0 }
 0x127   :  { %950 = vadd.xlane.f32.xlu0 %v949_v38  ;;  %v958_v55 = vsel %vm828_vm0, %v948_v52, 0.0 }
 0x12a   :  { %953 = vadd.xlane.f32.xlu1 %v952_v40 }
 0x12b   :  { %900 = vadd.xlane.f32.xlu0 %v899_v41 }
 0x12e   :  { %903 = vadd.xlane.f32.xlu1 %v902_v42 }
 0x12f   :  { %936 = vadd.xlane.f32.xlu0 %v935_v43 }
 0x132   :  { %939 = vadd.xlane.f32.xlu1 %v938_v46 }
 0x133   :  { %920 = vadd.xlane.f32.xlu0 %v919_v48 }
 0x136   :  { %923 = vadd.xlane.f32.xlu1 %v922_v51 }
 0x137   :  { %956 = vadd.xlane.f32.xlu0 %v955_v54 }
 0x13a   :  { %959 = vadd.xlane.f32.xlu1 %v958_v55 }
 0x188   :  { %v831_v57 = vpop.xlane.xlu0 %830 }
 0x18b   :  { %v862_v58 = vpop.xlane.xlu1 %861 }
 0x18c   :  { %v859_v59 = vpop.xlane.xlu0 %858 }
 0x18d   :  { %v869_v15 = vadd.f32 %v859_v59, %v831_v57 }
 0x18f   :  { %v850_v60 = vpop.xlane.xlu1 %849 }
 0x190   :  { %v834_v61 = vpop.xlane.xlu0 %833 }
 0x191   :  { %v870_v17 = vadd.f32 %v862_v58, %v834_v61 }
 0x193   :  { %v882_v62 = vpop.xlane.xlu1 %881 }
 0x194   :  { %v847_v63 = vpop.xlane.xlu0 %846  ;;  %v890_v33 = vadd.f32 %v882_v62, %v850_v60 }
 0x197   :  { %v837_v0 = vpop.xlane.xlu1 %836 }
 0x198   :  { %v879_v1 = vpop.xlane.xlu0 %878 }
 0x199   :  { %v889_v27 = vadd.f32 %v879_v1, %v847_v63 }
 0x19b   :  { %v840_v2 = vpop.xlane.xlu1 %839 }
 0x19c   :  { %v865_v4 = vpop.xlane.xlu0 %864 }
 0x19d   :  { %v871_v54 = vadd.f32 %v865_v4, %v837_v0 }
 0x19f   :  { %v868_v5 = vpop.xlane.xlu1 %867 }
 0x1a0   :  { %v853_v7 = vpop.xlane.xlu0 %852  ;;  %v872_v58 = vadd.f32 %v868_v5, %v840_v2 }
 0x1a3   :  { %v856_v8 = vpop.xlane.xlu1 %855 }
 0x1a4   :  { %v885_v10 = vpop.xlane.xlu0 %884 }
 0x1a7   :  { %v888_v11 = vpop.xlane.xlu1 %887 }
 0x1a8   :  { %v895_v13 = vpop.xlane.xlu0 %894 }
 0x1a9   :  { %v905_v18 = vadd.f32 %v895_v13, %v869_v15  ;;  %v891_v15 = vadd.f32 %v885_v10, %v853_v7 }
 0x1ab   :  { %v898_v14 = vpop.xlane.xlu1 %897 }
 0x1ac   :  { %v931_v16 = vpop.xlane.xlu0 %930  ;;  %v906_v23 = vadd.f32 %v898_v14, %v870_v17 }
 0x1ad   :  { %v941_v24 = vadd.f32 %v931_v16, %v905_v18  ;;  %v892_v18 = vadd.f32 %v888_v11, %v856_v8  ;;  %v986_v8 = vld [vmem:[%s2024_s2 + $0x8] sm:$0xff] }
 0x1af   :  { %v934_v20 = vpop.xlane.xlu1 %933  ;;  %v965_v34 = vmul.f32 0.0078125, %v941_v24 }
 0x1b0   :  { %v915_v26 = vpop.xlane.xlu0 %914  ;;  %v942_v30 = vadd.f32 %v934_v20, %v906_v23 }
 0x1b1   :  { %v925_v36 = vadd.f32 %v915_v26, %v889_v27  ;;  %v973_v43 = vmul.f32 %v965_v34, %v965_v34 }
 0x1b2   :  { %v1913_v38 = vmul.f32 0.0078125, %v942_v30 }
 0x1b3   :  { %v918_v31 = vpop.xlane.xlu1 %917 }
 0x1b4   :  { %v951_v37 = vpop.xlane.xlu0 %950  ;;  %v926_v40 = vadd.f32 %v918_v31, %v890_v33  ;;  %v974_v48 = vmul.f32 %v1913_v38, %v1913_v38  ;;  %v985_v31 = vld [vmem:[%s2024_s2] sm:$0xff] }
 0x1b5   :  { %v961_v41 = vadd.f32 %v951_v37, %v925_v36 }
 0x1b7   :  { %v954_v42 = vpop.xlane.xlu1 %953  ;;  %v969_v45 = vmul.f32 0.0078125, %v961_v41 }
 0x1b8   :  { %v962_v46 = vadd.f32 %v954_v42, %v926_v40  ;;  %v901_v47 = vpop.xlane.xlu0 %900 }
 0x1b9   :  { %v977_v50 = vsub.f32 %v969_v45, %v973_v43  ;;  %v907_v61 = vadd.f32 %v901_v47, %v871_v54  ;;  %v1001_v47 = vld [vmem:[%s2025_s3] sm:$0xff] }
 0x1ba   :  { %v970_v51 = vmul.f32 0.0078125, %v962_v46 }
 0x1bb   :  { %v904_v52 = vpop.xlane.xlu1 %903  ;;  %v981_v55 = vmax.f32 %v977_v50, 0.0 }
 0x1bc   :  { %v978_v56 = vsub.f32 %v970_v51, %v974_v48  ;;  %v937_v57 = vpop.xlane.xlu0 %936  ;;  %v908_v1 = vadd.f32 %v904_v52, %v872_v58  ;;  %v1002_v52 = vld [vmem:[%s2025_s3 + $0x8] sm:$0xff]  ;;  %v988_v58 = vld [vmem:[%s2024_s2 + $0x18] sm:$0xff] }
 0x1bd   :  { %v989_v59 = vadd.f32 1e-05, %v981_v55  ;;  %v943_v13 = vadd.f32 %v937_v57, %v907_v61 }
 0x1be   :  { %v982_v60 = vmax.f32 %v978_v56, 0.0 }
 0x1bf   :  { %v940_v62 = vpop.xlane.xlu1 %939  ;;  %1527 = vrsqrt.f32 %v989_v59  ;;  %v967_v20 = vmul.f32 0.0078125, %v943_v13 }
 0x1c0   :  { %v990_v63 = vadd.f32 1e-05, %v982_v60  ;;  %v921_v14 = vpop.xlane.xlu0 %920  ;;  %v944_v16 = vadd.f32 %v940_v62, %v908_v1  ;;  %v1003_v60 = vld [vmem:[%s2025_s3 + $0x10] sm:$0xff] }
 0x1c1   :  { %v927_v0 = vadd.f32 %v921_v14, %v891_v15  ;;  %v975_v26 = vmul.f32 %v967_v20, %v967_v20 }
 0x1c2   :  { %1529 = vrsqrt.f32 %v990_v63  ;;  %v968_v23 = vmul.f32 0.0078125, %v944_v16  ;;  %v1004_v63 = vld [vmem:[%s2025_s3 + $0x18] sm:$0xff] }
 0x1c3   :  { %v924_v17 = vpop.xlane.xlu1 %923 }
 0x1c4   :  { %v957_v4 = vpop.xlane.xlu0 %956  ;;  %v928_v24 = vadd.f32 %v924_v17, %v892_v18  ;;  %v976_v7 = vmul.f32 %v968_v23, %v968_v23 }
 0x1c5   :  { %v963_v2 = vadd.f32 %v957_v4, %v927_v0 }
 0x1c7   :  { %v960_v5 = vpop.xlane.xlu1 %959  ;;  %v971_v27 = vmul.f32 0.0078125, %v963_v2 }
 0x1c8   :  { %v964_v30 = vadd.f32 %v960_v5, %v928_v24 }
 0x1c9   :  { %v1528_v33 = vpop.eup %1527  ;;  %v979_v10 = vsub.f32 %v971_v27, %v975_v26 }
 0x1ca   :  { %v972_v36 = vmul.f32 0.0078125, %v964_v30  ;;  %v997_v11 = vmul.f32 %v1528_v33, %v985_v31 }
 0x1cb   :  { %v983_v40 = vmax.f32 %v979_v10, 0.0 }
 0x1cc   :  { %v1530_v37 = vpop.eup %1529  ;;  %v980_v41 = vsub.f32 %v972_v36, %v976_v7  ;;  %1015 = vperm.xlu0 %1437, %v997_v11   ;;  %v1005_v43 = vmul.f32 %v997_v11, %v965_v34  ;;  %v987_v34 = vld [vmem:[%s2024_s2 + $0x10] sm:$0xff] }
 0x1cd   :  { %v998_v42 = vmul.f32 %v1530_v37, %v986_v8  ;;  %v991_v45 = vadd.f32 1e-05, %v983_v40 }
 0x1ce   :  { %v984_v46 = vmax.f32 %v980_v41, 0.0  ;;  %v1009_v50 = vsub.f32 %v1001_v47, %v1005_v43 }
 0x1cf   :  { %1020 = vperm.xlu1 %1438, %v998_v42   ;;  %1531 = vrsqrt.f32 %v991_v45  ;;  %v1006_v51 = vmul.f32 %v998_v42, %v1913_v38 }
 0x1d0   :  { %v992_v48 = vadd.f32 1e-05, %v984_v46 }
 0x1d1   :  { %v1010_v54 = vsub.f32 %v1002_v52, %v1006_v51 }
 0x1d2   :  { %1533 = vrsqrt.f32 %v992_v48 }
 0x1d3   :  { %1039 = vperm.xlu1 %1438, %v1009_v50  }
 0x1d7   :  { %1044 = vperm.xlu1 %1438, %v1010_v54  }
 0x1d9   :  { %v1532_v55 = vpop.eup %1531 }
 0x1da   :  { %v999_v56 = vmul.f32 %v1532_v55, %v987_v34 }
 0x1dc   :  { %v1534_v57 = vpop.eup %1533  ;;  %1025 = vperm.xlu1 %1438, %v999_v56   ;;  %v1007_v59 = vmul.f32 %v999_v56, %v967_v20 }
 0x1dd   :  { %v1000_v38 = vmul.f32 %v1534_v57, %v988_v58 }
 0x1de   :  { %v1011_v61 = vsub.f32 %v1003_v60, %v1007_v59 }
 0x1df   :  { %v1008_v62 = vmul.f32 %v1000_v38, %v968_v23 }
 0x1e0   :  { %1030 = vperm.xlu1 %1438, %v1000_v38  }
 0x1e1   :  { %v1012_v1 = vsub.f32 %v1004_v63, %v1008_v62 }
 0x1e4   :  { %1049 = vperm.xlu1 %1438, %v1011_v61  }
 0x1e8   :  { %1054 = vperm.xlu1 %1438, %v1012_v1  }
 0x24b   :  { %v1016_v13 = vpop.permute.xlu0 %1015 }
 0x24c   :  { %v1033_v15 = vmul.f32 %v1801_v19, %v1016_v13  ;;  %v1069_v16 = vmul.f32 %v1803_v22, %v1016_v13  ;;  %v1086_v17 = vmul.f32 %v1857_v3, %v1016_v13  ;;  %v1103_v18 = vmul.f32 %v1859_v6, %v1016_v13 }
 0x24e   :  { %v1021_v14 = vpop.permute.xlu1 %1020 }
 0x24f   :  { %v1034_v2 = vmul.f32 %v1805_v25, %v1021_v14  ;;  %v1070_v5 = vmul.f32 %v1809_v28, %v1021_v14  ;;  %v1087_v26 = vmul.f32 %v1861_v9, %v1021_v14  ;;  %v1104_v27 = vmul.f32 %v1865_v12, %v1021_v14 }
 0x252   :  { %v1040_v20 = vpop.permute.xlu1 %1039 }
 0x253   :  { %v1057_v0 = vadd.f32 %v1040_v20, %v1033_v15  ;;  %v1073_v4 = vadd.f32 %v1069_v16, %v1040_v20  ;;  %v1090_v23 = vadd.f32 %v1086_v17, %v1040_v20  ;;  %v1107_v24 = vadd.f32 %v1103_v18, %v1040_v20 }
 0x255   :  { %v1061_v19 = vmax.f32 %v1057_v0, 0.0  ;;  %v1077_v30 = vmax.f32 %v1073_v4, 0.0  ;;  %v1094_v22 = vmax.f32 %v1090_v23, 0.0  ;;  %v1111_v31 = vmax.f32 %v1107_v24, 0.0 }
 0x256   :  { %v1045_v3 = vpop.permute.xlu1 %1044 }
 0x257   :  { %1065 = vst.msk [vmem:[%s2026_s4] sm:$0xff] %vm828_vm0, %v1061_v19  ;;  %1312 = vst.msk [vmem:[%s2026_s4 + $0x20] sm:$0xff] %vm828_vm0, %v1077_v30  ;;  %v1058_v25 = vadd.f32 %v1045_v3, %v1034_v2  ;;  %v1074_v28 = vadd.f32 %v1070_v5, %v1045_v3  ;;  %v1091_v6 = vadd.f32 %v1087_v26, %v1045_v3 }
 0x258   :  { %1316 = vst.msk [vmem:[%s2026_s4 + $0x40] sm:$0xff] %vm828_vm0, %v1094_v22  ;;  %1320 = vst.msk [vmem:[%s2026_s4 + $0x60] sm:$0xff] %vm828_vm0, %v1111_v31  ;;  %v1108_v9 = vadd.f32 %v1104_v27, %v1045_v3 }
 0x259   :  { %v1062_v12 = vmax.f32 %v1058_v25, 0.0  ;;  %v1078_v33 = vmax.f32 %v1074_v28, 0.0  ;;  %v1095_v7 = vmax.f32 %v1091_v6, 0.0 }
 0x25a   :  { %v1112_v10 = vmax.f32 %v1108_v9, 0.0 }
 0x25b   :  { %1066 = vst.msk [vmem:[%s2026_s4 + $0x8] sm:$0xff] %vm828_vm0, %v1062_v12  ;;  %1313 = vst.msk [vmem:[%s2026_s4 + $0x28] sm:$0xff] %vm828_vm0, %v1078_v33  ;;  %v1026_v36 = vpop.permute.xlu1 %1025 }
 0x25c   :  { %1317 = vst.msk [vmem:[%s2026_s4 + $0x48] sm:$0xff] %vm828_vm0, %v1095_v7  ;;  %1321 = vst.msk [vmem:[%s2026_s4 + $0x68] sm:$0xff] %vm828_vm0, %v1112_v10  ;;  %v1035_v11 = vmul.f32 %v1825_v39, %v1026_v36  ;;  %v1071_v37 = vmul.f32 %v1835_v49, %v1026_v36  ;;  %v1088_v40 = vmul.f32 %v1875_v21, %v1026_v36 }
 0x25d   :  { %v1105_v41 = vmul.f32 %v1879_v29, %v1026_v36 }
 0x25f   :  { %v1031_v8 = vpop.permute.xlu1 %1030 }
 0x260   :  { %v1036_v48 = vmul.f32 %v1830_v44, %v1031_v8  ;;  %v1072_v50 = vmul.f32 %v1839_v53, %v1031_v8  ;;  %v1089_v51 = vmul.f32 %v1882_v32, %v1031_v8  ;;  %v1106_v52 = vmul.f32 %v1886_v35, %v1031_v8 }
 0x263   :  { %v1050_v42 = vpop.permute.xlu1 %1049 }
 0x264   :  { %v1059_v43 = vadd.f32 %v1050_v42, %v1035_v11  ;;  %v1075_v45 = vadd.f32 %v1071_v37, %v1050_v42  ;;  %v1092_v46 = vadd.f32 %v1088_v40, %v1050_v42  ;;  %v1109_v47 = vadd.f32 %v1105_v41, %v1050_v42 }
 0x266   :  { %v1063_v39 = vmax.f32 %v1059_v43, 0.0  ;;  %v1079_v54 = vmax.f32 %v1075_v45, 0.0  ;;  %v1096_v49 = vmax.f32 %v1092_v46, 0.0  ;;  %v1113_v34 = vmax.f32 %v1109_v47, 0.0 }
 0x267   :  { %v1055_v21 = vpop.permute.xlu1 %1054 }
 0x268   :  { %1067 = vst.msk [vmem:[%s2026_s4 + $0x10] sm:$0xff] %vm828_vm0, %v1063_v39  ;;  %1314 = vst.msk [vmem:[%s2026_s4 + $0x30] sm:$0xff] %vm828_vm0, %v1079_v54  ;;  %v1060_v44 = vadd.f32 %v1055_v21, %v1036_v48  ;;  %v1076_v53 = vadd.f32 %v1072_v50, %v1055_v21  ;;  %v1093_v29 = vadd.f32 %v1089_v51, %v1055_v21 }
 0x269   :  { %1318 = vst.msk [vmem:[%s2026_s4 + $0x50] sm:$0xff] %vm828_vm0, %v1096_v49  ;;  %1322 = vst.msk [vmem:[%s2026_s4 + $0x70] sm:$0xff] %vm828_vm0, %v1113_v34  ;;  %v1110_v32 = vadd.f32 %v1106_v52, %v1055_v21 }
 0x26a   :  { %v1064_v35 = vmax.f32 %v1060_v44, 0.0  ;;  %v1080_v55 = vmax.f32 %v1076_v53, 0.0  ;;  %v1097_v56 = vmax.f32 %v1093_v29, 0.0 }
 0x26b   :  { %v1114_v57 = vmax.f32 %v1110_v32, 0.0 }
 0x26c   :  { %1068 = vst.msk [vmem:[%s2026_s4 + $0x18] sm:$0xff] %vm828_vm0, %v1064_v35  ;;  %1315 = vst.msk [vmem:[%s2026_s4 + $0x38] sm:$0xff] %vm828_vm0, %v1080_v55 }
 0x26d   :  { %1319 = vst.msk [vmem:[%s2026_s4 + $0x58] sm:$0xff] %vm828_vm0, %v1097_v56  ;;  %1323 = vst.msk [vmem:[%s2026_s4 + $0x78] sm:$0xff] %vm828_vm0, %v1114_v57 }

// kernel: inner_generator_forward.7
= control target key start
LH: loop header
LB: loop body
LE: loop exit
PB: predicated region body
PF: predicated region fallthrough
CT: control target
= control target key end

     0   :  { %v868_v0 = vmov 0.0   ;;  %vm869_vm0 = vmmov 0   ;;  %v870_v61 = vmov 0   ;;  %s1128_s0 = inlined_call_operand.vmem [shape: bf16[4,128,128], index: 0, kind: input, shape index: {}]   ;;  %s1129_s1 = inlined_call_operand.vmem [shape: bf16[4,16,128], index: 1, kind: input, shape index: {}]   ;;  %s1130_s2 = inlined_call_operand.vmem [shape: f32[16,1], index: 2, kind: input, shape index: {}]   ;;  %s1131_s3 = inlined_call_operand.vmem [shape: f32[16,1], index: 3, kind: input, shape index: {}]   ;;  %s1132_s4 = inlined_call_operand.vmem [shape: f32[4,16,128], index: 4, kind: output, shape index: {}]  }
   0x1   :  { %743 = vmatprep.subr.bf16.mxu0 %v868_v0  ;;  %763 = vmatprep.subr.bf16.mxu1 %v868_v0  ;;  %v828_v1 = vld [vmem:[%s1128_s0] sm:$0xff]   ;;  %v830_v3 = vld [vmem:[%s1128_s0 + $0x8] sm:$0xff]   ;;  %v832_v5 = vld [vmem:[%s1128_s0 + $0x10] sm:$0xff]  }
   0x2   :  { %v829_v2 = vld [vmem:[%s1128_s0 + $0x40] sm:$0xff]   ;;  %759 = vmatprep.mubr.msk.bf16.mxu0 %vm869_vm0, %v868_v0  ;;  %779 = vmatprep.mubr.msk.bf16.mxu1 %vm869_vm0, %v868_v0  ;;  %v831_v4 = vld [vmem:[%s1128_s0 + $0x48] sm:$0xff]   ;;  %v833_v6 = vld [vmem:[%s1128_s0 + $0x50] sm:$0xff]  }
   0x3   :  { %744 = vmatpush3.bf16.msra.mxu0 %v828_v1  ;;  %764 = vmatpush3.bf16.msra.mxu1 %v829_v2  ;;  %v834_v7 = vld [vmem:[%s1128_s0 + $0x18] sm:$0xff]   ;;  %v836_v9 = vld [vmem:[%s1128_s0 + $0x20] sm:$0xff]   ;;  %v838_v11 = vld [vmem:[%s1128_s0 + $0x28] sm:$0xff]  }
   0x4   :  { %745 = vmatprep.subr.bf16.mxu0 %v868_v0  ;;  %765 = vmatprep.subr.bf16.mxu1 %v868_v0  ;;  %v835_v8 = vld [vmem:[%s1128_s0 + $0x58] sm:$0xff]   ;;  %v837_v10 = vld [vmem:[%s1128_s0 + $0x60] sm:$0xff]   ;;  %v839_v12 = vld [vmem:[%s1128_s0 + $0x68] sm:$0xff]  }
   0x5   :  { %v840_v13 = vld [vmem:[%s1128_s0 + $0x30] sm:$0xff]   ;;  %v842_v15 = vld [vmem:[%s1128_s0 + $0x38] sm:$0xff]   ;;  %v844_v17 = vld [vmem:[%s1129_s1] sm:$0xff]   ;;  %826 = vset.pattern.permute.xlu0 %v870_v61  ;;  %827 = vset.pattern.permute.xlu1 %v870_v61 }
   0x6   :  { %v841_v14 = vld [vmem:[%s1128_s0 + $0x70] sm:$0xff]   ;;  %v843_v16 = vld [vmem:[%s1128_s0 + $0x78] sm:$0xff]   ;;  %v845_v18 = vld [vmem:[%s1129_s1 + $0x8] sm:$0xff]  }
   0x7   :  { %746 = vmatpush3.bf16.msra.mxu0 %v830_v3  ;;  %766 = vmatpush3.bf16.msra.mxu1 %v831_v4  ;;  %v846_v19 = vld [vmem:[%s1128_s0 + $0x80] sm:$0xff]   ;;  %v848_v21 = vld [vmem:[%s1128_s0 + $0x88] sm:$0xff]   ;;  %v850_v23 = vld [vmem:[%s1128_s0 + $0x90] sm:$0xff]  }
   0x8   :  { %747 = vmatprep.subr.bf16.mxu0 %v868_v0  ;;  %767 = vmatprep.subr.bf16.mxu1 %v868_v0  ;;  %v847_v20 = vld [vmem:[%s1128_s0 + $0xc0] sm:$0xff]   ;;  %v849_v22 = vld [vmem:[%s1128_s0 + $0xc8] sm:$0xff]   ;;  %v851_v24 = vld [vmem:[%s1128_s0 + $0xd0] sm:$0xff]  }
   0x9   :  { %v852_v25 = vld [vmem:[%s1128_s0 + $0x98] sm:$0xff]   ;;  %v854_v27 = vld [vmem:[%s1128_s0 + $0xa0] sm:$0xff]   ;;  %v856_v29 = vld [vmem:[%s1128_s0 + $0xa8] sm:$0xff]  }
   0xa   :  { %v853_v26 = vld [vmem:[%s1128_s0 + $0xd8] sm:$0xff]   ;;  %v855_v28 = vld [vmem:[%s1128_s0 + $0xe0] sm:$0xff]   ;;  %v857_v30 = vld [vmem:[%s1128_s0 + $0xe8] sm:$0xff]  }
   0xb   :  { %748 = vmatpush3.bf16.msra.mxu0 %v832_v5  ;;  %768 = vmatpush3.bf16.msra.mxu1 %v833_v6  ;;  %v858_v31 = vld [vmem:[%s1128_s0 + $0xb0] sm:$0xff]   ;;  %v860_v33 = vld [vmem:[%s1128_s0 + $0xb8] sm:$0xff]  }
   0xc   :  { %749 = vmatprep.subr.bf16.mxu0 %v868_v0  ;;  %769 = vmatprep.subr.bf16.mxu1 %v868_v0  ;;  %v859_v32 = vld [vmem:[%s1128_s0 + $0xf0] sm:$0xff]   ;;  %v861_v34 = vld [vmem:[%s1128_s0 + $0xf8] sm:$0xff]  }
   0xd   :  { %v862_v35 = vld [vmem:[%s1129_s1 + $0x10] sm:$0xff]   ;;  %v863_v36 = vld [vmem:[%s1129_s1 + $0x18] sm:$0xff]  }
   0xf   :  { %750 = vmatpush3.bf16.msra.mxu0 %v834_v7  ;;  %770 = vmatpush3.bf16.msra.mxu1 %v835_v8 }
  0x10   :  { %751 = vmatprep.subr.bf16.mxu0 %v868_v0  ;;  %771 = vmatprep.subr.bf16.mxu1 %v868_v0 }
  0x13   :  { %752 = vmatpush3.bf16.msra.mxu0 %v836_v9  ;;  %772 = vmatpush3.bf16.msra.mxu1 %v837_v10 }
  0x14   :  { %753 = vmatprep.subr.bf16.mxu0 %v868_v0  ;;  %773 = vmatprep.subr.bf16.mxu1 %v868_v0 }
  0x17   :  { %754 = vmatpush3.bf16.msra.mxu0 %v838_v11  ;;  %774 = vmatpush3.bf16.msra.mxu1 %v839_v12 }
  0x18   :  { %755 = vmatprep.subr.bf16.mxu0 %v868_v0  ;;  %775 = vmatprep.subr.bf16.mxu1 %v868_v0 }
  0x1b   :  { %756 = vmatpush3.bf16.msra.mxu0 %v840_v13  ;;  %776 = vmatpush3.bf16.msra.mxu1 %v841_v14 }
  0x1c   :  { %757 = vmatprep.subr.bf16.mxu0 %v868_v0  ;;  %777 = vmatprep.subr.bf16.mxu1 %v868_v0 }
  0x1f   :  { %758 = vmatpush3.bf16.msra.mxu0 %v842_v15  ;;  %778 = vmatpush3.bf16.msra.mxu1 %v843_v16 }
  0x20   :  { %783 = vmatprep.subr.bf16.mxu0 %v868_v0  ;;  %803 = vmatprep.subr.bf16.mxu1 %v868_v0 }
  0x22   :  { %760 = vmatmul.mubr.bf16.vlgmr.msra.gmra.mrb[0].mxu0 %v844_v17  ;;  %780 = vmatmul.mubr.bf16.vlgmr.msra.gmra.mrb[0].mxu1 %v845_v18 }
  0x23   :  { %784 = vmatpush3.bf16.msra.mxu0 %v846_v19  ;;  %804 = vmatpush3.bf16.msra.mxu1 %v847_v20 }
  0x24   :  { %785 = vmatprep.subr.bf16.mxu0 %v868_v0  ;;  %805 = vmatprep.subr.bf16.mxu1 %v868_v0 }
  0x25   :  { %799 = vmatprep.mubr.msk.bf16.mxu0 %vm869_vm0, %v868_v0  ;;  %819 = vmatprep.mubr.msk.bf16.mxu1 %vm869_vm0, %v868_v0 }
  0x27   :  { %786 = vmatpush3.bf16.msra.mxu0 %v848_v21  ;;  %806 = vmatpush3.bf16.msra.mxu1 %v849_v22 }
  0x28   :  { %787 = vmatprep.subr.bf16.mxu0 %v868_v0  ;;  %807 = vmatprep.subr.bf16.mxu1 %v868_v0 }
  0x2b   :  { %788 = vmatpush3.bf16.msra.mxu0 %v850_v23  ;;  %808 = vmatpush3.bf16.msra.mxu1 %v851_v24 }
  0x2c   :  { %789 = vmatprep.subr.bf16.mxu0 %v868_v0  ;;  %809 = vmatprep.subr.bf16.mxu1 %v868_v0 }
  0x2f   :  { %790 = vmatpush3.bf16.msra.mxu0 %v852_v25  ;;  %810 = vmatpush3.bf16.msra.mxu1 %v853_v26 }
  0x30   :  { %791 = vmatprep.subr.bf16.mxu0 %v868_v0  ;;  %811 = vmatprep.subr.bf16.mxu1 %v868_v0 }
  0x33   :  { %792 = vmatpush3.bf16.msra.mxu0 %v854_v27  ;;  %812 = vmatpush3.bf16.msra.mxu1 %v855_v28 }
  0x34   :  { %793 = vmatprep.subr.bf16.mxu0 %v868_v0  ;;  %813 = vmatprep.subr.bf16.mxu1 %v868_v0 }
  0x37   :  { %794 = vmatpush3.bf16.msra.mxu0 %v856_v29  ;;  %814 = vmatpush3.bf16.msra.mxu1 %v857_v30 }
  0x38   :  { %795 = vmatprep.subr.bf16.mxu0 %v868_v0  ;;  %815 = vmatprep.subr.bf16.mxu1 %v868_v0 }
  0x3b   :  { %796 = vmatpush3.bf16.msra.mxu0 %v858_v31  ;;  %816 = vmatpush3.bf16.msra.mxu1 %v859_v32 }
  0x3c   :  { %797 = vmatprep.subr.bf16.mxu0 %v868_v0  ;;  %817 = vmatprep.subr.bf16.mxu1 %v868_v0 }
  0x3f   :  { %798 = vmatpush3.bf16.msra.mxu0 %v860_v33  ;;  %818 = vmatpush3.bf16.msra.mxu1 %v861_v34 }
  0x42   :  { %800 = vmatmul.mubr.bf16.vlgmr.msra.gmra.mrb[4].mxu0 %v862_v35  ;;  %820 = vmatmul.mubr.bf16.vlgmr.msra.gmra.mrb[4].mxu1 %v863_v36 }
  0xf5   :  { %v1044_v37 = vpop.f32.mrb[0].mxu0  ;;  %v1046_v38 = vpop.f32.mrb[0].mxu1 }
  0xf6   :  { %476 = vadd.xlane.f32.xlu0 %v1044_v37  ;;  %v761_v39 = vpop.f32.mrb[1].mxu0  ;;  %486 = vadd.xlane.f32.xlu1 %v1046_v38  ;;  %v781_v41 = vpop.f32.mrb[1].mxu1  ;;  %v480_v45 = vmul.f32 %v1044_v37, %v1044_v37  ;;  %v492_v47 = vmul.f32 %v1046_v38, %v1046_v38 }
  0xf7   :  { %v1050_v40 = vpop.f32.mrb[2].mxu0  ;;  %v1052_v43 = vpop.f32.mrb[2].mxu1  ;;  %v538_v41 = vld [vmem:[%s1130_s2] sm:$0xff] }
  0xf8   :  { %v762_v42 = vpop.f32.mrb[3].mxu0  ;;  %v782_v44 = vpop.f32.mrb[3].mxu1  ;;  %v481_v46 = vmul.f32 %v1050_v40, %v1050_v40  ;;  %v493_v48 = vmul.f32 %v1052_v43, %v1052_v43 }
  0xf9   :  { %v539_v44 = vld [vmem:[%s1130_s2 + $0x8] sm:$0xff] }
  0xfa   :  { %478 = vadd.xlane.f32.xlu0 %v1050_v40  ;;  %488 = vadd.xlane.f32.xlu1 %v1052_v43 }
  0xfe   :  { %482 = vadd.xlane.f32.xlu0 %v480_v45  ;;  %484 = vadd.xlane.f32.xlu1 %v481_v46 }
 0x102   :  { %494 = vadd.xlane.f32.xlu0 %v492_v47  ;;  %496 = vadd.xlane.f32.xlu1 %v493_v48 }
 0x115   :  { %v1064_v49 = vpop.f32.mrb[4].mxu0  ;;  %v1066_v50 = vpop.f32.mrb[4].mxu1 }
 0x116   :  { %500 = vadd.xlane.f32.xlu0 %v1064_v49  ;;  %v801_v51 = vpop.f32.mrb[5].mxu0  ;;  %v821_v53 = vpop.f32.mrb[5].mxu1  ;;  %v506_v57 = vmul.f32 %v1064_v49, %v1064_v49  ;;  %v520_v59 = vmul.f32 %v1066_v50, %v1066_v50 }
 0x117   :  { %v1069_v52 = vpop.f32.mrb[6].mxu0  ;;  %v1071_v54 = vpop.f32.mrb[6].mxu1  ;;  %v546_v51 = vld [vmem:[%s1131_s3] sm:$0xff] }
 0x118   :  { %502 = vadd.xlane.f32.xlu1 %v1069_v52  ;;  %v802_v55 = vpop.f32.mrb[7].mxu0  ;;  %v822_v56 = vpop.f32.mrb[7].mxu1  ;;  %v507_v58 = vmul.f32 %v1069_v52, %v1069_v52  ;;  %v521_v60 = vmul.f32 %v1071_v54, %v1071_v54 }
 0x119   :  { %v547_v56 = vld [vmem:[%s1131_s3 + $0x8] sm:$0xff] }
 0x11a   :  { %514 = vadd.xlane.f32.xlu0 %v1066_v50 }
 0x11c   :  { %516 = vadd.xlane.f32.xlu1 %v1071_v54 }
 0x11e   :  { %508 = vadd.xlane.f32.xlu0 %v506_v57 }
 0x120   :  { %510 = vadd.xlane.f32.xlu1 %v507_v58 }
 0x122   :  { %522 = vadd.xlane.f32.xlu0 %v520_v59 }
 0x124   :  { %524 = vadd.xlane.f32.xlu1 %v521_v60 }
 0x183   :  { %v477_v62 = vpop.xlane.xlu0 %476  ;;  %v487_v63 = vpop.xlane.xlu1 %486 }
 0x184   :  { %v490_v8 = vadd.f32 %v487_v63, %v477_v62 }
 0x187   :  { %v479_v0 = vpop.xlane.xlu0 %478  ;;  %v489_v1 = vpop.xlane.xlu1 %488 }
 0x188   :  { %v491_v10 = vadd.f32 %v489_v1, %v479_v0 }
 0x18b   :  { %v483_v2 = vpop.xlane.xlu0 %482  ;;  %v485_v3 = vpop.xlane.xlu1 %484 }
 0x18f   :  { %v495_v4 = vpop.xlane.xlu0 %494  ;;  %v497_v5 = vpop.xlane.xlu1 %496 }
 0x190   :  { %v498_v16 = vadd.f32 %v495_v4, %v483_v2  ;;  %v499_v19 = vadd.f32 %v497_v5, %v485_v3 }
 0x1a3   :  { %v501_v6 = vpop.xlane.xlu0 %500 }
 0x1a4   :  { %v504_v11 = vadd.f32 %v501_v6, %v490_v8 }
 0x1a5   :  { %v503_v7 = vpop.xlane.xlu1 %502 }
 0x1a6   :  { %v505_v13 = vadd.f32 %v503_v7, %v491_v10 }
 0x1a7   :  { %v515_v9 = vpop.xlane.xlu0 %514 }
 0x1a8   :  { %v518_v14 = vadd.f32 %v515_v9, %v504_v11 }
 0x1a9   :  { %v517_v12 = vpop.xlane.xlu1 %516 }
 0x1aa   :  { %v519_v17 = vadd.f32 %v517_v12, %v505_v13  ;;  %v528_v20 = vmul.f32 0.001953125, %v518_v14 }
 0x1ab   :  { %v509_v15 = vpop.xlane.xlu0 %508 }
 0x1ac   :  { %v512_v21 = vadd.f32 %v509_v15, %v498_v16  ;;  %v529_v23 = vmul.f32 0.001953125, %v519_v17  ;;  %v532_v27 = vmul.f32 %v528_v20, %v528_v20 }
 0x1ad   :  { %v511_v18 = vpop.xlane.xlu1 %510 }
 0x1ae   :  { %v513_v24 = vadd.f32 %v511_v18, %v499_v19  ;;  %v533_v30 = vmul.f32 %v529_v23, %v529_v23 }
 0x1af   :  { %v523_v22 = vpop.xlane.xlu0 %522 }
 0x1b0   :  { %v526_v25 = vadd.f32 %v523_v22, %v512_v21 }
 0x1b1   :  { %v525_v26 = vpop.xlane.xlu1 %524 }
 0x1b2   :  { %v530_v28 = vmul.f32 0.001953125, %v526_v25  ;;  %v527_v29 = vadd.f32 %v525_v26, %v513_v24 }
 0x1b4   :  { %v534_v31 = vsub.f32 %v530_v28, %v532_v27  ;;  %v531_v32 = vmul.f32 0.001953125, %v527_v29 }
 0x1b6   :  { %v536_v33 = vmax.f32 %v534_v31, 0.0  ;;  %v535_v34 = vsub.f32 %v531_v32, %v533_v30 }
 0x1b8   :  { %v540_v35 = vadd.f32 1e-05, %v536_v33  ;;  %v537_v36 = vmax.f32 %v535_v34, 0.0 }
 0x1ba   :  { %864 = vrsqrt.f32 %v540_v35  ;;  %v541_v39 = vadd.f32 1e-05, %v537_v36 }
 0x1bc   :  { %866 = vrsqrt.f32 %v541_v39 }
 0x1c4   :  { %v865_v42 = vpop.eup %864 }
 0x1c5   :  { %v544_v45 = vmul.f32 %v865_v42, %v538_v41 }
 0x1c6   :  { %v867_v46 = vpop.eup %866 }
 0x1c7   :  { %554 = vperm.xlu0 %826, %v544_v45   ;;  %v545_v47 = vmul.f32 %v867_v46, %v539_v44  ;;  %v548_v48 = vmul.f32 %v544_v45, %v528_v20 }
 0x1c9   :  { %559 = vperm.xlu1 %827, %v545_v47   ;;  %v550_v53 = vsub.f32 %v546_v51, %v548_v48  ;;  %v549_v55 = vmul.f32 %v545_v47, %v529_v23 }
 0x1cb   :  { %v551_v57 = vsub.f32 %v547_v56, %v549_v55 }
 0x1cd   :  { %566 = vperm.xlu1 %827, %v550_v53  }
 0x1d1   :  { %571 = vperm.xlu1 %827, %v551_v57  }
 0x246   :  { %v555_v58 = vpop.permute.xlu0 %554 }
 0x247   :  { %v562_v60 = vmul.f32 %v555_v58, %v1044_v37  ;;  %v580_v61 = vmul.f32 %v555_v58, %v1046_v38  ;;  %v589_v62 = vmul.f32 %v555_v58, %v1064_v49  ;;  %v598_v63 = vmul.f32 %v555_v58, %v1066_v50 }
 0x248   :  { %v560_v59 = vpop.permute.xlu1 %559 }
 0x249   :  { %v563_v5 = vmul.f32 %v560_v59, %v1050_v40  ;;  %v581_v6 = vmul.f32 %v560_v59, %v1052_v43  ;;  %v590_v7 = vmul.f32 %v560_v59, %v1069_v52  ;;  %v599_v8 = vmul.f32 %v560_v59, %v1071_v54 }
 0x24c   :  { %v567_v0 = vpop.permute.xlu1 %566 }
 0x24d   :  { %v574_v1 = vadd.f32 %v567_v0, %v562_v60  ;;  %v582_v2 = vadd.f32 %v580_v61, %v567_v0  ;;  %v591_v3 = vadd.f32 %v589_v62, %v567_v0  ;;  %v600_v4 = vadd.f32 %v598_v63, %v567_v0 }
 0x24f   :  { %v576_v37 = vmax.f32 %v574_v1, 0.0  ;;  %v584_v9 = vmax.f32 %v582_v2, 0.0  ;;  %v593_v38 = vmax.f32 %v591_v3, 0.0  ;;  %v602_v10 = vmax.f32 %v600_v4, 0.0 }
 0x250   :  { %v572_v49 = vpop.permute.xlu1 %571 }
 0x251   :  { %578 = vst [vmem:[%s1132_s4] sm:$0xff] %v576_v37  ;;  %701 = vst [vmem:[%s1132_s4 + $0x10] sm:$0xff] %v584_v9  ;;  %v575_v40 = vadd.f32 %v572_v49, %v563_v5  ;;  %v583_v43 = vadd.f32 %v581_v6, %v572_v49  ;;  %v592_v50 = vadd.f32 %v590_v7, %v572_v49 }
 0x252   :  { %703 = vst [vmem:[%s1132_s4 + $0x20] sm:$0xff] %v593_v38  ;;  %705 = vst [vmem:[%s1132_s4 + $0x30] sm:$0xff] %v602_v10  ;;  %v601_v52 = vadd.f32 %v599_v8, %v572_v49 }
 0x253   :  { %v577_v54 = vmax.f32 %v575_v40, 0.0  ;;  %v585_v11 = vmax.f32 %v583_v43, 0.0  ;;  %v594_v12 = vmax.f32 %v592_v50, 0.0 }
 0x254   :  { %v603_v13 = vmax.f32 %v601_v52, 0.0 }
 0x255   :  { %579 = vst [vmem:[%s1132_s4 + $0x8] sm:$0xff] %v577_v54  ;;  %702 = vst [vmem:[%s1132_s4 + $0x18] sm:$0xff] %v585_v11 }
 0x256   :  { %704 = vst [vmem:[%s1132_s4 + $0x28] sm:$0xff] %v594_v12  ;;  %706 = vst [vmem:[%s1132_s4 + $0x38] sm:$0xff] %v603_v13 }

// kernel: inner_generator_forward.8
= control target key start
LH: loop header
LB: loop body
LE: loop exit
PB: predicated region body
PF: predicated region fallthrough
CT: control target
= control target key end

     0   :  { %v1144_v1 = vmov 0   ;;  %vm115_vm0 = vcmask 523264   ;;  %s1536_s0 = inlined_call_operand.vmem [shape: bf16[4,64,512], index: 0, kind: input, shape index: {}]   ;;  %s1537_s1 = inlined_call_operand.vmem [shape: bf16[4,8,64], index: 1, kind: input, shape index: {}]   ;;  %s1538_s2 = inlined_call_operand.vmem [shape: f32[8,1], index: 2, kind: input, shape index: {}]   ;;  %s1539_s3 = inlined_call_operand.vmem [shape: f32[8,1], index: 3, kind: input, shape index: {}]   ;;  %s1540_s4 = inlined_call_operand.vmem [shape: f32[4,8,512], index: 4, kind: output, shape index: {}]  }
   0x1   :  { %v1046_v0 = vld [vmem:[%s1536_s0 + $0x4] ss:$16 sps:$4 sm:$0xff]   ;;  %151 = vmatprep.mubr.bf16.mxu0 %v1144_v1  ;;  %192 = vmatprep.mubr.bf16.mxu1 %v1144_v1  ;;  %v1048_v2 = vld [vmem:[%s1536_s0 + $0xc] ss:$16 sps:$4 sm:$0xff]   ;;  %v1050_v3 = vld [vmem:[%s1536_s0] ss:$16 sps:$4 sm:$0xff]  }
   0x2   :  { %1044 = vset.pattern.permute.xlu0 %v1144_v1  ;;  %1045 = vset.pattern.permute.xlu1 %v1144_v1  ;;  %v1051_v4 = vld [vmem:[%s1536_s0 + $0x8] ss:$16 sps:$4 sm:$0xff]   ;;  %v1052_v5 = vld [vmem:[%s1536_s0 + $0x24] ss:$16 sps:$4 sm:$0xff]   ;;  %v1054_v6 = vld [vmem:[%s1536_s0 + $0x2c] ss:$16 sps:$4 sm:$0xff]  }
   0x3   :  { %119 = vmatprep.subr.bf16.mxu0 %v1046_v0  ;;  %160 = vmatprep.subr.bf16.mxu1 %v1048_v2  ;;  %v1056_v7 = vld [vmem:[%s1536_s0 + $0x20] ss:$16 sps:$4 sm:$0xff]   ;;  %v1057_v8 = vld [vmem:[%s1536_s0 + $0x28] ss:$16 sps:$4 sm:$0xff]   ;;  %v1058_v9 = vld [vmem:[%s1536_s0 + $0x44] ss:$16 sps:$4 sm:$0xff]  }
   0x4   :  { %120 = vmatpush1.bf16.msra.mxu0 %v1050_v3  ;;  %161 = vmatpush1.bf16.msra.mxu1 %v1051_v4  ;;  %v1060_v10 = vld [vmem:[%s1536_s0 + $0x4c] ss:$16 sps:$4 sm:$0xff]   ;;  %v1062_v11 = vld [vmem:[%s1536_s0 + $0x40] ss:$16 sps:$4 sm:$0xff]   ;;  %v1063_v12 = vld [vmem:[%s1536_s0 + $0x48] ss:$16 sps:$4 sm:$0xff]  }
   0x5   :  { %121 = vmatprep.subr.bf16.mxu0 %v1052_v5  ;;  %162 = vmatprep.subr.bf16.mxu1 %v1054_v6  ;;  %v1064_v13 = vld [vmem:[%s1536_s0 + $0x64] ss:$16 sps:$4 sm:$0xff]   ;;  %v1066_v14 = vld [vmem:[%s1536_s0 + $0x6c] ss:$16 sps:$4 sm:$0xff]   ;;  %v1068_v15 = vld [vmem:[%s1536_s0 + $0x60] ss:$16 sps:$4 sm:$0xff]  }
   0x6   :  { %v1069_v16 = vld [vmem:[%s1536_s0 + $0x68] ss:$16 sps:$4 sm:$0xff]   ;;  %v1072_v17 = vld [vmem:[%s1536_s0 + $0x84] ss:$16 sps:$4 sm:$0xff]   ;;  %v1075_v18 = vld [vmem:[%s1536_s0 + $0x8c] ss:$16 sps:$4 sm:$0xff]  }
   0x7   :  { %v18_v19 = vld [vmem:[%s1537_s1] sm:$0xf]  ;;  %v1073_v21 = vld [vmem:[%s1536_s0 + $0x88] ss:$16 sps:$4 sm:$0xff]   ;;  %v1078_v22 = vld [vmem:[%s1536_s0 + $0xa4] ss:$16 sps:$4 sm:$0xff]  }
   0x8   :  { %122 = vmatpush1.bf16.msra.mxu0 %v1056_v7  ;;  %163 = vmatpush1.bf16.msra.mxu1 %v1057_v8  ;;  %v1070_v20 = vld [vmem:[%s1536_s0 + $0x80] ss:$16 sps:$4 sm:$0xff]   ;;  %v1081_v23 = vld [vmem:[%s1536_s0 + $0xac] ss:$16 sps:$4 sm:$0xff]   ;;  %v1079_v25 = vld [vmem:[%s1536_s0 + $0xa8] ss:$16 sps:$4 sm:$0xff]  }
   0x9   :  { %123 = vmatprep.subr.bf16.mxu0 %v1058_v9  ;;  %164 = vmatprep.subr.bf16.mxu1 %v1060_v10  ;;  %v1076_v24 = vld [vmem:[%s1536_s0 + $0xa0] ss:$16 sps:$4 sm:$0xff]   ;;  %v1084_v26 = vld [vmem:[%s1536_s0 + $0xc4] ss:$16 sps:$4 sm:$0xff]   ;;  %v1087_v27 = vld [vmem:[%s1536_s0 + $0xcc] ss:$16 sps:$4 sm:$0xff]  }
   0xa   :  { %v1082_v28 = vld [vmem:[%s1536_s0 + $0xc0] ss:$16 sps:$4 sm:$0xff]   ;;  %v1085_v29 = vld [vmem:[%s1536_s0 + $0xc8] ss:$16 sps:$4 sm:$0xff]   ;;  %v1090_v30 = vld [vmem:[%s1536_s0 + $0xe4] ss:$16 sps:$4 sm:$0xff]  }
   0xb   :  { %v1093_v31 = vld [vmem:[%s1536_s0 + $0xec] ss:$16 sps:$4 sm:$0xff]   ;;  %v1088_v32 = vld [vmem:[%s1536_s0 + $0xe0] ss:$16 sps:$4 sm:$0xff]   ;;  %v1091_v33 = vld [vmem:[%s1536_s0 + $0xe8] ss:$16 sps:$4 sm:$0xff]  }
   0xc   :  { %124 = vmatpush1.bf16.msra.mxu0 %v1062_v11  ;;  %165 = vmatpush1.bf16.msra.mxu1 %v1063_v12  ;;  %v1096_v34 = vld [vmem:[%s1536_s0 + $0x104] ss:$16 sps:$4 sm:$0xff]   ;;  %v1099_v35 = vld [vmem:[%s1536_s0 + $0x10c] ss:$16 sps:$4 sm:$0xff]   ;;  %v1094_v37 = vld [vmem:[%s1536_s0 + $0x100] ss:$16 sps:$4 sm:$0xff]  }
   0xd   :  { %125 = vmatprep.subr.bf16.mxu0 %v1064_v13  ;;  %166 = vmatprep.subr.bf16.mxu1 %v1066_v14  ;;  %v926_v36 = vld [vmem:[%s1537_s1 + $0x4] sm:$0xf]  ;;  %v1097_v38 = vld [vmem:[%s1536_s0 + $0x108] ss:$16 sps:$4 sm:$0xff]   ;;  %v1105_v40 = vld [vmem:[%s1536_s0 + $0x12c] ss:$16 sps:$4 sm:$0xff]  }
   0xe   :  { %v1102_v39 = vld [vmem:[%s1536_s0 + $0x124] ss:$16 sps:$4 sm:$0xff]   ;;  %v1100_v41 = vld [vmem:[%s1536_s0 + $0x120] ss:$16 sps:$4 sm:$0xff]   ;;  %v1103_v42 = vld [vmem:[%s1536_s0 + $0x128] ss:$16 sps:$4 sm:$0xff]  }
   0xf   :  { %v1108_v43 = vld [vmem:[%s1536_s0 + $0x144] ss:$16 sps:$4 sm:$0xff]   ;;  %v1111_v44 = vld [vmem:[%s1536_s0 + $0x14c] ss:$16 sps:$4 sm:$0xff]   ;;  %v1106_v45 = vld [vmem:[%s1536_s0 + $0x140] ss:$16 sps:$4 sm:$0xff]  }
  0x10   :  { %126 = vmatpush1.bf16.msra.mxu0 %v1068_v15  ;;  %167 = vmatpush1.bf16.msra.mxu1 %v1069_v16  ;;  %v1109_v46 = vld [vmem:[%s1536_s0 + $0x148] ss:$16 sps:$4 sm:$0xff]   ;;  %v1114_v47 = vld [vmem:[%s1536_s0 + $0x164] ss:$16 sps:$4 sm:$0xff]   ;;  %v1117_v48 = vld [vmem:[%s1536_s0 + $0x16c] ss:$16 sps:$4 sm:$0xff]  }
  0x11   :  { %303 = vmatprep.subr.bf16.mxu0 %v1072_v17  ;;  %344 = vmatprep.subr.bf16.mxu1 %v1075_v18  ;;  %v1112_v49 = vld [vmem:[%s1536_s0 + $0x160] ss:$16 sps:$4 sm:$0xff]   ;;  %v1115_v50 = vld [vmem:[%s1536_s0 + $0x168] ss:$16 sps:$4 sm:$0xff]   ;;  %v1120_v51 = vld [vmem:[%s1536_s0 + $0x184] ss:$16 sps:$4 sm:$0xff]  }
  0x12   :  { %v1123_v52 = vld [vmem:[%s1536_s0 + $0x18c] ss:$16 sps:$4 sm:$0xff]   ;;  %v961_v53 = vld [vmem:[%s1537_s1 + $0x8] sm:$0xf]  ;;  %v1118_v54 = vld [vmem:[%s1536_s0 + $0x180] ss:$16 sps:$4 sm:$0xff]  }
  0x13   :  { %924 = vmatmul.mubr.msk.bf16.vlgmr.msra.gmra.mrb[0].mxu0 %vm115_vm0, %v18_v19  ;;  %925 = vmatmul.mubr.msk.bf16.vlgmr.msra.gmra.mrb[0].mxu1 %vm115_vm0, %v18_v19  ;;  %v1121_v55 = vld [vmem:[%s1536_s0 + $0x188] ss:$16 sps:$4 sm:$0xff]   ;;  %v1126_v56 = vld [vmem:[%s1536_s0 + $0x1a4] ss:$16 sps:$4 sm:$0xff]   ;;  %v1129_v57 = vld [vmem:[%s1536_s0 + $0x1ac] ss:$16 sps:$4 sm:$0xff]  }
  0x14   :  { %304 = vmatpush1.bf16.msra.mxu0 %v1070_v20  ;;  %345 = vmatpush1.bf16.msra.mxu1 %v1073_v21  ;;  %v1124_v58 = vld [vmem:[%s1536_s0 + $0x1a0] ss:$16 sps:$4 sm:$0xff]   ;;  %v1127_v59 = vld [vmem:[%s1536_s0 + $0x1a8] ss:$16 sps:$4 sm:$0xff]   ;;  %v1132_v60 = vld [vmem:[%s1536_s0 + $0x1c4] ss:$16 sps:$4 sm:$0xff]  }
  0x15   :  { %305 = vmatprep.subr.bf16.mxu0 %v1078_v22  ;;  %346 = vmatprep.subr.bf16.mxu1 %v1081_v23  ;;  %v1135_v61 = vld [vmem:[%s1536_s0 + $0x1cc] ss:$16 sps:$4 sm:$0xff]   ;;  %v1130_v62 = vld [vmem:[%s1536_s0 + $0x1c0] ss:$16 sps:$4 sm:$0xff]   ;;  %v1133_v63 = vld [vmem:[%s1536_s0 + $0x1c8] ss:$16 sps:$4 sm:$0xff]  }
  0x16   :  { %335 = vmatprep.mubr.bf16.mxu0 %v1144_v1  ;;  %376 = vmatprep.mubr.bf16.mxu1 %v1144_v1  ;;  %v1138_v0 = vld [vmem:[%s1536_s0 + $0x1e4] ss:$16 sps:$4 sm:$0xff]   ;;  %v1136_v2 = vld [vmem:[%s1536_s0 + $0x1e0] ss:$16 sps:$4 sm:$0xff]   ;;  %v1139_v3 = vld [vmem:[%s1536_s0 + $0x1e8] ss:$16 sps:$4 sm:$0xff]  }
  0x17   :  { %v996_v4 = vld [vmem:[%s1537_s1 + $0xc] sm:$0xf] }
  0x18   :  { %306 = vmatpush1.bf16.msra.mxu0 %v1076_v24  ;;  %347 = vmatpush1.bf16.msra.mxu1 %v1079_v25 }
  0x19   :  { %307 = vmatprep.subr.bf16.mxu0 %v1084_v26  ;;  %348 = vmatprep.subr.bf16.mxu1 %v1087_v27 }
  0x1c   :  { %308 = vmatpush1.bf16.msra.mxu0 %v1082_v28  ;;  %349 = vmatpush1.bf16.msra.mxu1 %v1085_v29 }
  0x1d   :  { %309 = vmatprep.subr.bf16.mxu0 %v1090_v30  ;;  %350 = vmatprep.subr.bf16.mxu1 %v1093_v31 }
  0x20   :  { %310 = vmatpush1.bf16.msra.mxu0 %v1088_v32  ;;  %351 = vmatpush1.bf16.msra.mxu1 %v1091_v33 }
  0x21   :  { %487 = vmatprep.subr.bf16.mxu0 %v1096_v34  ;;  %528 = vmatprep.subr.bf16.mxu1 %v1099_v35 }
  0x23   :  { %959 = vmatmul.mubr.msk.bf16.vlgmr.msra.gmra.mrb[4].mxu0 %vm115_vm0, %v926_v36  ;;  %960 = vmatmul.mubr.msk.bf16.vlgmr.msra.gmra.mrb[4].mxu1 %vm115_vm0, %v926_v36 }
  0x24   :  { %488 = vmatpush1.bf16.msra.mxu0 %v1094_v37  ;;  %529 = vmatpush1.bf16.msra.mxu1 %v1097_v38 }
  0x25   :  { %489 = vmatprep.subr.bf16.mxu0 %v1102_v39  ;;  %530 = vmatprep.subr.bf16.mxu1 %v1105_v40 }
  0x26   :  { %519 = vmatprep.mubr.bf16.mxu0 %v1144_v1  ;;  %560 = vmatprep.mubr.bf16.mxu1 %v1144_v1 }
  0x28   :  { %490 = vmatpush1.bf16.msra.mxu0 %v1100_v41  ;;  %531 = vmatpush1.bf16.msra.mxu1 %v1103_v42 }
  0x29   :  { %491 = vmatprep.subr.bf16.mxu0 %v1108_v43  ;;  %532 = vmatprep.subr.bf16.mxu1 %v1111_v44 }
  0x2c   :  { %492 = vmatpush1.bf16.msra.mxu0 %v1106_v45  ;;  %533 = vmatpush1.bf16.msra.mxu1 %v1109_v46 }
  0x2d   :  { %493 = vmatprep.subr.bf16.mxu0 %v1114_v47  ;;  %534 = vmatprep.subr.bf16.mxu1 %v1117_v48 }
  0x30   :  { %494 = vmatpush1.bf16.msra.mxu0 %v1112_v49  ;;  %535 = vmatpush1.bf16.msra.mxu1 %v1115_v50 }
  0x31   :  { %671 = vmatprep.subr.bf16.mxu0 %v1120_v51  ;;  %712 = vmatprep.subr.bf16.mxu1 %v1123_v52 }
  0x33   :  { %994 = vmatmul.mubr.msk.bf16.vlgmr.msra.gmra.mrb[8].mxu0 %vm115_vm0, %v961_v53  ;;  %995 = vmatmul.mubr.msk.bf16.vlgmr.msra.gmra.mrb[8].mxu1 %vm115_vm0, %v961_v53 }
  0x34   :  { %672 = vmatpush1.bf16.msra.mxu0 %v1118_v54  ;;  %713 = vmatpush1.bf16.msra.mxu1 %v1121_v55 }
  0x35   :  { %673 = vmatprep.subr.bf16.mxu0 %v1126_v56  ;;  %714 = vmatprep.subr.bf16.mxu1 %v1129_v57 }
  0x36   :  { %703 = vmatprep.mubr.bf16.mxu0 %v1144_v1  ;;  %744 = vmatprep.mubr.bf16.mxu1 %v1144_v1  ;;  %v1141_v1 = vld [vmem:[%s1536_s0 + $0x1ec] ss:$16 sps:$4 sm:$0xff]  }
  0x38   :  { %674 = vmatpush1.bf16.msra.mxu0 %v1124_v58  ;;  %715 = vmatpush1.bf16.msra.mxu1 %v1127_v59 }
  0x39   :  { %675 = vmatprep.subr.bf16.mxu0 %v1132_v60  ;;  %716 = vmatprep.subr.bf16.mxu1 %v1135_v61 }
  0x3c   :  { %676 = vmatpush1.bf16.msra.mxu0 %v1130_v62  ;;  %717 = vmatpush1.bf16.msra.mxu1 %v1133_v63 }
  0x3d   :  { %677 = vmatprep.subr.bf16.mxu0 %v1138_v0  ;;  %718 = vmatprep.subr.bf16.mxu1 %v1141_v1 }
  0x40   :  { %678 = vmatpush1.bf16.msra.mxu0 %v1136_v2  ;;  %719 = vmatpush1.bf16.msra.mxu1 %v1139_v3 }
  0x43   :  { %1029 = vmatmul.mubr.msk.bf16.vlgmr.msra.gmra.mrb[12].mxu0 %vm115_vm0, %v996_v4  ;;  %1030 = vmatmul.mubr.msk.bf16.vlgmr.msra.gmra.mrb[12].mxu1 %vm115_vm0, %v996_v4 }
  0xe6   :  { %v1392_v5 = vpop.f32.mrb[0].mxu0  ;;  %v1394_v6 = vpop.f32.mrb[0].mxu1 }
  0xe7   :  { %v758_v7 = vmul.f32 %v1392_v5, %v1392_v5  ;;  %v1398_v8 = vpop.f32.mrb[1].mxu0  ;;  %v1400_v9 = vpop.f32.mrb[1].mxu1  ;;  %v760_v12 = vmul.f32 %v1394_v6, %v1394_v6 }
  0xe8   :  { %v753_v10 = vadd.f32 %v1398_v8, %v1392_v5  ;;  %v759_v11 = vmul.f32 %v1398_v8, %v1398_v8  ;;  %v157_v13 = vpop.f32.mrb[2].mxu0  ;;  %v198_v14 = vpop.f32.mrb[2].mxu1  ;;  %v761_v18 = vmul.f32 %v1400_v9, %v1400_v9 }
  0xe9   :  { %v158_v15 = vpop.f32.mrb[3].mxu0  ;;  %v199_v16 = vpop.f32.mrb[3].mxu1 }
  0xea   :  { %v754_v17 = vadd.f32 %v753_v10, %v1394_v6  ;;  %v762_v19 = vadd.f32 %v759_v11, %v758_v7 }
  0xec   :  { %v755_v20 = vadd.f32 %v754_v17, %v1400_v9  ;;  %v763_v21 = vadd.f32 %v762_v19, %v760_v12 }
  0xee   :  { %756 = vadd.xlane.f32.xlu0 %v755_v20  ;;  %v764_v22 = vadd.f32 %v763_v21, %v761_v18 }
  0xf0   :  { %765 = vadd.xlane.f32.xlu1 %v764_v22 }
  0xf6   :  { %v1412_v23 = vpop.f32.mrb[4].mxu0  ;;  %v1414_v24 = vpop.f32.mrb[4].mxu1 }
  0xf7   :  { %v773_v25 = vmul.f32 %v1412_v23, %v1412_v23  ;;  %v1418_v26 = vpop.f32.mrb[5].mxu0  ;;  %v1420_v27 = vpop.f32.mrb[5].mxu1  ;;  %v775_v30 = vmul.f32 %v1414_v24, %v1414_v24 }
  0xf8   :  { %v767_v28 = vadd.f32 %v1418_v26, %v1412_v23  ;;  %v774_v29 = vmul.f32 %v1418_v26, %v1418_v26  ;;  %v341_v31 = vpop.f32.mrb[6].mxu0  ;;  %v382_v32 = vpop.f32.mrb[6].mxu1  ;;  %v776_v36 = vmul.f32 %v1420_v27, %v1420_v27 }
  0xf9   :  { %v342_v33 = vpop.f32.mrb[7].mxu0  ;;  %v383_v34 = vpop.f32.mrb[7].mxu1 }
  0xfa   :  { %v768_v35 = vadd.f32 %v767_v28, %v1414_v24  ;;  %v777_v37 = vadd.f32 %v774_v29, %v773_v25 }
  0xfc   :  { %v769_v38 = vadd.f32 %v768_v35, %v1420_v27  ;;  %v778_v39 = vadd.f32 %v777_v37, %v775_v30 }
  0xfe   :  { %770 = vadd.xlane.f32.xlu0 %v769_v38  ;;  %v779_v40 = vadd.f32 %v778_v39, %v776_v36 }
 0x100   :  { %780 = vadd.xlane.f32.xlu1 %v779_v40 }
 0x106   :  { %v1432_v41 = vpop.f32.mrb[8].mxu0  ;;  %v1434_v42 = vpop.f32.mrb[8].mxu1 }
 0x107   :  { %v789_v43 = vmul.f32 %v1432_v41, %v1432_v41  ;;  %v1438_v44 = vpop.f32.mrb[9].mxu0  ;;  %v1440_v45 = vpop.f32.mrb[9].mxu1  ;;  %v791_v48 = vmul.f32 %v1434_v42, %v1434_v42 }
 0x108   :  { %v783_v46 = vadd.f32 %v1438_v44, %v1432_v41  ;;  %v790_v47 = vmul.f32 %v1438_v44, %v1438_v44  ;;  %v525_v49 = vpop.f32.mrb[10].mxu0  ;;  %v566_v50 = vpop.f32.mrb[10].mxu1  ;;  %v792_v54 = vmul.f32 %v1440_v45, %v1440_v45 }
 0x109   :  { %v526_v51 = vpop.f32.mrb[11].mxu0  ;;  %v567_v52 = vpop.f32.mrb[11].mxu1 }
 0x10a   :  { %v784_v53 = vadd.f32 %v783_v46, %v1434_v42  ;;  %v793_v55 = vadd.f32 %v790_v47, %v789_v43  ;;  %v820_v43 = vld [vmem:[%s1538_s2] sm:$0xff] }
 0x10c   :  { %v785_v56 = vadd.f32 %v784_v53, %v1440_v45  ;;  %v794_v57 = vadd.f32 %v793_v55, %v791_v48  ;;  %v824_v48 = vld [vmem:[%s1539_s3] sm:$0xff] }
 0x10e   :  { %786 = vadd.xlane.f32.xlu0 %v785_v56  ;;  %v795_v58 = vadd.f32 %v794_v57, %v792_v54 }
 0x110   :  { %796 = vadd.xlane.f32.xlu1 %v795_v58 }
 0x116   :  { %v1452_v59 = vpop.f32.mrb[12].mxu0  ;;  %v1454_v60 = vpop.f32.mrb[12].mxu1 }
 0x117   :  { %v805_v61 = vmul.f32 %v1452_v59, %v1452_v59  ;;  %v707_v62 = vpop.f32.mrb[13].mxu0  ;;  %v1458_v63 = vpop.f32.mrb[13].mxu1  ;;  %v807_v0 = vmul.f32 %v1454_v60, %v1454_v60 }
 0x118   :  { %v799_v1 = vadd.f32 %v707_v62, %v1452_v59  ;;  %v806_v2 = vmul.f32 %v707_v62, %v707_v62  ;;  %v709_v3 = vpop.f32.mrb[14].mxu0  ;;  %v750_v4 = vpop.f32.mrb[14].mxu1  ;;  %v808_v14 = vmul.f32 %v1458_v63, %v1458_v63 }
 0x119   :  { %v710_v7 = vpop.f32.mrb[15].mxu0  ;;  %v751_v10 = vpop.f32.mrb[15].mxu1 }
 0x11a   :  { %v800_v11 = vadd.f32 %v799_v1, %v1454_v60  ;;  %v809_v12 = vadd.f32 %v806_v2, %v805_v61 }
 0x11c   :  { %v801_v13 = vadd.f32 %v800_v11, %v1458_v63  ;;  %v810_v15 = vadd.f32 %v809_v12, %v807_v0 }
 0x11e   :  { %802 = vadd.xlane.f32.xlu0 %v801_v13  ;;  %v811_v16 = vadd.f32 %v810_v15, %v808_v14 }
 0x120   :  { %812 = vadd.xlane.f32.xlu1 %v811_v16 }
 0x17b   :  { %v757_v17 = vpop.xlane.xlu0 %756 }
 0x17d   :  { %v766_v18 = vpop.xlane.xlu1 %765 }
 0x18b   :  { %v771_v19 = vpop.xlane.xlu0 %770 }
 0x18c   :  { %v772_v22 = vadd.f32 %v771_v19, %v757_v17 }
 0x18d   :  { %v781_v20 = vpop.xlane.xlu1 %780 }
 0x18e   :  { %v782_v28 = vadd.f32 %v781_v20, %v766_v18 }
 0x19b   :  { %v787_v21 = vpop.xlane.xlu0 %786 }
 0x19c   :  { %v788_v29 = vadd.f32 %v787_v21, %v772_v22 }
 0x19d   :  { %v797_v25 = vpop.xlane.xlu1 %796 }
 0x19e   :  { %v798_v31 = vadd.f32 %v797_v25, %v782_v28 }
 0x1ab   :  { %v803_v30 = vpop.xlane.xlu0 %802 }
 0x1ac   :  { %v804_v32 = vadd.f32 %v803_v30, %v788_v29 }
 0x1ad   :  { %v813_v33 = vpop.xlane.xlu1 %812 }
 0x1ae   :  { %v815_v34 = vmul.f32 0.00048828125, %v804_v32  ;;  %v814_v35 = vadd.f32 %v813_v33, %v798_v31 }
 0x1b0   :  { %v817_v36 = vmul.f32 %v815_v34, %v815_v34  ;;  %v816_v37 = vmul.f32 0.00048828125, %v814_v35 }
 0x1b2   :  { %v818_v38 = vsub.f32 %v816_v37, %v817_v36 }
 0x1b4   :  { %v819_v39 = vmax.f32 %v818_v38, 0.0 }
 0x1b6   :  { %v821_v40 = vadd.f32 1e-05, %v819_v39 }
 0x1b8   :  { %1142 = vrsqrt.f32 %v821_v40 }
 0x1c2   :  { %v1143_v46 = vpop.eup %1142 }
 0x1c3   :  { %v823_v47 = vmul.f32 %v1143_v46, %v820_v43 }
 0x1c5   :  { %829 = vperm.xlu0 %1044, %v823_v47   ;;  %v825_v49 = vmul.f32 %v823_v47, %v815_v34 }
 0x1c7   :  { %v826_v50 = vsub.f32 %v824_v48, %v825_v49 }
 0x1c9   :  { %838 = vperm.xlu1 %1045, %v826_v50  }
 0x244   :  { %v830_v51 = vpop.permute.xlu0 %829 }
 0x245   :  { %v832_v52 = vmul.f32 %v830_v51, %v1392_v5  ;;  %v833_v53 = vmul.f32 %v830_v51, %v1398_v8  ;;  %v834_v54 = vmul.f32 %v830_v51, %v1394_v6  ;;  %v835_v55 = vmul.f32 %v830_v51, %v1400_v9 }
 0x246   :  { %v853_v56 = vmul.f32 %v830_v51, %v1412_v23  ;;  %v854_v57 = vmul.f32 %v830_v51, %v1418_v26  ;;  %v855_v58 = vmul.f32 %v830_v51, %v1414_v24  ;;  %v856_v61 = vmul.f32 %v830_v51, %v1420_v27 }
 0x247   :  { %v870_v0 = vmul.f32 %v830_v51, %v1432_v41  ;;  %v871_v1 = vmul.f32 %v830_v51, %v1438_v44  ;;  %v872_v5 = vmul.f32 %v830_v51, %v1434_v42  ;;  %v873_v8 = vmul.f32 %v830_v51, %v1440_v45 }
 0x248   :  { %v887_v6 = vmul.f32 %v830_v51, %v1452_v59  ;;  %v888_v2 = vmul.f32 %v830_v51, %v707_v62  ;;  %v889_v9 = vmul.f32 %v830_v51, %v1454_v60  ;;  %v890_v23 = vmul.f32 %v830_v51, %v1458_v63  ;;  %v839_v26 = vpop.permute.xlu1 %838 }
 0x249   :  { %v841_v3 = vadd.f32 %v839_v26, %v832_v52  ;;  %v842_v24 = vadd.f32 %v839_v26, %v833_v53  ;;  %v843_v4 = vadd.f32 %v839_v26, %v834_v54  ;;  %v844_v27 = vadd.f32 %v839_v26, %v835_v55 }
 0x24a   :  { %v857_v7 = vadd.f32 %v853_v56, %v839_v26  ;;  %v858_v41 = vadd.f32 %v854_v57, %v839_v26  ;;  %v859_v10 = vadd.f32 %v855_v58, %v839_v26  ;;  %v860_v44 = vadd.f32 %v856_v61, %v839_v26 }
 0x24b   :  { %v845_v11 = vmax.f32 %v841_v3, 0.0  ;;  %v846_v42 = vmax.f32 %v842_v24, 0.0  ;;  %v847_v12 = vmax.f32 %v843_v4, 0.0  ;;  %v848_v45 = vmax.f32 %v844_v27, 0.0 }
 0x24c   :  { %v861_v13 = vmax.f32 %v857_v7, 0.0  ;;  %v862_v59 = vmax.f32 %v858_v41, 0.0  ;;  %v863_v62 = vmax.f32 %v859_v10, 0.0  ;;  %v864_v14 = vmax.f32 %v860_v44, 0.0 }
 0x24d   :  { %849 = vst [vmem:[%s1540_s4] sm:$0xff] %v845_v11  ;;  %850 = vst [vmem:[%s1540_s4 + $0x8] sm:$0xff] %v846_v42  ;;  %v874_v60 = vadd.f32 %v870_v0, %v839_v26  ;;  %v875_v63 = vadd.f32 %v871_v1, %v839_v26  ;;  %v876_v15 = vadd.f32 %v872_v5, %v839_v26 }
 0x24e   :  { %851 = vst [vmem:[%s1540_s4 + $0x10] sm:$0xff] %v847_v12  ;;  %852 = vst [vmem:[%s1540_s4 + $0x18] sm:$0xff] %v848_v45  ;;  %v877_v16 = vadd.f32 %v873_v8, %v839_v26  ;;  %v891_v17 = vadd.f32 %v887_v6, %v839_v26  ;;  %v892_v18 = vadd.f32 %v888_v2, %v839_v26 }
 0x24f   :  { %1031 = vst [vmem:[%s1540_s4 + $0x20] sm:$0xff] %v861_v13  ;;  %1032 = vst [vmem:[%s1540_s4 + $0x28] sm:$0xff] %v862_v59  ;;  %v893_v19 = vadd.f32 %v889_v9, %v839_v26  ;;  %v894_v20 = vadd.f32 %v890_v23, %v839_v26  ;;  %v878_v21 = vmax.f32 %v874_v60, 0.0  ;;  %v879_v22 = vmax.f32 %v875_v63, 0.0 }
 0x250   :  { %1033 = vst [vmem:[%s1540_s4 + $0x30] sm:$0xff] %v863_v62  ;;  %1034 = vst [vmem:[%s1540_s4 + $0x38] sm:$0xff] %v864_v14  ;;  %v880_v25 = vmax.f32 %v876_v15, 0.0  ;;  %v881_v28 = vmax.f32 %v877_v16, 0.0  ;;  %v895_v29 = vmax.f32 %v891_v17, 0.0  ;;  %v896_v30 = vmax.f32 %v892_v18, 0.0 }
 0x251   :  { %v897_v31 = vmax.f32 %v893_v19, 0.0  ;;  %v898_v32 = vmax.f32 %v894_v20, 0.0  ;;  %1035 = vst [vmem:[%s1540_s4 + $0x40] sm:$0xff] %v878_v21  ;;  %1036 = vst [vmem:[%s1540_s4 + $0x48] sm:$0xff] %v879_v22 }
 0x252   :  { %1037 = vst [vmem:[%s1540_s4 + $0x50] sm:$0xff] %v880_v25  ;;  %1038 = vst [vmem:[%s1540_s4 + $0x58] sm:$0xff] %v881_v28 }
 0x253   :  { %1039 = vst [vmem:[%s1540_s4 + $0x60] sm:$0xff] %v895_v29  ;;  %1040 = vst [vmem:[%s1540_s4 + $0x68] sm:$0xff] %v896_v30 }
 0x254   :  { %1041 = vst [vmem:[%s1540_s4 + $0x70] sm:$0xff] %v897_v31  ;;  %1042 = vst [vmem:[%s1540_s4 + $0x78] sm:$0xff] %v898_v32 }

// kernel: inner_generator_forward.9
= control target key start
LH: loop header
LB: loop body
LE: loop exit
PB: predicated region body
PF: predicated region fallthrough
CT: control target
= control target key end

     0   :  { %v2764_v3 = vmov 0   ;;  %vm211_vm0 = vcmask 261120   ;;  %s3386_s0 = inlined_call_operand.vmem [shape: bf16[4,32,2048], index: 0, kind: input, shape index: {}]   ;;  %s3387_s2 = inlined_call_operand.vmem [shape: f32[3,1], index: 2, kind: input, shape index: {}]   ;;  %s3388_s3 = inlined_call_operand.vmem [shape: f32[3,1], index: 3, kind: input, shape index: {}]   ;;  %s3389_s1 = inlined_call_operand.vmem [shape: bf16[4,3,32], index: 1, kind: input, shape index: {}]   ;;  %s3390_s4 = inlined_call_operand.vmem [shape: f32[4,3,2048], index: 4, kind: output, shape index: {}]  }
   0x1   :  { %v19_v0 = vld [vmem:[%s3386_s0] sm:$0xff]  ;;  %v20_v2 = vld [vmem:[%s3386_s0 + $0x8] sm:$0xff]  ;;  %247 = vmatprep.mubr.bf16.mxu0 %v2764_v3  ;;  %288 = vmatprep.mubr.bf16.mxu1 %v2764_v3  ;;  %v21_v15 = vld [vmem:[%s3386_s0 + $0x10] sm:$0xff] }
   0x2   :  { %v27_v1 = vld [vmem:[%s3386_s0 + $0x40] sm:$0xff]  ;;  %v28_v5 = vld [vmem:[%s3386_s0 + $0x48] sm:$0xff]  ;;  %v29_v16 = vld [vmem:[%s3386_s0 + $0x50] sm:$0xff] }
   0x3   :  { %v2353_v4 = vcombine.high %v19_v0, %v27_v1  ;;  %v2352_v6 = vcombine.low %v19_v0, %v27_v1  ;;  %v35_v7 = vld [vmem:[%s3386_s0 + $0x80] sm:$0xff]  ;;  %v2355_v9 = vcombine.high %v20_v2, %v28_v5  ;;  %v2354_v10 = vcombine.low %v20_v2, %v28_v5  ;;  %v36_v12 = vld [vmem:[%s3386_s0 + $0x88] sm:$0xff]  ;;  %v22_v17 = vld [vmem:[%s3386_s0 + $0x18] sm:$0xff] }
   0x4   :  { %v43_v8 = vld [vmem:[%s3386_s0 + $0xc0] sm:$0xff]  ;;  %v44_v13 = vld [vmem:[%s3386_s0 + $0xc8] sm:$0xff]  ;;  %v30_v19 = vld [vmem:[%s3386_s0 + $0x58] sm:$0xff]  ;;  %v2357_v21 = vcombine.high %v21_v15, %v29_v16  ;;  %v2356_v28 = vcombine.low %v21_v15, %v29_v16 }
   0x5   :  { %v2369_v11 = vcombine.high %v35_v7, %v43_v8  ;;  %215 = vmatprep.subr.bf16.mxu0 %v2353_v4  ;;  %v2371_v14 = vcombine.high %v36_v12, %v44_v13  ;;  %256 = vmatprep.subr.bf16.mxu1 %v2355_v9  ;;  %v2368_v18 = vcombine.low %v35_v7, %v43_v8  ;;  %v37_v23 = vld [vmem:[%s3386_s0 + $0x90] sm:$0xff]  ;;  %v38_v25 = vld [vmem:[%s3386_s0 + $0x98] sm:$0xff]  ;;  %v2843_v27 = vld [vmem:[%s3389_s1] sm:$0x3] }
   0x6   :  { %216 = vmatpush1.bf16.msra.mxu0 %v2352_v6  ;;  %257 = vmatpush1.bf16.msra.mxu1 %v2354_v10  ;;  %v2370_v20 = vcombine.low %v36_v12, %v44_v13  ;;  %v2359_v22 = vcombine.high %v22_v17, %v30_v19  ;;  %v45_v24 = vld [vmem:[%s3386_s0 + $0xd0] sm:$0xff]  ;;  %v46_v26 = vld [vmem:[%s3386_s0 + $0xd8] sm:$0xff]  ;;  %v2358_v29 = vcombine.low %v22_v17, %v30_v19  ;;  %v23_v32 = vld [vmem:[%s3386_s0 + $0x20] sm:$0xff] }
   0x7   :  { %217 = vmatprep.subr.bf16.mxu0 %v2369_v11  ;;  %258 = vmatprep.subr.bf16.mxu1 %v2371_v14  ;;  %v2373_v30 = vcombine.high %v37_v23, %v45_v24  ;;  %v2375_v31 = vcombine.high %v38_v25, %v46_v26  ;;  %v31_v33 = vld [vmem:[%s3386_s0 + $0x60] sm:$0xff]  ;;  %v24_v34 = vld [vmem:[%s3386_s0 + $0x28] sm:$0xff]  ;;  %v2372_v36 = vcombine.low %v37_v23, %v45_v24  ;;  %v25_v48 = vld [vmem:[%s3386_s0 + $0x30] sm:$0xff] }
   0x8   :  { %v32_v35 = vld [vmem:[%s3386_s0 + $0x68] sm:$0xff]  ;;  %v2374_v37 = vcombine.low %v38_v25, %v46_v26  ;;  %v2361_v38 = vcombine.high %v23_v32, %v31_v33  ;;  %v39_v40 = vld [vmem:[%s3386_s0 + $0xa0] sm:$0xff]  ;;  %v2360_v44 = vcombine.low %v23_v32, %v31_v33  ;;  %v33_v49 = vld [vmem:[%s3386_s0 + $0x70] sm:$0xff] }
   0x9   :  { %v2363_v39 = vcombine.high %v24_v34, %v32_v35  ;;  %v47_v41 = vld [vmem:[%s3386_s0 + $0xe0] sm:$0xff]  ;;  %v40_v42 = vld [vmem:[%s3386_s0 + $0xa8] sm:$0xff]  ;;  %v2362_v45 = vcombine.low %v24_v34, %v32_v35  ;;  %v26_v50 = vld [vmem:[%s3386_s0 + $0x38] sm:$0xff]  ;;  %v2365_v54 = vcombine.high %v25_v48, %v33_v49  ;;  %v2364_v60 = vcombine.low %v25_v48, %v33_v49 }
   0xa   :  { %218 = vmatpush1.bf16.msra.mxu0 %v2368_v18  ;;  %259 = vmatpush1.bf16.msra.mxu1 %v2370_v20  ;;  %v48_v43 = vld [vmem:[%s3386_s0 + $0xe8] sm:$0xff]  ;;  %v2377_v46 = vcombine.high %v39_v40, %v47_v41  ;;  %v34_v51 = vld [vmem:[%s3386_s0 + $0x78] sm:$0xff]  ;;  %v2376_v52 = vcombine.low %v39_v40, %v47_v41  ;;  %v41_v56 = vld [vmem:[%s3386_s0 + $0xb0] sm:$0xff] }
   0xb   :  { %297 = vmatprep.subr.bf16.mxu0 %v2357_v21  ;;  %338 = vmatprep.subr.bf16.mxu1 %v2359_v22  ;;  %v2379_v47 = vcombine.high %v40_v42, %v48_v43  ;;  %v2378_v53 = vcombine.low %v40_v42, %v48_v43  ;;  %v2367_v55 = vcombine.high %v26_v50, %v34_v51  ;;  %v49_v57 = vld [vmem:[%s3386_s0 + $0xf0] sm:$0xff]  ;;  %v42_v58 = vld [vmem:[%s3386_s0 + $0xb8] sm:$0xff]  ;;  %v2393_v0 = vld [vmem:[%s3386_s0 + $0x100] sm:$0xff] }
   0xc   :  { %v50_v59 = vld [vmem:[%s3386_s0 + $0xf8] sm:$0xff]  ;;  %v2366_v61 = vcombine.low %v26_v50, %v34_v51  ;;  %v2381_v62 = vcombine.high %v41_v56, %v49_v57  ;;  %v2401_v1 = vld [vmem:[%s3386_s0 + $0x140] sm:$0xff]  ;;  %v2394_v2 = vld [vmem:[%s3386_s0 + $0x108] sm:$0xff]  ;;  %v2380_v5 = vcombine.low %v41_v56, %v49_v57 }
   0xd   :  { %2384 = vmatmul.mubr.msk.bf16.vlgmr.msra.gmra.mrb[0].mxu0 %vm211_vm0, %v2843_v27  ;;  %2385 = vmatmul.mubr.msk.bf16.vlgmr.msra.gmra.mrb[0].mxu1 %vm211_vm0, %v2843_v27  ;;  %v2383_v63 = vcombine.high %v42_v58, %v50_v59  ;;  %v2402_v4 = vld [vmem:[%s3386_s0 + $0x148] sm:$0xff]  ;;  %v2382_v6 = vcombine.low %v42_v58, %v50_v59  ;;  %v2426_v7 = vcombine.high %v2393_v0, %v2401_v1  ;;  %v2409_v9 = vld [vmem:[%s3386_s0 + $0x180] sm:$0xff]  ;;  %v2395_v17 = vld [vmem:[%s3386_s0 + $0x110] sm:$0xff] }
   0xe   :  { %298 = vmatpush1.bf16.msra.mxu0 %v2356_v28  ;;  %339 = vmatpush1.bf16.msra.mxu1 %v2358_v29  ;;  %v2428_v8 = vcombine.high %v2394_v2, %v2402_v4  ;;  %v2417_v10 = vld [vmem:[%s3386_s0 + $0x1c0] sm:$0xff]  ;;  %v2410_v11 = vld [vmem:[%s3386_s0 + $0x188] sm:$0xff]  ;;  %v2425_v13 = vcombine.low %v2393_v0, %v2401_v1  ;;  %v2427_v14 = vcombine.low %v2394_v2, %v2402_v4  ;;  %v2403_v18 = vld [vmem:[%s3386_s0 + $0x150] sm:$0xff] }
   0xf   :  { %299 = vmatprep.subr.bf16.mxu0 %v2373_v30  ;;  %340 = vmatprep.subr.bf16.mxu1 %v2375_v31  ;;  %v2418_v12 = vld [vmem:[%s3386_s0 + $0x1c8] sm:$0xff]  ;;  %v2442_v15 = vcombine.high %v2409_v9, %v2417_v10  ;;  %v2396_v19 = vld [vmem:[%s3386_s0 + $0x118] sm:$0xff]  ;;  %v2441_v21 = vcombine.low %v2409_v9, %v2417_v10  ;;  %v2430_v23 = vcombine.high %v2395_v17, %v2403_v18  ;;  %v2411_v25 = vld [vmem:[%s3386_s0 + $0x190] sm:$0xff] }
  0x10   :  { %329 = vmatprep.mubr.bf16.mxu0 %v2764_v3  ;;  %370 = vmatprep.mubr.bf16.mxu1 %v2764_v3  ;;  %v2444_v16 = vcombine.high %v2410_v11, %v2418_v12  ;;  %v2404_v20 = vld [vmem:[%s3386_s0 + $0x158] sm:$0xff]  ;;  %v2443_v22 = vcombine.low %v2410_v11, %v2418_v12  ;;  %v2419_v26 = vld [vmem:[%s3386_s0 + $0x1d0] sm:$0xff]  ;;  %v2968_v29 = vld [vmem:[%s3389_s1 + $0x2] sm:$0x3]  ;;  %v2429_v30 = vcombine.low %v2395_v17, %v2403_v18 }
  0x11   :  { %v2432_v24 = vcombine.high %v2396_v19, %v2404_v20  ;;  %v2420_v28 = vld [vmem:[%s3386_s0 + $0x1d8] sm:$0xff]  ;;  %v2431_v31 = vcombine.low %v2396_v19, %v2404_v20  ;;  %v2446_v32 = vcombine.high %v2411_v25, %v2419_v26  ;;  %v2397_v34 = vld [vmem:[%s3386_s0 + $0x120] sm:$0xff]  ;;  %v2399_v50 = vld [vmem:[%s3386_s0 + $0x130] sm:$0xff] }
  0x12   :  { %300 = vmatpush1.bf16.msra.mxu0 %v2372_v36  ;;  %341 = vmatpush1.bf16.msra.mxu1 %v2374_v37  ;;  %v2405_v35 = vld [vmem:[%s3386_s0 + $0x160] sm:$0xff]  ;;  %v2398_v36 = vld [vmem:[%s3386_s0 + $0x128] sm:$0xff]  ;;  %v2407_v51 = vld [vmem:[%s3386_s0 + $0x170] sm:$0xff] }
  0x13   :  { %379 = vmatprep.subr.bf16.mxu0 %v2361_v38  ;;  %420 = vmatprep.subr.bf16.mxu1 %v2363_v39  ;;  %v2406_v37 = vld [vmem:[%s3386_s0 + $0x168] sm:$0xff]  ;;  %v2445_v38 = vcombine.low %v2411_v25, %v2419_v26  ;;  %v2434_v40 = vcombine.high %v2397_v34, %v2405_v35  ;;  %v2413_v42 = vld [vmem:[%s3386_s0 + $0x1a0] sm:$0xff]  ;;  %v2438_v56 = vcombine.high %v2399_v50, %v2407_v51  ;;  %v2415_v58 = vld [vmem:[%s3386_s0 + $0x1b0] sm:$0xff] }
  0x14   :  { %v2436_v41 = vcombine.high %v2398_v36, %v2406_v37  ;;  %v2421_v43 = vld [vmem:[%s3386_s0 + $0x1e0] sm:$0xff]  ;;  %v2423_v59 = vld [vmem:[%s3386_s0 + $0x1f0] sm:$0xff] }
  0x15   :  { %2386 = vmatmul.mubr.msk.bf16.vlgmr.msra.gmra.mrb[4].mxu0 %vm211_vm0, %v2843_v27  ;;  %2387 = vmatmul.mubr.msk.bf16.vlgmr.msra.gmra.mrb[4].mxu1 %vm211_vm0, %v2843_v27  ;;  %v2450_v48 = vcombine.high %v2413_v42, %v2421_v43  ;;  %v2454_v0 = vcombine.high %v2415_v58, %v2423_v59  ;;  %v2466_v2 = vld [vmem:[%s3386_s0 + $0x200] sm:$0xff]  ;;  %v2468_v19 = vld [vmem:[%s3386_s0 + $0x210] sm:$0xff] }
  0x16   :  { %380 = vmatpush1.bf16.msra.mxu0 %v2360_v44  ;;  %421 = vmatpush1.bf16.msra.mxu1 %v2362_v45  ;;  %v2414_v44 = vld [vmem:[%s3386_s0 + $0x1a8] sm:$0xff]  ;;  %v2474_v4 = vld [vmem:[%s3386_s0 + $0x240] sm:$0xff]  ;;  %v2476_v20 = vld [vmem:[%s3386_s0 + $0x250] sm:$0xff] }
  0x17   :  { %381 = vmatprep.subr.bf16.mxu0 %v2377_v46  ;;  %422 = vmatprep.subr.bf16.mxu1 %v2379_v47  ;;  %v2422_v45 = vld [vmem:[%s3386_s0 + $0x1e8] sm:$0xff]  ;;  %v2433_v46 = vcombine.low %v2397_v34, %v2405_v35  ;;  %v2435_v47 = vcombine.low %v2398_v36, %v2406_v37  ;;  %v2499_v9 = vcombine.high %v2466_v2, %v2474_v4  ;;  %v2482_v11 = vld [vmem:[%s3386_s0 + $0x280] sm:$0xff] }
  0x18   :  { %411 = vmatprep.mubr.bf16.mxu0 %v2764_v3  ;;  %452 = vmatprep.mubr.bf16.mxu1 %v2764_v3  ;;  %v2452_v49 = vcombine.high %v2414_v44, %v2422_v45  ;;  %v2490_v12 = vld [vmem:[%s3386_s0 + $0x2c0] sm:$0xff]  ;;  %v2503_v25 = vcombine.high %v2468_v19, %v2476_v20 }
  0x19   :  { %v2515_v17 = vcombine.high %v2482_v11, %v2490_v12  ;;  %v2470_v36 = vld [vmem:[%s3386_s0 + $0x220] sm:$0xff] }
  0x1a   :  { %382 = vmatpush1.bf16.msra.mxu0 %v2376_v52  ;;  %423 = vmatpush1.bf16.msra.mxu1 %v2378_v53  ;;  %v2400_v52 = vld [vmem:[%s3386_s0 + $0x138] sm:$0xff]  ;;  %v2478_v37 = vld [vmem:[%s3386_s0 + $0x260] sm:$0xff] }
  0x1b   :  { %461 = vmatprep.subr.bf16.mxu0 %v2365_v54  ;;  %502 = vmatprep.subr.bf16.mxu1 %v2367_v55  ;;  %v2408_v53 = vld [vmem:[%s3386_s0 + $0x178] sm:$0xff]  ;;  %v2449_v54 = vcombine.low %v2413_v42, %v2421_v43  ;;  %v2451_v55 = vcombine.low %v2414_v44, %v2422_v45  ;;  %v2507_v42 = vcombine.high %v2470_v36, %v2478_v37  ;;  %v2486_v44 = vld [vmem:[%s3386_s0 + $0x2a0] sm:$0xff] }
  0x1c   :  { %v2440_v57 = vcombine.high %v2400_v52, %v2408_v53  ;;  %v2494_v45 = vld [vmem:[%s3386_s0 + $0x2e0] sm:$0xff] }
  0x1d   :  { %2388 = vmatmul.mubr.msk.bf16.vlgmr.msra.gmra.mrb[8].mxu0 %vm211_vm0, %v2843_v27  ;;  %2389 = vmatmul.mubr.msk.bf16.vlgmr.msra.gmra.mrb[8].mxu1 %vm211_vm0, %v2843_v27 }
  0x1e   :  { %462 = vmatpush1.bf16.msra.mxu0 %v2364_v60  ;;  %503 = vmatpush1.bf16.msra.mxu1 %v2366_v61  ;;  %v2416_v60 = vld [vmem:[%s3386_s0 + $0x1b8] sm:$0xff] }
  0x1f   :  { %463 = vmatprep.subr.bf16.mxu0 %v2381_v62  ;;  %504 = vmatprep.subr.bf16.mxu1 %v2383_v63  ;;  %v2424_v61 = vld [vmem:[%s3386_s0 + $0x1f8] sm:$0xff]  ;;  %v2437_v62 = vcombine.low %v2399_v50, %v2407_v51  ;;  %v2439_v63 = vcombine.low %v2400_v52, %v2408_v53  ;;  %v2523_v50 = vcombine.high %v2486_v44, %v2494_v45  ;;  %v2472_v52 = vld [vmem:[%s3386_s0 + $0x230] sm:$0xff] }
  0x20   :  { %493 = vmatprep.mubr.bf16.mxu0 %v2764_v3  ;;  %534 = vmatprep.mubr.bf16.mxu1 %v2764_v3  ;;  %v2456_v1 = vcombine.high %v2416_v60, %v2424_v61  ;;  %v2480_v53 = vld [vmem:[%s3386_s0 + $0x270] sm:$0xff] }
  0x22   :  { %464 = vmatpush1.bf16.msra.mxu0 %v2380_v5  ;;  %505 = vmatpush1.bf16.msra.mxu1 %v2382_v6  ;;  %v2467_v5 = vld [vmem:[%s3386_s0 + $0x208] sm:$0xff] }
  0x23   :  { %741 = vmatprep.subr.bf16.mxu0 %v2426_v7  ;;  %782 = vmatprep.subr.bf16.mxu1 %v2428_v8  ;;  %v2475_v6 = vld [vmem:[%s3386_s0 + $0x248] sm:$0xff]  ;;  %v2453_v7 = vcombine.low %v2415_v58, %v2423_v59  ;;  %v2455_v8 = vcombine.low %v2416_v60, %v2424_v61  ;;  %v2511_v58 = vcombine.high %v2472_v52, %v2480_v53  ;;  %v2488_v60 = vld [vmem:[%s3386_s0 + $0x2b0] sm:$0xff] }
  0x24   :  { %v2501_v10 = vcombine.high %v2467_v5, %v2475_v6  ;;  %v2496_v61 = vld [vmem:[%s3386_s0 + $0x2f0] sm:$0xff] }
  0x25   :  { %2390 = vmatmul.mubr.msk.bf16.vlgmr.msra.gmra.mrb[12].mxu0 %vm211_vm0, %v2843_v27  ;;  %2391 = vmatmul.mubr.msk.bf16.vlgmr.msra.gmra.mrb[12].mxu1 %vm211_vm0, %v2843_v27  ;;  %v2412_v27 = vld [vmem:[%s3386_s0 + $0x198] sm:$0xff] }
  0x26   :  { %742 = vmatpush1.bf16.msra.mxu0 %v2425_v13  ;;  %783 = vmatpush1.bf16.msra.mxu1 %v2427_v14  ;;  %v2448_v33 = vcombine.high %v2412_v27, %v2420_v28  ;;  %v2447_v39 = vcombine.low %v2412_v27, %v2420_v28  ;;  %v2483_v13 = vld [vmem:[%s3386_s0 + $0x288] sm:$0xff]  ;;  %v2484_v27 = vld [vmem:[%s3386_s0 + $0x290] sm:$0xff] }
  0x27   :  { %743 = vmatprep.subr.bf16.mxu0 %v2442_v15  ;;  %784 = vmatprep.subr.bf16.mxu1 %v2444_v16  ;;  %v2491_v14 = vld [vmem:[%s3386_s0 + $0x2c8] sm:$0xff]  ;;  %v2498_v15 = vcombine.low %v2466_v2, %v2474_v4  ;;  %v2500_v16 = vcombine.low %v2467_v5, %v2475_v6  ;;  %v2492_v28 = vld [vmem:[%s3386_s0 + $0x2d0] sm:$0xff]  ;;  %v2527_v2 = vcombine.high %v2488_v60, %v2496_v61  ;;  %v2539_v5 = vld [vmem:[%s3386_s0 + $0x300] sm:$0xff] }
  0x28   :  { %773 = vmatprep.mubr.bf16.mxu0 %v2764_v3  ;;  %814 = vmatprep.mubr.bf16.mxu1 %v2764_v3  ;;  %v2517_v18 = vcombine.high %v2483_v13, %v2491_v14  ;;  %v2519_v34 = vcombine.high %v2484_v27, %v2492_v28  ;;  %v2547_v6 = vld [vmem:[%s3386_s0 + $0x340] sm:$0xff] }
  0x2a   :  { %744 = vmatpush1.bf16.msra.mxu0 %v2441_v21  ;;  %785 = vmatpush1.bf16.msra.mxu1 %v2443_v22  ;;  %v2469_v21 = vld [vmem:[%s3386_s0 + $0x218] sm:$0xff] }
  0x2b   :  { %823 = vmatprep.subr.bf16.mxu0 %v2430_v23  ;;  %864 = vmatprep.subr.bf16.mxu1 %v2432_v24  ;;  %v2477_v22 = vld [vmem:[%s3386_s0 + $0x258] sm:$0xff]  ;;  %v2514_v23 = vcombine.low %v2482_v11, %v2490_v12  ;;  %v2516_v24 = vcombine.low %v2483_v13, %v2491_v14  ;;  %v2572_v11 = vcombine.high %v2539_v5, %v2547_v6  ;;  %v2555_v13 = vld [vmem:[%s3386_s0 + $0x380] sm:$0xff] }
  0x2c   :  { %v2505_v26 = vcombine.high %v2469_v21, %v2477_v22  ;;  %v2563_v14 = vld [vmem:[%s3386_s0 + $0x3c0] sm:$0xff] }
  0x2d   :  { %2457 = vmatmul.mubr.msk.bf16.vlgmr.msra.gmra.mrb[16].mxu0 %vm211_vm0, %v2968_v29  ;;  %2458 = vmatmul.mubr.msk.bf16.vlgmr.msra.gmra.mrb[16].mxu1 %vm211_vm0, %v2968_v29 }
  0x2e   :  { %824 = vmatpush1.bf16.msra.mxu0 %v2429_v30  ;;  %865 = vmatpush1.bf16.msra.mxu1 %v2431_v31  ;;  %v2493_v30 = vld [vmem:[%s3386_s0 + $0x2d8] sm:$0xff]  ;;  %v3093_v31 = vld [vmem:[%s3389_s1 + $0x4] sm:$0x3] }
  0x2f   :  { %825 = vmatprep.subr.bf16.mxu0 %v2446_v32  ;;  %866 = vmatprep.subr.bf16.mxu1 %v2448_v33  ;;  %v2502_v32 = vcombine.low %v2468_v19, %v2476_v20  ;;  %v2504_v33 = vcombine.low %v2469_v21, %v2477_v22  ;;  %v2588_v19 = vcombine.high %v2555_v13, %v2563_v14  ;;  %v2541_v21 = vld [vmem:[%s3386_s0 + $0x310] sm:$0xff] }
  0x30   :  { %855 = vmatprep.mubr.bf16.mxu0 %v2764_v3  ;;  %896 = vmatprep.mubr.bf16.mxu1 %v2764_v3  ;;  %v2549_v22 = vld [vmem:[%s3386_s0 + $0x350] sm:$0xff] }
  0x32   :  { %826 = vmatpush1.bf16.msra.mxu0 %v2445_v38  ;;  %867 = vmatpush1.bf16.msra.mxu1 %v2447_v39  ;;  %v2471_v38 = vld [vmem:[%s3386_s0 + $0x228] sm:$0xff] }
  0x33   :  { %905 = vmatprep.subr.bf16.mxu0 %v2434_v40  ;;  %946 = vmatprep.subr.bf16.mxu1 %v2436_v41  ;;  %v2479_v39 = vld [vmem:[%s3386_s0 + $0x268] sm:$0xff]  ;;  %v2518_v40 = vcombine.low %v2484_v27, %v2492_v28  ;;  %v2576_v27 = vcombine.high %v2541_v21, %v2549_v22 }
  0x34   :  { %v2509_v43 = vcombine.high %v2471_v38, %v2479_v39 }
  0x35   :  { %2459 = vmatmul.mubr.msk.bf16.vlgmr.msra.gmra.mrb[20].mxu0 %vm211_vm0, %v2968_v29  ;;  %2460 = vmatmul.mubr.msk.bf16.vlgmr.msra.gmra.mrb[20].mxu1 %vm211_vm0, %v2968_v29 }
  0x36   :  { %906 = vmatpush1.bf16.msra.mxu0 %v2433_v46  ;;  %947 = vmatpush1.bf16.msra.mxu1 %v2435_v47  ;;  %v2487_v46 = vld [vmem:[%s3386_s0 + $0x2a8] sm:$0xff] }
  0x37   :  { %907 = vmatprep.subr.bf16.mxu0 %v2450_v48  ;;  %948 = vmatprep.subr.bf16.mxu1 %v2452_v49  ;;  %v2495_v47 = vld [vmem:[%s3386_s0 + $0x2e8] sm:$0xff]  ;;  %v2506_v48 = vcombine.low %v2470_v36, %v2478_v37  ;;  %v2508_v49 = vcombine.low %v2471_v38, %v2479_v39  ;;  %v2543_v38 = vld [vmem:[%s3386_s0 + $0x320] sm:$0xff] }
  0x38   :  { %937 = vmatprep.mubr.bf16.mxu0 %v2764_v3  ;;  %978 = vmatprep.mubr.bf16.mxu1 %v2764_v3  ;;  %v2525_v51 = vcombine.high %v2487_v46, %v2495_v47  ;;  %v2551_v39 = vld [vmem:[%s3386_s0 + $0x360] sm:$0xff] }
  0x3a   :  { %908 = vmatpush1.bf16.msra.mxu0 %v2449_v54  ;;  %949 = vmatpush1.bf16.msra.mxu1 %v2451_v55  ;;  %v2473_v54 = vld [vmem:[%s3386_s0 + $0x238] sm:$0xff] }
  0x3b   :  { %987 = vmatprep.subr.bf16.mxu0 %v2438_v56  ;;  %1028 = vmatprep.subr.bf16.mxu1 %v2440_v57  ;;  %v2481_v55 = vld [vmem:[%s3386_s0 + $0x278] sm:$0xff]  ;;  %v2522_v56 = vcombine.low %v2486_v44, %v2494_v45  ;;  %v2524_v57 = vcombine.low %v2487_v46, %v2495_v47  ;;  %v2580_v44 = vcombine.high %v2543_v38, %v2551_v39  ;;  %v2559_v46 = vld [vmem:[%s3386_s0 + $0x3a0] sm:$0xff] }
  0x3c   :  { %v2513_v59 = vcombine.high %v2473_v54, %v2481_v55  ;;  %v2567_v47 = vld [vmem:[%s3386_s0 + $0x3e0] sm:$0xff] }
  0x3d   :  { %2461 = vmatmul.mubr.msk.bf16.vlgmr.msra.gmra.mrb[24].mxu0 %vm211_vm0, %v2968_v29  ;;  %2462 = vmatmul.mubr.msk.bf16.vlgmr.msra.gmra.mrb[24].mxu1 %vm211_vm0, %v2968_v29 }
  0x3e   :  { %988 = vmatpush1.bf16.msra.mxu0 %v2437_v62  ;;  %1029 = vmatpush1.bf16.msra.mxu1 %v2439_v63  ;;  %v2489_v62 = vld [vmem:[%s3386_s0 + $0x2b8] sm:$0xff] }
  0x3f   :  { %989 = vmatprep.subr.bf16.mxu0 %v2454_v0  ;;  %1030 = vmatprep.subr.bf16.mxu1 %v2456_v1  ;;  %v2497_v63 = vld [vmem:[%s3386_s0 + $0x2f8] sm:$0xff]  ;;  %v2510_v0 = vcombine.low %v2472_v52, %v2480_v53  ;;  %v2512_v1 = vcombine.low %v2473_v54, %v2481_v55  ;;  %v2596_v52 = vcombine.high %v2559_v46, %v2567_v47  ;;  %v2545_v54 = vld [vmem:[%s3386_s0 + $0x330] sm:$0xff] }
  0x40   :  { %1019 = vmatprep.mubr.bf16.mxu0 %v2764_v3  ;;  %1060 = vmatprep.mubr.bf16.mxu1 %v2764_v3  ;;  %v2529_v4 = vcombine.high %v2489_v62, %v2497_v63  ;;  %v2553_v55 = vld [vmem:[%s3386_s0 + $0x370] sm:$0xff] }
  0x42   :  { %990 = vmatpush1.bf16.msra.mxu0 %v2453_v7  ;;  %1031 = vmatpush1.bf16.msra.mxu1 %v2455_v8  ;;  %v2540_v7 = vld [vmem:[%s3386_s0 + $0x308] sm:$0xff] }
  0x43   :  { %1267 = vmatprep.subr.bf16.mxu0 %v2499_v9  ;;  %1308 = vmatprep.subr.bf16.mxu1 %v2501_v10  ;;  %v2548_v8 = vld [vmem:[%s3386_s0 + $0x348] sm:$0xff]  ;;  %v2526_v9 = vcombine.low %v2488_v60, %v2496_v61  ;;  %v2528_v10 = vcombine.low %v2489_v62, %v2497_v63  ;;  %v2584_v60 = vcombine.high %v2545_v54, %v2553_v55  ;;  %v2561_v62 = vld [vmem:[%s3386_s0 + $0x3b0] sm:$0xff] }
  0x44   :  { %v2574_v12 = vcombine.high %v2540_v7, %v2548_v8  ;;  %v2569_v63 = vld [vmem:[%s3386_s0 + $0x3f0] sm:$0xff] }
  0x45   :  { %2463 = vmatmul.mubr.msk.bf16.vlgmr.msra.gmra.mrb[28].mxu0 %vm211_vm0, %v2968_v29  ;;  %2464 = vmatmul.mubr.msk.bf16.vlgmr.msra.gmra.mrb[28].mxu1 %vm211_vm0, %v2968_v29  ;;  %v2485_v29 = vld [vmem:[%s3386_s0 + $0x298] sm:$0xff] }
  0x46   :  { %1268 = vmatpush1.bf16.msra.mxu0 %v2498_v15  ;;  %1309 = vmatpush1.bf16.msra.mxu1 %v2500_v16  ;;  %v2521_v35 = vcombine.high %v2485_v29, %v2493_v30  ;;  %v2520_v41 = vcombine.low %v2485_v29, %v2493_v30  ;;  %v2556_v15 = vld [vmem:[%s3386_s0 + $0x388] sm:$0xff]  ;;  %v2557_v29 = vld [vmem:[%s3386_s0 + $0x390] sm:$0xff] }
  0x47   :  { %1269 = vmatprep.subr.bf16.mxu0 %v2515_v17  ;;  %1310 = vmatprep.subr.bf16.mxu1 %v2517_v18  ;;  %v2564_v16 = vld [vmem:[%s3386_s0 + $0x3c8] sm:$0xff]  ;;  %v2571_v17 = vcombine.low %v2539_v5, %v2547_v6  ;;  %v2573_v18 = vcombine.low %v2540_v7, %v2548_v8  ;;  %v2565_v30 = vld [vmem:[%s3386_s0 + $0x3d0] sm:$0xff]  ;;  %v2600_v5 = vcombine.high %v2561_v62, %v2569_v63 }
  0x48   :  { %1299 = vmatprep.mubr.bf16.mxu0 %v2764_v3  ;;  %1340 = vmatprep.mubr.bf16.mxu1 %v2764_v3  ;;  %v2590_v20 = vcombine.high %v2556_v15, %v2564_v16  ;;  %v2592_v36 = vcombine.high %v2557_v29, %v2565_v30  ;;  %v2599_v7 = vcombine.low %v2561_v62, %v2569_v63 }
  0x4a   :  { %1270 = vmatpush1.bf16.msra.mxu0 %v2514_v23  ;;  %1311 = vmatpush1.bf16.msra.mxu1 %v2516_v24  ;;  %v2542_v23 = vld [vmem:[%s3386_s0 + $0x318] sm:$0xff] }
  0x4b   :  { %1349 = vmatprep.subr.bf16.mxu0 %v2503_v25  ;;  %1390 = vmatprep.subr.bf16.mxu1 %v2505_v26  ;;  %v2550_v24 = vld [vmem:[%s3386_s0 + $0x358] sm:$0xff]  ;;  %v2587_v25 = vcombine.low %v2555_v13, %v2563_v14  ;;  %v2589_v26 = vcombine.low %v2556_v15, %v2564_v16 }
  0x4c   :  { %v2578_v28 = vcombine.high %v2542_v23, %v2550_v24 }
  0x4d   :  { %2530 = vmatmul.mubr.msk.bf16.vlgmr.msra.gmra.mrb[32].mxu0 %vm211_vm0, %v3093_v31  ;;  %2531 = vmatmul.mubr.msk.bf16.vlgmr.msra.gmra.mrb[32].mxu1 %vm211_vm0, %v3093_v31 }
  0x4e   :  { %1350 = vmatpush1.bf16.msra.mxu0 %v2502_v32  ;;  %1391 = vmatpush1.bf16.msra.mxu1 %v2504_v33  ;;  %v2566_v32 = vld [vmem:[%s3386_s0 + $0x3d8] sm:$0xff]  ;;  %v3218_v33 = vld [vmem:[%s3389_s1 + $0x6] sm:$0x3] }
  0x4f   :  { %1351 = vmatprep.subr.bf16.mxu0 %v2519_v34  ;;  %1392 = vmatprep.subr.bf16.mxu1 %v2521_v35  ;;  %v2575_v34 = vcombine.low %v2541_v21, %v2549_v22  ;;  %v2577_v35 = vcombine.low %v2542_v23, %v2550_v24 }
  0x50   :  { %1381 = vmatprep.mubr.bf16.mxu0 %v2764_v3  ;;  %1422 = vmatprep.mubr.bf16.mxu1 %v2764_v3 }
  0x52   :  { %1352 = vmatpush1.bf16.msra.mxu0 %v2518_v40  ;;  %1393 = vmatpush1.bf16.msra.mxu1 %v2520_v41  ;;  %v2544_v40 = vld [vmem:[%s3386_s0 + $0x328] sm:$0xff] }
  0x53   :  { %1431 = vmatprep.subr.bf16.mxu0 %v2507_v42  ;;  %1472 = vmatprep.subr.bf16.mxu1 %v2509_v43  ;;  %v2552_v41 = vld [vmem:[%s3386_s0 + $0x368] sm:$0xff]  ;;  %v2591_v42 = vcombine.low %v2557_v29, %v2565_v30 }
  0x54   :  { %v2582_v45 = vcombine.high %v2544_v40, %v2552_v41 }
  0x55   :  { %2532 = vmatmul.mubr.msk.bf16.vlgmr.msra.gmra.mrb[36].mxu0 %vm211_vm0, %v3093_v31  ;;  %2533 = vmatmul.mubr.msk.bf16.vlgmr.msra.gmra.mrb[36].mxu1 %vm211_vm0, %v3093_v31 }
  0x56   :  { %1432 = vmatpush1.bf16.msra.mxu0 %v2506_v48  ;;  %1473 = vmatpush1.bf16.msra.mxu1 %v2508_v49  ;;  %v2560_v48 = vld [vmem:[%s3386_s0 + $0x3a8] sm:$0xff] }
  0x57   :  { %1433 = vmatprep.subr.bf16.mxu0 %v2523_v50  ;;  %1474 = vmatprep.subr.bf16.mxu1 %v2525_v51  ;;  %v2568_v49 = vld [vmem:[%s3386_s0 + $0x3e8] sm:$0xff]  ;;  %v2579_v50 = vcombine.low %v2543_v38, %v2551_v39  ;;  %v2581_v51 = vcombine.low %v2544_v40, %v2552_v41 }
  0x58   :  { %1463 = vmatprep.mubr.bf16.mxu0 %v2764_v3  ;;  %1504 = vmatprep.mubr.bf16.mxu1 %v2764_v3  ;;  %v2598_v53 = vcombine.high %v2560_v48, %v2568_v49 }
  0x5a   :  { %1434 = vmatpush1.bf16.msra.mxu0 %v2522_v56  ;;  %1475 = vmatpush1.bf16.msra.mxu1 %v2524_v57  ;;  %v2546_v56 = vld [vmem:[%s3386_s0 + $0x338] sm:$0xff] }
  0x5b   :  { %1513 = vmatprep.subr.bf16.mxu0 %v2511_v58  ;;  %1554 = vmatprep.subr.bf16.mxu1 %v2513_v59  ;;  %v2554_v57 = vld [vmem:[%s3386_s0 + $0x378] sm:$0xff]  ;;  %v2595_v58 = vcombine.low %v2559_v46, %v2567_v47  ;;  %v2597_v59 = vcombine.low %v2560_v48, %v2568_v49 }
  0x5c   :  { %v2586_v61 = vcombine.high %v2546_v56, %v2554_v57 }
  0x5d   :  { %2534 = vmatmul.mubr.msk.bf16.vlgmr.msra.gmra.mrb[40].mxu0 %vm211_vm0, %v3093_v31  ;;  %2535 = vmatmul.mubr.msk.bf16.vlgmr.msra.gmra.mrb[40].mxu1 %vm211_vm0, %v3093_v31 }
  0x5e   :  { %1514 = vmatpush1.bf16.msra.mxu0 %v2510_v0  ;;  %1555 = vmatpush1.bf16.msra.mxu1 %v2512_v1  ;;  %v2562_v0 = vld [vmem:[%s3386_s0 + $0x3b8] sm:$0xff] }
  0x5f   :  { %1515 = vmatprep.subr.bf16.mxu0 %v2527_v2  ;;  %1556 = vmatprep.subr.bf16.mxu1 %v2529_v4  ;;  %v2570_v1 = vld [vmem:[%s3386_s0 + $0x3f8] sm:$0xff]  ;;  %v2583_v2 = vcombine.low %v2545_v54, %v2553_v55  ;;  %v2585_v4 = vcombine.low %v2546_v56, %v2554_v57 }
  0x60   :  { %1545 = vmatprep.mubr.bf16.mxu0 %v2764_v3  ;;  %1586 = vmatprep.mubr.bf16.mxu1 %v2764_v3  ;;  %v2602_v6 = vcombine.high %v2562_v0, %v2570_v1  ;;  %v2601_v8 = vcombine.low %v2562_v0, %v2570_v1 }
  0x62   :  { %1516 = vmatpush1.bf16.msra.mxu0 %v2526_v9  ;;  %1557 = vmatpush1.bf16.msra.mxu1 %v2528_v10 }
  0x63   :  { %1793 = vmatprep.subr.bf16.mxu0 %v2572_v11  ;;  %1834 = vmatprep.subr.bf16.mxu1 %v2574_v12 }
  0x65   :  { %2536 = vmatmul.mubr.msk.bf16.vlgmr.msra.gmra.mrb[44].mxu0 %vm211_vm0, %v3093_v31  ;;  %2537 = vmatmul.mubr.msk.bf16.vlgmr.msra.gmra.mrb[44].mxu1 %vm211_vm0, %v3093_v31  ;;  %v2558_v31 = vld [vmem:[%s3386_s0 + $0x398] sm:$0xff] }
  0x66   :  { %1794 = vmatpush1.bf16.msra.mxu0 %v2571_v17  ;;  %1835 = vmatpush1.bf16.msra.mxu1 %v2573_v18  ;;  %v2594_v37 = vcombine.high %v2558_v31, %v2566_v32  ;;  %v2593_v43 = vcombine.low %v2558_v31, %v2566_v32 }
  0x67   :  { %1795 = vmatprep.subr.bf16.mxu0 %v2588_v19  ;;  %1836 = vmatprep.subr.bf16.mxu1 %v2590_v20 }
  0x68   :  { %1825 = vmatprep.mubr.bf16.mxu0 %v2764_v3  ;;  %1866 = vmatprep.mubr.bf16.mxu1 %v2764_v3 }
  0x6a   :  { %1796 = vmatpush1.bf16.msra.mxu0 %v2587_v25  ;;  %1837 = vmatpush1.bf16.msra.mxu1 %v2589_v26 }
  0x6b   :  { %1875 = vmatprep.subr.bf16.mxu0 %v2576_v27  ;;  %1916 = vmatprep.subr.bf16.mxu1 %v2578_v28 }
  0x6d   :  { %2603 = vmatmul.mubr.msk.bf16.vlgmr.msra.gmra.mrb[48].mxu0 %vm211_vm0, %v3218_v33  ;;  %2604 = vmatmul.mubr.msk.bf16.vlgmr.msra.gmra.mrb[48].mxu1 %vm211_vm0, %v3218_v33 }
  0x6e   :  { %1876 = vmatpush1.bf16.msra.mxu0 %v2575_v34  ;;  %1917 = vmatpush1.bf16.msra.mxu1 %v2577_v35 }
  0x6f   :  { %1877 = vmatprep.subr.bf16.mxu0 %v2592_v36  ;;  %1918 = vmatprep.subr.bf16.mxu1 %v2594_v37 }
  0x70   :  { %1907 = vmatprep.mubr.bf16.mxu0 %v2764_v3  ;;  %1948 = vmatprep.mubr.bf16.mxu1 %v2764_v3 }
  0x72   :  { %1878 = vmatpush1.bf16.msra.mxu0 %v2591_v42  ;;  %1919 = vmatpush1.bf16.msra.mxu1 %v2593_v43 }
  0x73   :  { %1957 = vmatprep.subr.bf16.mxu0 %v2580_v44  ;;  %1998 = vmatprep.subr.bf16.mxu1 %v2582_v45 }
  0x75   :  { %2605 = vmatmul.mubr.msk.bf16.vlgmr.msra.gmra.mrb[52].mxu0 %vm211_vm0, %v3218_v33  ;;  %2606 = vmatmul.mubr.msk.bf16.vlgmr.msra.gmra.mrb[52].mxu1 %vm211_vm0, %v3218_v33 }
  0x76   :  { %1958 = vmatpush1.bf16.msra.mxu0 %v2579_v50  ;;  %1999 = vmatpush1.bf16.msra.mxu1 %v2581_v51 }
  0x77   :  { %1959 = vmatprep.subr.bf16.mxu0 %v2596_v52  ;;  %2000 = vmatprep.subr.bf16.mxu1 %v2598_v53 }
  0x78   :  { %1989 = vmatprep.mubr.bf16.mxu0 %v2764_v3  ;;  %2030 = vmatprep.mubr.bf16.mxu1 %v2764_v3 }
  0x7a   :  { %1960 = vmatpush1.bf16.msra.mxu0 %v2595_v58  ;;  %2001 = vmatpush1.bf16.msra.mxu1 %v2597_v59 }
  0x7b   :  { %2039 = vmatprep.subr.bf16.mxu0 %v2584_v60  ;;  %2080 = vmatprep.subr.bf16.mxu1 %v2586_v61 }
  0x7d   :  { %2607 = vmatmul.mubr.msk.bf16.vlgmr.msra.gmra.mrb[56].mxu0 %vm211_vm0, %v3218_v33  ;;  %2608 = vmatmul.mubr.msk.bf16.vlgmr.msra.gmra.mrb[56].mxu1 %vm211_vm0, %v3218_v33 }
  0x7e   :  { %2040 = vmatpush1.bf16.msra.mxu0 %v2583_v2  ;;  %2081 = vmatpush1.bf16.msra.mxu1 %v2585_v4 }
  0x7f   :  { %2041 = vmatprep.subr.bf16.mxu0 %v2600_v5  ;;  %2082 = vmatprep.subr.bf16.mxu1 %v2602_v6 }
  0x80   :  { %2071 = vmatprep.mubr.bf16.mxu0 %v2764_v3  ;;  %2112 = vmatprep.mubr.bf16.mxu1 %v2764_v3 }
  0x82   :  { %2042 = vmatpush1.bf16.msra.mxu0 %v2599_v7  ;;  %2083 = vmatpush1.bf16.msra.mxu1 %v2601_v8 }
  0x85   :  { %2609 = vmatmul.mubr.msk.bf16.vlgmr.msra.gmra.mrb[60].mxu0 %vm211_vm0, %v3218_v33  ;;  %2610 = vmatmul.mubr.msk.bf16.vlgmr.msra.gmra.mrb[60].mxu1 %vm211_vm0, %v3218_v33 }
  0xe0   :  { %v249_v9 = vpop.f32.mrb[0].mxu0  ;;  %v290_v10 = vpop.f32.mrb[0].mxu1 }
  0xe1   :  { %2636 = vtanh.f32 %v249_v9  ;;  %v251_v11 = vpop.f32.mrb[1].mxu0  ;;  %v292_v12 = vpop.f32.mrb[1].mxu1 }
  0xe2   :  { %2638 = vtanh.f32 %v290_v10  ;;  %v253_v13 = vpop.f32.mrb[2].mxu0  ;;  %v294_v14 = vpop.f32.mrb[2].mxu1 }
  0xe3   :  { %2640 = vtanh.f32 %v251_v11  ;;  %v254_v15 = vpop.f32.mrb[3].mxu0  ;;  %v295_v3 = vpop.f32.mrb[3].mxu1 }
  0xe4   :  { %2642 = vtanh.f32 %v292_v12 }
  0xe8   :  { %v331_v16 = vpop.f32.mrb[4].mxu0  ;;  %v372_v17 = vpop.f32.mrb[4].mxu1 }
  0xe9   :  { %2644 = vtanh.f32 %v331_v16  ;;  %v333_v18 = vpop.f32.mrb[5].mxu0  ;;  %v374_v19 = vpop.f32.mrb[5].mxu1 }
  0xea   :  { %2646 = vtanh.f32 %v372_v17  ;;  %v335_v20 = vpop.f32.mrb[6].mxu0  ;;  %v376_v22 = vpop.f32.mrb[6].mxu1 }
  0xeb   :  { %v2637_v21 = vpop.eup %2636  ;;  %2648 = vtanh.f32 %v333_v18  ;;  %v336_v23 = vpop.f32.mrb[7].mxu0 }
  0xec   :  { %v2639_v24 = vpop.eup %2638  ;;  %2650 = vtanh.f32 %v374_v19  ;;  %v377_v25 = vpop.f32.mrb[7].mxu1 }
  0xed   :  { %v2641_v26 = vpop.eup %2640 }
  0xee   :  { %v2643_v27 = vpop.eup %2642  ;;  %v2153_v28 = vcombine.low %v2637_v21, %v2641_v26 }
  0xef   :  { %v2154_v29 = vcombine.low %v2639_v24, %v2643_v27 }
  0xf0   :  { %2169 = vst [vmem:[%s3390_s4] sm:$0x77] %v2153_v28  ;;  %v413_v30 = vpop.f32.mrb[8].mxu0  ;;  %v454_v31 = vpop.f32.mrb[8].mxu1 }
  0xf1   :  { %2170 = vst [vmem:[%s3390_s4 + $0x8] sm:$0x77] %v2154_v29  ;;  %2652 = vtanh.f32 %v413_v30  ;;  %v415_v32 = vpop.f32.mrb[9].mxu0  ;;  %v456_v33 = vpop.f32.mrb[9].mxu1 }
  0xf2   :  { %2654 = vtanh.f32 %v454_v31  ;;  %v417_v34 = vpop.f32.mrb[10].mxu0  ;;  %v458_v36 = vpop.f32.mrb[10].mxu1 }
  0xf3   :  { %v2645_v35 = vpop.eup %2644  ;;  %2656 = vtanh.f32 %v415_v32  ;;  %v418_v37 = vpop.f32.mrb[11].mxu0 }
  0xf4   :  { %v2647_v38 = vpop.eup %2646  ;;  %2658 = vtanh.f32 %v456_v33  ;;  %v459_v39 = vpop.f32.mrb[11].mxu1 }
  0xf5   :  { %v2649_v40 = vpop.eup %2648 }
  0xf6   :  { %v2651_v41 = vpop.eup %2650  ;;  %v2155_v42 = vcombine.low %v2645_v35, %v2649_v40 }
  0xf7   :  { %v2156_v43 = vcombine.low %v2647_v38, %v2651_v41 }
  0xf8   :  { %2171 = vst [vmem:[%s3390_s4 + $0x10] sm:$0x77] %v2155_v42  ;;  %v495_v44 = vpop.f32.mrb[12].mxu0  ;;  %v536_v45 = vpop.f32.mrb[12].mxu1 }
  0xf9   :  { %2172 = vst [vmem:[%s3390_s4 + $0x18] sm:$0x77] %v2156_v43  ;;  %2660 = vtanh.f32 %v495_v44  ;;  %v497_v46 = vpop.f32.mrb[13].mxu0  ;;  %v538_v47 = vpop.f32.mrb[13].mxu1 }
  0xfa   :  { %2662 = vtanh.f32 %v536_v45  ;;  %v499_v48 = vpop.f32.mrb[14].mxu0  ;;  %v540_v50 = vpop.f32.mrb[14].mxu1 }
  0xfb   :  { %v2653_v49 = vpop.eup %2652  ;;  %2664 = vtanh.f32 %v497_v46  ;;  %v500_v51 = vpop.f32.mrb[15].mxu0 }
  0xfc   :  { %v2655_v52 = vpop.eup %2654  ;;  %2666 = vtanh.f32 %v538_v47  ;;  %v541_v53 = vpop.f32.mrb[15].mxu1 }
  0xfd   :  { %v2657_v54 = vpop.eup %2656 }
  0xfe   :  { %v2659_v55 = vpop.eup %2658  ;;  %v2157_v56 = vcombine.low %v2653_v49, %v2657_v54 }
  0xff   :  { %v2158_v57 = vcombine.low %v2655_v52, %v2659_v55 }
 0x100   :  { %2173 = vst [vmem:[%s3390_s4 + $0x20] sm:$0x77] %v2157_v56  ;;  %v775_v58 = vpop.f32.mrb[16].mxu0  ;;  %v816_v59 = vpop.f32.mrb[16].mxu1 }
 0x101   :  { %2174 = vst [vmem:[%s3390_s4 + $0x28] sm:$0x77] %v2158_v57  ;;  %2668 = vtanh.f32 %v775_v58  ;;  %v777_v60 = vpop.f32.mrb[17].mxu0  ;;  %v818_v61 = vpop.f32.mrb[17].mxu1 }
 0x102   :  { %2670 = vtanh.f32 %v816_v59  ;;  %v779_v62 = vpop.f32.mrb[18].mxu0  ;;  %v820_v0 = vpop.f32.mrb[18].mxu1 }
 0x103   :  { %v2661_v63 = vpop.eup %2660  ;;  %2672 = vtanh.f32 %v777_v60  ;;  %v780_v1 = vpop.f32.mrb[19].mxu0 }
 0x104   :  { %v2663_v2 = vpop.eup %2662  ;;  %2674 = vtanh.f32 %v818_v61  ;;  %v821_v4 = vpop.f32.mrb[19].mxu1 }
 0x105   :  { %v2665_v5 = vpop.eup %2664 }
 0x106   :  { %v2667_v6 = vpop.eup %2666  ;;  %v2159_v7 = vcombine.low %v2661_v63, %v2665_v5 }
 0x107   :  { %v2160_v8 = vcombine.low %v2663_v2, %v2667_v6 }
 0x108   :  { %2175 = vst [vmem:[%s3390_s4 + $0x30] sm:$0x77] %v2159_v7  ;;  %v857_v9 = vpop.f32.mrb[20].mxu0  ;;  %v898_v10 = vpop.f32.mrb[20].mxu1 }
 0x109   :  { %2176 = vst [vmem:[%s3390_s4 + $0x38] sm:$0x77] %v2160_v8  ;;  %2676 = vtanh.f32 %v857_v9  ;;  %v859_v11 = vpop.f32.mrb[21].mxu0  ;;  %v900_v12 = vpop.f32.mrb[21].mxu1 }
 0x10a   :  { %2678 = vtanh.f32 %v898_v10  ;;  %v861_v13 = vpop.f32.mrb[22].mxu0  ;;  %v902_v15 = vpop.f32.mrb[22].mxu1 }
 0x10b   :  { %v2669_v14 = vpop.eup %2668  ;;  %2680 = vtanh.f32 %v859_v11  ;;  %v862_v3 = vpop.f32.mrb[23].mxu0 }
 0x10c   :  { %v2671_v16 = vpop.eup %2670  ;;  %2682 = vtanh.f32 %v900_v12  ;;  %v903_v17 = vpop.f32.mrb[23].mxu1 }
 0x10d   :  { %v2673_v18 = vpop.eup %2672 }
 0x10e   :  { %v2675_v19 = vpop.eup %2674  ;;  %v2209_v20 = vcombine.low %v2669_v14, %v2673_v18 }
 0x10f   :  { %v2210_v21 = vcombine.low %v2671_v16, %v2675_v19 }
 0x110   :  { %2611 = vst [vmem:[%s3390_s4 + $0x40] sm:$0x77] %v2209_v20  ;;  %v939_v22 = vpop.f32.mrb[24].mxu0  ;;  %v980_v23 = vpop.f32.mrb[24].mxu1 }
 0x111   :  { %2612 = vst [vmem:[%s3390_s4 + $0x48] sm:$0x77] %v2210_v21  ;;  %2684 = vtanh.f32 %v939_v22  ;;  %v941_v24 = vpop.f32.mrb[25].mxu0  ;;  %v982_v25 = vpop.f32.mrb[25].mxu1 }
 0x112   :  { %2686 = vtanh.f32 %v980_v23  ;;  %v943_v26 = vpop.f32.mrb[26].mxu0  ;;  %v984_v28 = vpop.f32.mrb[26].mxu1 }
 0x113   :  { %v2677_v27 = vpop.eup %2676  ;;  %2688 = vtanh.f32 %v941_v24  ;;  %v944_v29 = vpop.f32.mrb[27].mxu0 }
 0x114   :  { %v2679_v30 = vpop.eup %2678  ;;  %2690 = vtanh.f32 %v982_v25  ;;  %v985_v31 = vpop.f32.mrb[27].mxu1 }
 0x115   :  { %v2681_v32 = vpop.eup %2680 }
 0x116   :  { %v2683_v33 = vpop.eup %2682  ;;  %v2211_v34 = vcombine.low %v2677_v27, %v2681_v32 }
 0x117   :  { %v2212_v35 = vcombine.low %v2679_v30, %v2683_v33 }
 0x118   :  { %2613 = vst [vmem:[%s3390_s4 + $0x50] sm:$0x77] %v2211_v34  ;;  %v1021_v36 = vpop.f32.mrb[28].mxu0  ;;  %v1062_v37 = vpop.f32.mrb[28].mxu1 }
 0x119   :  { %2614 = vst [vmem:[%s3390_s4 + $0x58] sm:$0x77] %v2212_v35  ;;  %2692 = vtanh.f32 %v1021_v36  ;;  %v1023_v38 = vpop.f32.mrb[29].mxu0  ;;  %v1064_v39 = vpop.f32.mrb[29].mxu1 }
 0x11a   :  { %2694 = vtanh.f32 %v1062_v37  ;;  %v1025_v40 = vpop.f32.mrb[30].mxu0  ;;  %v1066_v42 = vpop.f32.mrb[30].mxu1 }
 0x11b   :  { %v2685_v41 = vpop.eup %2684  ;;  %2696 = vtanh.f32 %v1023_v38  ;;  %v1026_v43 = vpop.f32.mrb[31].mxu0 }
 0x11c   :  { %v2687_v44 = vpop.eup %2686  ;;  %2698 = vtanh.f32 %v1064_v39  ;;  %v1067_v45 = vpop.f32.mrb[31].mxu1 }
 0x11d   :  { %v2689_v46 = vpop.eup %2688 }
 0x11e   :  { %v2691_v47 = vpop.eup %2690  ;;  %v2213_v48 = vcombine.low %v2685_v41, %v2689_v46 }
 0x11f   :  { %v2214_v49 = vcombine.low %v2687_v44, %v2691_v47 }
 0x120   :  { %2615 = vst [vmem:[%s3390_s4 + $0x60] sm:$0x77] %v2213_v48  ;;  %v1301_v50 = vpop.f32.mrb[32].mxu0  ;;  %v1342_v51 = vpop.f32.mrb[32].mxu1 }
 0x121   :  { %2616 = vst [vmem:[%s3390_s4 + $0x68] sm:$0x77] %v2214_v49  ;;  %2700 = vtanh.f32 %v1301_v50  ;;  %v1303_v52 = vpop.f32.mrb[33].mxu0  ;;  %v1344_v53 = vpop.f32.mrb[33].mxu1 }
 0x122   :  { %2702 = vtanh.f32 %v1342_v51  ;;  %v1305_v54 = vpop.f32.mrb[34].mxu0  ;;  %v1346_v56 = vpop.f32.mrb[34].mxu1 }
 0x123   :  { %v2693_v55 = vpop.eup %2692  ;;  %2704 = vtanh.f32 %v1303_v52  ;;  %v1306_v57 = vpop.f32.mrb[35].mxu0 }
 0x124   :  { %v2695_v58 = vpop.eup %2694  ;;  %2706 = vtanh.f32 %v1344_v53  ;;  %v1347_v59 = vpop.f32.mrb[35].mxu1 }
 0x125   :  { %v2697_v60 = vpop.eup %2696 }
 0x126   :  { %v2699_v61 = vpop.eup %2698  ;;  %v2215_v62 = vcombine.low %v2693_v55, %v2697_v60 }
 0x127   :  { %v2216_v63 = vcombine.low %v2695_v58, %v2699_v61 }
 0x128   :  { %2617 = vst [vmem:[%s3390_s4 + $0x70] sm:$0x77] %v2215_v62  ;;  %v1383_v0 = vpop.f32.mrb[36].mxu0  ;;  %v1424_v1 = vpop.f32.mrb[36].mxu1 }
 0x129   :  { %2618 = vst [vmem:[%s3390_s4 + $0x78] sm:$0x77] %v2216_v63  ;;  %2708 = vtanh.f32 %v1383_v0  ;;  %v1385_v2 = vpop.f32.mrb[37].mxu0  ;;  %v1426_v4 = vpop.f32.mrb[37].mxu1 }
 0x12a   :  { %2710 = vtanh.f32 %v1424_v1  ;;  %v1387_v5 = vpop.f32.mrb[38].mxu0  ;;  %v1428_v7 = vpop.f32.mrb[38].mxu1 }
 0x12b   :  { %v2701_v6 = vpop.eup %2700  ;;  %2712 = vtanh.f32 %v1385_v2  ;;  %v1388_v8 = vpop.f32.mrb[39].mxu0 }
 0x12c   :  { %v2703_v9 = vpop.eup %2702  ;;  %2714 = vtanh.f32 %v1426_v4  ;;  %v1429_v10 = vpop.f32.mrb[39].mxu1 }
 0x12d   :  { %v2705_v11 = vpop.eup %2704 }
 0x12e   :  { %v2707_v12 = vpop.eup %2706  ;;  %v2266_v13 = vcombine.low %v2701_v6, %v2705_v11 }
 0x12f   :  { %v2267_v14 = vcombine.low %v2703_v9, %v2707_v12 }
 0x130   :  { %2619 = vst [vmem:[%s3390_s4 + $0x80] sm:$0x77] %v2266_v13  ;;  %v1465_v15 = vpop.f32.mrb[40].mxu0  ;;  %v1506_v3 = vpop.f32.mrb[40].mxu1 }
 0x131   :  { %2620 = vst [vmem:[%s3390_s4 + $0x88] sm:$0x77] %v2267_v14  ;;  %2716 = vtanh.f32 %v1465_v15  ;;  %v1467_v16 = vpop.f32.mrb[41].mxu0  ;;  %v1508_v17 = vpop.f32.mrb[41].mxu1 }
 0x132   :  { %2718 = vtanh.f32 %v1506_v3  ;;  %v1469_v18 = vpop.f32.mrb[42].mxu0  ;;  %v1510_v20 = vpop.f32.mrb[42].mxu1 }
 0x133   :  { %v2709_v19 = vpop.eup %2708  ;;  %2720 = vtanh.f32 %v1467_v16  ;;  %v1470_v21 = vpop.f32.mrb[43].mxu0 }
 0x134   :  { %v2711_v22 = vpop.eup %2710  ;;  %2722 = vtanh.f32 %v1508_v17  ;;  %v1511_v23 = vpop.f32.mrb[43].mxu1 }
 0x135   :  { %v2713_v24 = vpop.eup %2712 }
 0x136   :  { %v2715_v25 = vpop.eup %2714  ;;  %v2268_v26 = vcombine.low %v2709_v19, %v2713_v24 }
 0x137   :  { %v2269_v27 = vcombine.low %v2711_v22, %v2715_v25 }
 0x138   :  { %2621 = vst [vmem:[%s3390_s4 + $0x90] sm:$0x77] %v2268_v26  ;;  %v1547_v28 = vpop.f32.mrb[44].mxu0  ;;  %v1588_v29 = vpop.f32.mrb[44].mxu1 }
 0x139   :  { %2622 = vst [vmem:[%s3390_s4 + $0x98] sm:$0x77] %v2269_v27  ;;  %2724 = vtanh.f32 %v1547_v28  ;;  %v1549_v30 = vpop.f32.mrb[45].mxu0  ;;  %v1590_v31 = vpop.f32.mrb[45].mxu1 }
 0x13a   :  { %2726 = vtanh.f32 %v1588_v29  ;;  %v1551_v32 = vpop.f32.mrb[46].mxu0  ;;  %v1592_v34 = vpop.f32.mrb[46].mxu1 }
 0x13b   :  { %v2717_v33 = vpop.eup %2716  ;;  %2728 = vtanh.f32 %v1549_v30  ;;  %v1552_v35 = vpop.f32.mrb[47].mxu0 }
 0x13c   :  { %v2719_v36 = vpop.eup %2718  ;;  %2730 = vtanh.f32 %v1590_v31  ;;  %v1593_v37 = vpop.f32.mrb[47].mxu1 }
 0x13d   :  { %v2721_v38 = vpop.eup %2720 }
 0x13e   :  { %v2723_v39 = vpop.eup %2722  ;;  %v2270_v40 = vcombine.low %v2717_v33, %v2721_v38 }
 0x13f   :  { %v2271_v41 = vcombine.low %v2719_v36, %v2723_v39 }
 0x140   :  { %2623 = vst [vmem:[%s3390_s4 + $0xa0] sm:$0x77] %v2270_v40  ;;  %v1827_v42 = vpop.f32.mrb[48].mxu0  ;;  %v1868_v43 = vpop.f32.mrb[48].mxu1 }
 0x141   :  { %2624 = vst [vmem:[%s3390_s4 + $0xa8] sm:$0x77] %v2271_v41  ;;  %2732 = vtanh.f32 %v1827_v42  ;;  %v1829_v44 = vpop.f32.mrb[49].mxu0  ;;  %v1870_v45 = vpop.f32.mrb[49].mxu1 }
 0x142   :  { %2734 = vtanh.f32 %v1868_v43  ;;  %v1831_v46 = vpop.f32.mrb[50].mxu0  ;;  %v1872_v48 = vpop.f32.mrb[50].mxu1 }
 0x143   :  { %v2725_v47 = vpop.eup %2724  ;;  %2736 = vtanh.f32 %v1829_v44  ;;  %v1832_v49 = vpop.f32.mrb[51].mxu0 }
 0x144   :  { %v2727_v50 = vpop.eup %2726  ;;  %2738 = vtanh.f32 %v1870_v45  ;;  %v1873_v51 = vpop.f32.mrb[51].mxu1 }
 0x145   :  { %v2729_v52 = vpop.eup %2728 }
 0x146   :  { %v2731_v53 = vpop.eup %2730  ;;  %v2272_v54 = vcombine.low %v2725_v47, %v2729_v52 }
 0x147   :  { %v2273_v55 = vcombine.low %v2727_v50, %v2731_v53 }
 0x148   :  { %2625 = vst [vmem:[%s3390_s4 + $0xb0] sm:$0x77] %v2272_v54  ;;  %v1909_v56 = vpop.f32.mrb[52].mxu0  ;;  %v1950_v57 = vpop.f32.mrb[52].mxu1 }
 0x149   :  { %2626 = vst [vmem:[%s3390_s4 + $0xb8] sm:$0x77] %v2273_v55  ;;  %2740 = vtanh.f32 %v1909_v56  ;;  %v1911_v58 = vpop.f32.mrb[53].mxu0  ;;  %v1952_v59 = vpop.f32.mrb[53].mxu1 }
 0x14a   :  { %2742 = vtanh.f32 %v1950_v57  ;;  %v1913_v60 = vpop.f32.mrb[54].mxu0  ;;  %v1954_v62 = vpop.f32.mrb[54].mxu1 }
 0x14b   :  { %v2733_v61 = vpop.eup %2732  ;;  %2744 = vtanh.f32 %v1911_v58  ;;  %v1914_v63 = vpop.f32.mrb[55].mxu0 }
 0x14c   :  { %v2735_v0 = vpop.eup %2734  ;;  %2746 = vtanh.f32 %v1952_v59  ;;  %v1955_v1 = vpop.f32.mrb[55].mxu1 }
 0x14d   :  { %v2737_v2 = vpop.eup %2736 }
 0x14e   :  { %v2739_v4 = vpop.eup %2738  ;;  %v2323_v5 = vcombine.low %v2733_v61, %v2737_v2 }
 0x14f   :  { %v2324_v6 = vcombine.low %v2735_v0, %v2739_v4 }
 0x150   :  { %2627 = vst [vmem:[%s3390_s4 + $0xc0] sm:$0x77] %v2323_v5  ;;  %v1991_v7 = vpop.f32.mrb[56].mxu0  ;;  %v2032_v8 = vpop.f32.mrb[56].mxu1 }
 0x151   :  { %2628 = vst [vmem:[%s3390_s4 + $0xc8] sm:$0x77] %v2324_v6  ;;  %2748 = vtanh.f32 %v1991_v7  ;;  %v1993_v9 = vpop.f32.mrb[57].mxu0  ;;  %v2034_v10 = vpop.f32.mrb[57].mxu1 }
 0x152   :  { %2750 = vtanh.f32 %v2032_v8  ;;  %v1995_v11 = vpop.f32.mrb[58].mxu0  ;;  %v2036_v13 = vpop.f32.mrb[58].mxu1 }
 0x153   :  { %v2741_v12 = vpop.eup %2740  ;;  %2752 = vtanh.f32 %v1993_v9  ;;  %v1996_v14 = vpop.f32.mrb[59].mxu0 }
 0x154   :  { %v2743_v15 = vpop.eup %2742  ;;  %2754 = vtanh.f32 %v2034_v10  ;;  %v2037_v3 = vpop.f32.mrb[59].mxu1 }
 0x155   :  { %v2745_v16 = vpop.eup %2744 }
 0x156   :  { %v2747_v17 = vpop.eup %2746  ;;  %v2325_v18 = vcombine.low %v2741_v12, %v2745_v16 }
 0x157   :  { %v2326_v19 = vcombine.low %v2743_v15, %v2747_v17 }
 0x158   :  { %2629 = vst [vmem:[%s3390_s4 + $0xd0] sm:$0x77] %v2325_v18  ;;  %v2073_v20 = vpop.f32.mrb[60].mxu0  ;;  %v2114_v21 = vpop.f32.mrb[60].mxu1 }
 0x159   :  { %2630 = vst [vmem:[%s3390_s4 + $0xd8] sm:$0x77] %v2326_v19  ;;  %2756 = vtanh.f32 %v2073_v20  ;;  %v2075_v22 = vpop.f32.mrb[61].mxu0  ;;  %v2116_v23 = vpop.f32.mrb[61].mxu1 }
 0x15a   :  { %2758 = vtanh.f32 %v2114_v21  ;;  %v2077_v24 = vpop.f32.mrb[62].mxu0  ;;  %v2118_v26 = vpop.f32.mrb[62].mxu1 }
 0x15b   :  { %v2749_v25 = vpop.eup %2748  ;;  %2760 = vtanh.f32 %v2075_v22  ;;  %v2078_v27 = vpop.f32.mrb[63].mxu0 }
 0x15c   :  { %v2751_v28 = vpop.eup %2750  ;;  %2762 = vtanh.f32 %v2116_v23  ;;  %v2119_v29 = vpop.f32.mrb[63].mxu1 }
 0x15d   :  { %v2753_v30 = vpop.eup %2752 }
 0x15e   :  { %v2755_v31 = vpop.eup %2754  ;;  %v2327_v32 = vcombine.low %v2749_v25, %v2753_v30 }
 0x15f   :  { %v2328_v33 = vcombine.low %v2751_v28, %v2755_v31 }
 0x160   :  { %2631 = vst [vmem:[%s3390_s4 + $0xe0] sm:$0x77] %v2327_v32 }
 0x161   :  { %2632 = vst [vmem:[%s3390_s4 + $0xe8] sm:$0x77] %v2328_v33 }
 0x163   :  { %v2757_v34 = vpop.eup %2756 }
 0x164   :  { %v2759_v35 = vpop.eup %2758 }
 0x165   :  { %v2761_v36 = vpop.eup %2760 }
 0x166   :  { %v2763_v37 = vpop.eup %2762  ;;  %v2329_v38 = vcombine.low %v2757_v34, %v2761_v36 }
 0x167   :  { %v2330_v39 = vcombine.low %v2759_v35, %v2763_v37 }
 0x168   :  { %2633 = vst [vmem:[%s3390_s4 + $0xf0] sm:$0x77] %v2329_v38 }
 0x169   :  { %2634 = vst [vmem:[%s3390_s4 + $0xf8] sm:$0x77] %v2330_v39 }

</bundles_post_ra>
